<compile_context>
chip_gen: v7x
topology: tpu7x:2x2x1
jax: 0.10.0
libtpu: 0.0.40
codegen_flags: <defaults>
</compile_context>

<pallas_src>
import functools

import jax
import jax.numpy as jnp
from jax import lax
from jax.experimental import pallas as pl
from jax.experimental.pallas import tpu as pltpu


def _bilinear_predictor_kernel(ori_ref, dst_ref, dis_ref,
                               q_ref, r_ref, w1f_ref, b1_ref, w2t_ref, b2_ref,
                               out_ref):
    """One batch tile per grid step; weights stay VMEM-resident across steps.

    ori: [TB, E]     dst: [TB, E]     dis: [TB, D]
    q  : [E, E*E]    (repeat pattern: q[k, i*E+j] = delta(k, i))
    r  : [E, E*E]    (tile   pattern: r[k, i*E+j] = delta(k, j))
    w1f: [E*E, E]    (w1f[i*E+j, o] = W1[o, i, j])
    b1 : [1, E]
    w2t: [D, E]      (w2t[j, i] = W2[0, i, j])
    b2 : [1, 1]
    out: [TB, 1]
    """
    hi = lax.Precision.HIGHEST

    ori = ori_ref[...]                        # [TB, E]
    dst = dst_ref[...]                        # [TB, E]
    dis = dis_ref[...]                        # [TB, D]

    # ---- first bilinear, all on the MXU (no reshapes / rank-3 tensors) ----
    # ori_rep[b, i*E+j] = ori[b, i]; dst_rep[b, i*E+j] = dst[b, j]
    ori_rep = jnp.dot(ori, q_ref[...], precision=hi,
                      preferred_element_type=jnp.float32)          # [TB, E*E]
    dst_rep = jnp.dot(dst, r_ref[...], precision=hi,
                      preferred_element_type=jnp.float32)          # [TB, E*E]
    p = ori_rep * dst_rep                                          # outer product (VPU)

    od = jnp.dot(p, w1f_ref[...], precision=hi,
                 preferred_element_type=jnp.float32) + b1_ref[...]  # [TB, E]
    od = jnp.maximum(od, 0.0)                                       # relu

    # ---- second bilinear (out_features == 1) ------------------------------
    # r2[b, i] = sum_j W2[0, i, j] * dis[b, j]  ==  dis @ W2[0].T   (MXU)
    r2 = jnp.dot(dis, w2t_ref[...], precision=hi,
                 preferred_element_type=jnp.float32)                # [TB, E]
    flow = jnp.sum(od * r2, axis=-1, keepdims=True) + b2_ref[...]   # [TB, 1]
    out_ref[...] = jnp.tanh(flow)


def prepare_params(w1, b1, w2, b2):
    """One-time weight / constant re-layout, hoisted out of the per-call path.

    w1: [E, E, E] (out, in1, in2) -> W1f [E*E, E] with W1f[i*E+j, o] = w1[o, i, j]
    w2: [1, E, D]                 -> W2t [D, E]   with W2t[j, i]     = w2[0, i, j]
    Q, R: 0/1 replication matrices for the lane-dense outer product.
    """
    E = w1.shape[0]
    eye = jnp.eye(E, dtype=jnp.float32)
    Q = jnp.repeat(eye, E, axis=1)               # [E, E*E], Q[k, i*E+j] = d(k,i)
    R = jnp.tile(eye, (1, E))                    # [E, E*E], R[k, i*E+j] = d(k,j)
    w1f = jnp.transpose(w1.reshape(E, E * E), (1, 0)).astype(jnp.float32)
    b1_2d = b1.reshape(1, E).astype(jnp.float32)
    w2t = jnp.transpose(w2[0], (1, 0)).astype(jnp.float32)
    b2_2d = b2.reshape(1, 1).astype(jnp.float32)
    return Q, R, w1f, b1_2d, w2t, b2_2d


@functools.partial(jax.jit, static_argnames=("tile_b",))
def bilinear_predictor_pallas(ori, dst, dis, params, *, tile_b=256):
    """ori/dst: [B, E], dis: [B, D], params from prepare_params() -> [B, 1]."""
    Q, R, w1f, b1_2d, w2t, b2_2d = params
    ori = ori.astype(jnp.float32)
    dst = dst.astype(jnp.float32)
    dis = dis.astype(jnp.float32)

    B, E = ori.shape
    D = dis.shape[1]
    EE = E * E

    # Batch tile: big enough to fill the MXU for large B, padded to the
    # 8-sublane granule when B is small.
    tb = tile_b if B >= tile_b else max(8, ((B + 7) // 8) * 8)
    bp = ((B + tb - 1) // tb) * tb
    if bp != B:
        pad = ((0, bp - B), (0, 0))
        ori = jnp.pad(ori, pad)
        dst = jnp.pad(dst, pad)
        dis = jnp.pad(dis, pad)

    out = pl.pallas_call(
        _bilinear_predictor_kernel,
        out_shape=jax.ShapeDtypeStruct((bp, 1), jnp.float32),
        grid=(bp // tb,),
        in_specs=[
            pl.BlockSpec((tb, E), lambda i: (i, 0)),      # ori tile
            pl.BlockSpec((tb, E), lambda i: (i, 0)),      # dst tile
            pl.BlockSpec((tb, D), lambda i: (i, 0)),      # dis tile
            pl.BlockSpec((E, EE), lambda i: (0, 0)),      # Q   (resident)
            pl.BlockSpec((E, EE), lambda i: (0, 0)),      # R   (resident)
            pl.BlockSpec((EE, E), lambda i: (0, 0)),      # W1f (resident)
            pl.BlockSpec((1, E), lambda i: (0, 0)),       # b1  (resident)
            pl.BlockSpec((D, E), lambda i: (0, 0)),       # W2t (resident)
            pl.BlockSpec((1, 1), lambda i: (0, 0)),       # b2  (resident)
        ],
        out_specs=pl.BlockSpec((tb, 1), lambda i: (i, 0)),
        compiler_params=pltpu.CompilerParams(
            dimension_semantics=("parallel",)),
    )(ori, dst, dis, Q, R, w1f, b1_2d, w2t, b2_2d)
    return out[:B]


def _reference(ori, dst, dis, w1, b1, w2, b2):
    """Pure-JAX reference mirroring torch.nn.Bilinear semantics."""
    hi = lax.Precision.HIGHEST
    od = jnp.einsum('bi,oij,bj->bo', ori, w1, dst, precision=hi) + b1
    od = jnp.maximum(od, 0.0)
    flow = jnp.einsum('bi,oij,bj->bo', od, w2, dis, precision=hi) + b2
    return jnp.tanh(flow)


if __name__ == "__main__":
    # config: node_embsize = 32, disProj_dim = 16
    B, E, D = 8, 32, 16

    key = jax.random.PRNGKey(0)
    k_ori, k_dst, k_dis, k_w1, k_b1, k_w2, k_b2 = jax.random.split(key, 7)

    ori = jax.random.normal(k_ori, (B, E), dtype=jnp.float32)
    dst = jax.random.normal(k_dst, (B, E), dtype=jnp.float32)
    dis = jax.random.normal(k_dis, (B, D), dtype=jnp.float32)

    # Deterministic parameter init (same shapes / uniform bound as nn.Bilinear).
    bound = 1.0 / (E ** 0.5)
    w1 = jax.random.uniform(k_w1, (E, E, E), jnp.float32, -bound, bound)
    b1 = jax.random.uniform(k_b1, (E,), jnp.float32, -bound, bound)
    w2 = jax.random.uniform(k_w2, (1, E, D), jnp.float32, -bound, bound)
    b2 = jax.random.uniform(k_b2, (1,), jnp.float32, -bound, bound)

    # Hoisted, one-time weight / constant re-layout.
    params = prepare_params(w1, b1, w2, b2)

    # Small batch (single grid step).
    out = jax.block_until_ready(bilinear_predictor_pallas(ori, dst, dis, params))
    ref = _reference(ori, dst, dis, w1, b1, w2, b2)
    assert out.shape == (B, 1), out.shape
    assert jnp.allclose(out, ref, atol=1e-3, rtol=1e-3), (out, ref)

    # Larger, non-multiple batch: exercises the batch grid + padding path.
    B2 = 300
    kk = jax.random.split(jax.random.PRNGKey(1), 3)
    ori2 = jax.random.normal(kk[0], (B2, E), dtype=jnp.float32)
    dst2 = jax.random.normal(kk[1], (B2, E), dtype=jnp.float32)
    dis2 = jax.random.normal(kk[2], (B2, D), dtype=jnp.float32)
    out2 = jax.block_until_ready(bilinear_predictor_pallas(ori2, dst2, dis2, params))
    ref2 = _reference(ori2, dst2, dis2, w1, b1, w2, b2)
    assert out2.shape == (B2, 1), out2.shape
    assert jnp.allclose(out2, ref2, atol=1e-3, rtol=1e-3), (out2, ref2)

    print("KERNEL_OK")
</pallas_src>

<mosaic_0001>
module attributes {stable_mosaic.version = 11 : i64} {
  func.func @_bilinear_predictor_kernel(%arg0: i32, %arg1: memref<8x32xf32, #tpu.memory_space<vmem>>, %arg2: memref<8x32xf32, #tpu.memory_space<vmem>>, %arg3: memref<8x16xf32, #tpu.memory_space<vmem>>, %arg4: memref<32x1024xf32, #tpu.memory_space<vmem>>, %arg5: memref<32x1024xf32, #tpu.memory_space<vmem>>, %arg6: memref<1024x32xf32, #tpu.memory_space<vmem>>, %arg7: memref<1x32xf32, #tpu.memory_space<vmem>>, %arg8: memref<16x32xf32, #tpu.memory_space<vmem>>, %arg9: memref<1x1xf32, #tpu.memory_space<vmem>>, %arg10: memref<8x1xf32, #tpu.memory_space<vmem>>) attributes {dimension_semantics = [#tpu.dimension_semantics<parallel>], iteration_bounds = array<i64: 1>, scalar_prefetch = 0 : i64, scratch_operands = 0 : i64, tpu.core_type = #tpu.core_type<tc>, window_params = [{transform_indices = @transform_0, window_bounds = array<i64: 8, 32>}, {transform_indices = @transform_1, window_bounds = array<i64: 8, 32>}, {transform_indices = @transform_2, window_bounds = array<i64: 8, 16>}, {pipeline_mode = #tpu.pipeline_mode<synchronous>, transform_indices = @transform_3, window_bounds = array<i64: 32, 1024>}, {pipeline_mode = #tpu.pipeline_mode<synchronous>, transform_indices = @transform_4, window_bounds = array<i64: 32, 1024>}, {pipeline_mode = #tpu.pipeline_mode<synchronous>, transform_indices = @transform_5, window_bounds = array<i64: 1024, 32>}, {pipeline_mode = #tpu.pipeline_mode<synchronous>, transform_indices = @transform_6, window_bounds = array<i64: 1, 32>}, {pipeline_mode = #tpu.pipeline_mode<synchronous>, transform_indices = @transform_7, window_bounds = array<i64: 16, 32>}, {pipeline_mode = #tpu.pipeline_mode<synchronous>, transform_indices = @transform_8, window_bounds = array<i64: 1, 1>}, {transform_indices = @transform_9, window_bounds = array<i64: 8, 1>}]} {
    %c0 = arith.constant 0 : index
    %c0_0 = arith.constant 0 : index
    %0 = vector.load %arg1[%c0, %c0_0] : memref<8x32xf32, #tpu.memory_space<vmem>>, vector<8x32xf32>
    %c0_1 = arith.constant 0 : index
    %c0_2 = arith.constant 0 : index
    %1 = vector.load %arg2[%c0_1, %c0_2] : memref<8x32xf32, #tpu.memory_space<vmem>>, vector<8x32xf32>
    %c0_3 = arith.constant 0 : index
    %c0_4 = arith.constant 0 : index
    %2 = vector.load %arg3[%c0_3, %c0_4] : memref<8x16xf32, #tpu.memory_space<vmem>>, vector<8x16xf32>
    %c0_5 = arith.constant 0 : index
    %c0_6 = arith.constant 0 : index
    %3 = vector.load %arg4[%c0_5, %c0_6] : memref<32x1024xf32, #tpu.memory_space<vmem>>, vector<32x1024xf32>
    %cst = arith.constant dense<0.000000e+00> : vector<8x1024xf32>
    %4 = tpu.matmul %0, %3, %cst {dimension_numbers = #tpu.dot_dimension_numbers<[1], [0], [0], [1], [0, 0, 1, 1], [], []>, precision = #tpu.contract_precision<fp32>} : vector<8x32xf32>, vector<32x1024xf32>, vector<8x1024xf32> -> vector<8x1024xf32>
    %c0_7 = arith.constant 0 : index
    %c0_8 = arith.constant 0 : index
    %5 = vector.load %arg5[%c0_7, %c0_8] : memref<32x1024xf32, #tpu.memory_space<vmem>>, vector<32x1024xf32>
    %cst_9 = arith.constant dense<0.000000e+00> : vector<8x1024xf32>
    %6 = tpu.matmul %1, %5, %cst_9 {dimension_numbers = #tpu.dot_dimension_numbers<[1], [0], [0], [1], [0, 0, 1, 1], [], []>, precision = #tpu.contract_precision<fp32>} : vector<8x32xf32>, vector<32x1024xf32>, vector<8x1024xf32> -> vector<8x1024xf32>
    %7 = arith.mulf %4, %6 : vector<8x1024xf32>
    %c0_10 = arith.constant 0 : index
    %c0_11 = arith.constant 0 : index
    %8 = vector.load %arg6[%c0_10, %c0_11] : memref<1024x32xf32, #tpu.memory_space<vmem>>, vector<1024x32xf32>
    %cst_12 = arith.constant dense<0.000000e+00> : vector<8x32xf32>
    %9 = tpu.matmul %7, %8, %cst_12 {dimension_numbers = #tpu.dot_dimension_numbers<[1], [0], [0], [1], [0, 0, 1, 1], [], []>, precision = #tpu.contract_precision<fp32>} : vector<8x1024xf32>, vector<1024x32xf32>, vector<8x32xf32> -> vector<8x32xf32>
    %c0_13 = arith.constant 0 : index
    %c0_14 = arith.constant 0 : index
    %10 = vector.load %arg7[%c0_13, %c0_14] : memref<1x32xf32, #tpu.memory_space<vmem>>, vector<1x32xf32>
    %11 = vector.broadcast %10 : vector<1x32xf32> to vector<8x32xf32>
    %12 = arith.addf %9, %11 : vector<8x32xf32>
    %cst_15 = arith.constant 0.000000e+00 : f32
    %13 = vector.broadcast %cst_15 : f32 to vector<8x32xf32>
    %14 = arith.maximumf %12, %13 : vector<8x32xf32>
    %c0_16 = arith.constant 0 : index
    %c0_17 = arith.constant 0 : index
    %15 = vector.load %arg8[%c0_16, %c0_17] : memref<16x32xf32, #tpu.memory_space<vmem>>, vector<16x32xf32>
    %cst_18 = arith.constant dense<0.000000e+00> : vector<8x32xf32>
    %16 = tpu.matmul %2, %15, %cst_18 {dimension_numbers = #tpu.dot_dimension_numbers<[1], [0], [0], [1], [0, 0, 1, 1], [], []>, precision = #tpu.contract_precision<fp32>} : vector<8x16xf32>, vector<16x32xf32>, vector<8x32xf32> -> vector<8x32xf32>
    %17 = arith.mulf %14, %16 : vector<8x32xf32>
    %cst_19 = arith.constant dense<0.000000e+00> : vector<8xf32>
    %18 = vector.multi_reduction <add>, %17, %cst_19 [1] : vector<8x32xf32> to vector<8xf32>
    %19 = vector.shape_cast %18 : vector<8xf32> to vector<8x1xf32>
    %c0_20 = arith.constant 0 : index
    %c0_21 = arith.constant 0 : index
    %20 = vector.load %arg9[%c0_20, %c0_21] : memref<1x1xf32, #tpu.memory_space<vmem>>, vector<1x1xf32>
    %21 = vector.broadcast %20 : vector<1x1xf32> to vector<8x1xf32>
    %22 = arith.addf %19, %21 : vector<8x1xf32>
    %23 = math.tanh %22 : vector<8x1xf32>
    %c0_22 = arith.constant 0 : index
    %c0_23 = arith.constant 0 : index
    %24 = vector.load %arg10[%c0_22, %c0_23] : memref<8x1xf32, #tpu.memory_space<vmem>>, vector<8x1xf32>
    tpu.vector_store %arg10[%c0_22, %c0_23], %23 {strides = array<i32>} : memref<8x1xf32, #tpu.memory_space<vmem>>, vector<8x1xf32>,
    return
  }
  func.func @transform_0(%arg0: i32) -> (i32, i32) {
    %c0_i32 = arith.constant 0 : i32
    %c0_i32_0 = arith.constant 0 : i32
    return %arg0, %c0_i32 : i32, i32
  }
  func.func @transform_1(%arg0: i32) -> (i32, i32) {
    %c0_i32 = arith.constant 0 : i32
    %c0_i32_0 = arith.constant 0 : i32
    return %arg0, %c0_i32 : i32, i32
  }
  func.func @transform_2(%arg0: i32) -> (i32, i32) {
    %c0_i32 = arith.constant 0 : i32
    %c0_i32_0 = arith.constant 0 : i32
    return %arg0, %c0_i32 : i32, i32
  }
  func.func @transform_3(%arg0: i32) -> (i32, i32) {
    %c0_i32 = arith.constant 0 : i32
    %c0_i32_0 = arith.constant 0 : i32
    %c0_i32_1 = arith.constant 0 : i32
    return %c0_i32, %c0_i32_0 : i32, i32
  }
  func.func @transform_4(%arg0: i32) -> (i32, i32) {
    %c0_i32 = arith.constant 0 : i32
    %c0_i32_0 = arith.constant 0 : i32
    %c0_i32_1 = arith.constant 0 : i32
    return %c0_i32, %c0_i32_0 : i32, i32
  }
  func.func @transform_5(%arg0: i32) -> (i32, i32) {
    %c0_i32 = arith.constant 0 : i32
    %c0_i32_0 = arith.constant 0 : i32
    %c0_i32_1 = arith.constant 0 : i32
    return %c0_i32, %c0_i32_0 : i32, i32
  }
  func.func @transform_6(%arg0: i32) -> (i32, i32) {
    %c0_i32 = arith.constant 0 : i32
    %c0_i32_0 = arith.constant 0 : i32
    %c0_i32_1 = arith.constant 0 : i32
    return %c0_i32, %c0_i32_0 : i32, i32
  }
  func.func @transform_7(%arg0: i32) -> (i32, i32) {
    %c0_i32 = arith.constant 0 : i32
    %c0_i32_0 = arith.constant 0 : i32
    %c0_i32_1 = arith.constant 0 : i32
    return %c0_i32, %c0_i32_0 : i32, i32
  }
  func.func @transform_8(%arg0: i32) -> (i32, i32) {
    %c0_i32 = arith.constant 0 : i32
    %c0_i32_0 = arith.constant 0 : i32
    %c0_i32_1 = arith.constant 0 : i32
    return %c0_i32, %c0_i32_0 : i32, i32
  }
  func.func @transform_9(%arg0: i32) -> (i32, i32) {
    %c0_i32 = arith.constant 0 : i32
    %c0_i32_0 = arith.constant 0 : i32
    return %arg0, %c0_i32 : i32, i32
  }
}

</mosaic_0001>

<bundles_post_ra>
// kernel: bilinear_predictor_pallas.1
= control target key start
LH: loop header
LB: loop body
LE: loop exit
PB: predicated region body
PF: predicated region fallthrough
CT: control target
= control target key end

     0   :  { %v15061_v3 = vmov 0.0   ;;  %vm69_vm0 = vcmask 261120   ;;  %vm8046_vm1 = vcmask 130048   ;;  %vm10696_vm2 = vmmov 0   ;;  %s15050_s3 = inlined_call_operand.vmem [shape: f32[32,1024], index: 3, kind: input, shape index: {}]   ;;  %s15051_s0 = inlined_call_operand.vmem [shape: f32[8,32], index: 0, kind: input, shape index: {}]   ;;  %s15052_s4 = inlined_call_operand.vmem [shape: f32[32,1024], index: 4, kind: input, shape index: {}]   ;;  %s15053_s1 = inlined_call_operand.vmem [shape: f32[8,32], index: 1, kind: input, shape index: {}]   ;;  %s15054_s5 = inlined_call_operand.vmem [shape: f32[1024,32], index: 5, kind: input, shape index: {}]   ;;  %s15055_s6 = inlined_call_operand.vmem [shape: f32[1,32], index: 6, kind: input, shape index: {}]   ;;  %s15056_s7 = inlined_call_operand.vmem [shape: f32[16,32], index: 7, kind: input, shape index: {}]   ;;  %s15057_s2 = inlined_call_operand.vmem [shape: f32[8,16], index: 2, kind: input, shape index: {}]   ;;  %s15058_s8 = inlined_call_operand.<no memory space> [shape: f32[1,1], index: 8, kind: input, shape index: {}]   ;;  %s15059_s9 = inlined_call_operand.vmem [shape: f32[8,1], index: 9, kind: output, shape index: {}]  }
   0x1   :  { %v38_v0 = vld [vmem:[%s15050_s3 + $0x8] sm:$0xff]  ;;  %v37_v2 = vld [vmem:[%s15050_s3] sm:$0xff]  ;;  %145 = vmatprep.mubr.f32.mxu1 %v15061_v3  ;;  %261 = vmatprep.mubr.f32.mxu0 %v15061_v3  ;;  %v40_v19 = vld [vmem:[%s15050_s3 + $0x18] sm:$0xff]  ;;  %vm8522_vm3 = vcmask 7168  }
   0x2   :  { %v46_v1 = vld [vmem:[%s15050_s3 + $0x48] sm:$0xff]  ;;  %v73_v4 = vand.u32 4294901760, %v38_v0  ;;  %v45_v6 = vld [vmem:[%s15050_s3 + $0x40] sm:$0xff]  ;;  %v75_v7 = vand.u32 4294901760, %v37_v2  ;;  %v48_v20 = vld [vmem:[%s15050_s3 + $0x58] sm:$0xff]  ;;  %v616_v33 = vand.u32 4294901760, %v40_v19 }
   0x3   :  { %v77_v5 = vand.u32 4294901760, %v46_v1  ;;  %v54_v8 = vld [vmem:[%s15050_s3 + $0x88] sm:$0xff]  ;;  %v79_v10 = vand.u32 4294901760, %v45_v6  ;;  %v53_v13 = vld [vmem:[%s15050_s3 + $0x80] sm:$0xff]  ;;  %v39_v26 = vld [vmem:[%s15050_s3 + $0x10] sm:$0xff]  ;;  %v620_v34 = vand.u32 4294901760, %v48_v20 }
   0x4   :  { %v62_v9 = vld [vmem:[%s15050_s3 + $0xc8] sm:$0xff]  ;;  %v81_v11 = vand.u32 4294901760, %v54_v8  ;;  %v61_v14 = vld [vmem:[%s15050_s3 + $0xc0] sm:$0xff]  ;;  %v10775_v16 = vsub.f32 %v37_v2, %v75_v7  ;;  %v83_v17 = vand.u32 4294901760, %v53_v13  ;;  %v10807_v31 = vsub.f32 %v38_v0, %v73_v4  ;;  %v47_v38 = vld [vmem:[%s15050_s3 + $0x50] sm:$0xff] }
   0x5   :  { %v85_v12 = vand.u32 4294901760, %v62_v9  ;;  %v10773_v15 = vpack.c.bf16 %v77_v5, %v73_v4  ;;  %v87_v18 = vand.u32 4294901760, %v61_v14  ;;  %v10783_v21 = vpack.c.bf16 %v79_v10, %v75_v7  ;;  %v34_v25 = vld [vmem:[%s15051_s0] sm:$0xff]  ;;  %v56_v56 = vld [vmem:[%s15050_s3 + $0x98] sm:$0xff]  ;;  %v55_v7 = vld [vmem:[%s15050_s3 + $0x90] sm:$0xff] }
   0x6   :  { %v10785_v22 = vsub.f32 %v45_v6, %v79_v10  ;;  %v10789_v24 = vsub.f32 %v54_v8, %v81_v11  ;;  %v10802_v29 = vsub.f32 %v53_v13, %v83_v17  ;;  %v10809_v32 = vsub.f32 %v46_v1, %v77_v5  ;;  %v64_v57 = vld [vmem:[%s15050_s3 + $0xd8] sm:$0xff] }
   0x7   :  { %v10787_v23 = vpack.c.bf16 %v85_v12, %v81_v11  ;;  %9431 = vmatprep.subr.bf16.mxu1 %v10773_v15  ;;  %v10798_v27 = vsub.f32 %v62_v9, %v85_v12  ;;  %v10800_v28 = vpack.c.bf16 %v87_v18, %v83_v17  ;;  %v10804_v30 = vsub.f32 %v61_v14, %v87_v18  ;;  %v63_v12 = vld [vmem:[%s15050_s3 + $0xd0] sm:$0xff] }
   0x8   :  { %9433 = vmatpush1.bf16.msra.mxu1 %v10783_v21  ;;  %v71_v35 = vsel %vm69_vm0, %v34_v25, 0  ;;  %v165_v36 = vand.u32 4294901760, %v10775_v16  ;;  %v177_v37 = vand.u32 4294901760, %v10785_v22  ;;  %v618_v39 = vand.u32 4294901760, %v39_v26 }
   0x9   :  { %9435 = vmatprep.subr.bf16.mxu1 %v10787_v23  ;;  %v159_v40 = vand.u32 4294901760, %v10807_v31  ;;  %v171_v41 = vand.u32 4294901760, %v10809_v32  ;;  %v10820_v42 = vpack.c.bf16 %v620_v34, %v616_v33  ;;  %v10822_v43 = vsub.f32 %v40_v19, %v616_v33 }
   0xa   :  { %v10824_v44 = vsub.f32 %v48_v20, %v620_v34  ;;  %v10826_v45 = vand.u32 4294901760, %v71_v35  ;;  %v166_v46 = vsub.f32 %v10775_v16, %v165_v36  ;;  %v178_v47 = vsub.f32 %v10785_v22, %v177_v37 }
   0xb   :  { %v160_v48 = vsub.f32 %v10807_v31, %v159_v40  ;;  %v172_v49 = vsub.f32 %v10809_v32, %v171_v41  ;;  %v622_v50 = vand.u32 4294901760, %v47_v38  ;;  %v10841_v51 = vsub.f32 %v39_v26, %v618_v39 }
   0xc   :  { %9437 = vmatpush1.bf16.msra.mxu1 %v10800_v28  ;;  %v10845_v52 = vsub.f32 %v71_v35, %v10826_v45  ;;  %v167_v53 = vand.u32 4294901760, %v166_v46  ;;  %v179_v54 = vand.u32 4294901760, %v178_v47  ;;  %v183_v55 = vand.u32 4294901760, %v10789_v24 }
   0xd   :  { %9479 = vmatprep.subr.bf16.mxu1 %v10820_v42  ;;  %v161_v58 = vand.u32 4294901760, %v160_v48  ;;  %v173_v59 = vand.u32 4294901760, %v172_v49  ;;  %v10854_v60 = vpack.c.bf16 %v622_v50, %v618_v39  ;;  %v10856_v61 = vsub.f32 %v47_v38, %v622_v50 }
   0xe   :  { %v10859_v62 = vand.u32 4294901760, %v10845_v52  ;;  %v9440_v63 = vpack.c.bf16 %v179_v54, %v167_v53  ;;  %v184_v0 = vsub.f32 %v10789_v24, %v183_v55  ;;  %v195_v1 = vand.u32 4294901760, %v10798_v27 }
   0xf   :  { %v9438_v2 = vpack.c.bf16 %v173_v59, %v161_v58  ;;  %v624_v4 = vand.u32 4294901760, %v56_v56  ;;  %v628_v5 = vand.u32 4294901760, %v64_v57  ;;  %v189_v6 = vand.u32 4294901760, %v10802_v29 }
  0x10   :  { %v149_v8 = vsub.f32 %v10845_v52, %v10859_v62  ;;  %v185_v9 = vand.u32 4294901760, %v184_v0  ;;  %v196_v10 = vsub.f32 %v10798_v27, %v195_v1  ;;  %v201_v11 = vand.u32 4294901760, %v10804_v30 }
  0x11   :  { %9439 = vmatprep.subr.bf16.mxu0 %v9438_v2  ;;  %v10878_v13 = vpack.c.bf16 %v628_v5, %v624_v4  ;;  %v10880_v14 = vsub.f32 %v56_v56, %v624_v4  ;;  %v10882_v17 = vsub.f32 %v64_v57, %v628_v5  ;;  %v190_v18 = vsub.f32 %v10802_v29, %v189_v6 }
  0x12   :  { %v10887_v19 = vand.u32 4294901760, %v149_v8  ;;  %9441 = vmatpush1.bf16.msra.mxu0 %v9440_v63  ;;  %v197_v20 = vand.u32 4294901760, %v196_v10  ;;  %v202_v25 = vsub.f32 %v10804_v30, %v201_v11  ;;  %v626_v26 = vand.u32 4294901760, %v55_v7 }
  0x13   :  { %v191_v33 = vand.u32 4294901760, %v190_v18  ;;  %v630_v34 = vand.u32 4294901760, %v63_v12  ;;  %v9446_v35 = vpack.c.bf16 %v10809_v32, %v10807_v31  ;;  %v702_v38 = vand.u32 4294901760, %v10822_v43 }
  0x14   :  { %151 = vmatmul.mubr.f32.vlgmr.msra.gmra.mrb[0].mxu1 %v10887_v19  ;;  %v9442_v39 = vpack.c.bf16 %v197_v20, %v185_v9  ;;  %v203_v46 = vand.u32 4294901760, %v202_v25  ;;  %v10896_v47 = vsub.f32 %v55_v7, %v626_v26  ;;  %v714_v48 = vand.u32 4294901760, %v10824_v44 }
  0x15   :  { %9481 = vmatpush1.bf16.msra.mxu1 %v10854_v60  ;;  %v10900_v49 = vpack.c.bf16 %v630_v34, %v626_v26  ;;  %v10902_v50 = vsub.f32 %v63_v12, %v630_v34  ;;  %688 = vmatprep.mubr.f32.mxu1 %v15061_v3  ;;  %v703_v53 = vsub.f32 %v10822_v43, %v702_v38  ;;  %v708_v54 = vand.u32 4294901760, %v10841_v51 }
  0x16   :  { %9443 = vmatprep.subr.bf16.mxu0 %v9442_v39  ;;  %9483 = vmatprep.subr.bf16.mxu1 %v10878_v13  ;;  %v9444_v56 = vpack.c.bf16 %v203_v46, %v191_v33  ;;  %v715_v57 = vsub.f32 %v10824_v44, %v714_v48  ;;  %v720_v58 = vand.u32 4294901760, %v10856_v61  ;;  %v9448_v63 = vpack.c.bf16 %v10785_v22, %v10775_v16  ;;  %v58_v16 = vld [vmem:[%s15050_s3 + $0xa8] sm:$0xff] }
  0x17   :  { %v704_v59 = vand.u32 4294901760, %v703_v53  ;;  %v709_v0 = vsub.f32 %v10841_v51, %v708_v54  ;;  %v726_v2 = vand.u32 4294901760, %v10880_v14  ;;  %v9450_v7 = vpack.c.bf16 %v10798_v27, %v10789_v24  ;;  %v66_v22 = vld [vmem:[%s15050_s3 + $0xe8] sm:$0xff] }
  0x18   :  { %9445 = vmatpush1.bf16.msra.mxu0 %v9444_v56  ;;  %v716_v4 = vand.u32 4294901760, %v715_v57  ;;  %v721_v5 = vsub.f32 %v10856_v61, %v720_v58  ;;  %v738_v8 = vand.u32 4294901760, %v10882_v17  ;;  %v732_v12 = vand.u32 4294901760, %v10896_v47 }
  0x19   :  { %9485 = vmatpush1.bf16.msra.mxu1 %v10900_v49  ;;  %9447 = vmatprep.subr.bf16.mxu0 %v9446_v35  ;;  %v710_v9 = vand.u32 4294901760, %v709_v0  ;;  %v727_v10 = vsub.f32 %v10880_v14, %v726_v2  ;;  %v744_v18 = vand.u32 4294901760, %v10902_v50  ;;  %v9452_v53 = vpack.c.bf16 %v10804_v30, %v10802_v29  ;;  %v57_v29 = vld [vmem:[%s15050_s3 + $0xa0] sm:$0xff] }
  0x1a   :  { %v9486_v20 = vpack.c.bf16 %v716_v4, %v704_v59  ;;  %v722_v25 = vand.u32 4294901760, %v721_v5  ;;  %v739_v26 = vsub.f32 %v10882_v17, %v738_v8  ;;  %v733_v34 = vsub.f32 %v10896_v47, %v732_v12  ;;  %v65_v30 = vld [vmem:[%s15050_s3 + $0xe0] sm:$0xff] }
  0x1b   :  { %263 = vmatmul.mubr.f32.vlgmr.msra.gmra.mrb[0].mxu0 %v10826_v45  ;;  %v728_v33 = vand.u32 4294901760, %v727_v10  ;;  %v745_v35 = vsub.f32 %v10902_v50, %v744_v18  ;;  %v9496_v4 = vpack.c.bf16 %v10856_v61, %v10841_v51  ;;  %v9498_v5 = vpack.c.bf16 %v10882_v17, %v10880_v14  ;;  %v42_v10 = vld [vmem:[%s15050_s3 + $0x28] sm:$0xff]  ;;  %v11062_v14 = vld [vmem:[%s15050_s3 + $0x30] sm:$0xff] }
  0x1c   :  { %9487 = vmatprep.subr.bf16.mxu1 %v9486_v20  ;;  %9449 = vmatpush1.bf16.msra.mxu0 %v9448_v63  ;;  %v9488_v39 = vpack.c.bf16 %v722_v25, %v710_v9  ;;  %v740_v46 = vand.u32 4294901760, %v739_v26  ;;  %v734_v56 = vand.u32 4294901760, %v733_v34  ;;  %v9494_v63 = vpack.c.bf16 %v10824_v44, %v10822_v43  ;;  %v50_v20 = vld [vmem:[%s15050_s3 + $0x68] sm:$0xff]  ;;  %v41_v25 = vld [vmem:[%s15050_s3 + $0x20] sm:$0xff]  ;;  %v11067_v17 = vld [vmem:[%s15050_s3 + $0x70] sm:$0xff] }
  0x1d   :  { %694 = vmatmul.mubr.f32.vlgmr.msra.gmra.mrb[2].mxu1 %v10887_v19  ;;  %9451 = vmatprep.subr.bf16.mxu0 %v9450_v7  ;;  %v746_v57 = vand.u32 4294901760, %v745_v35  ;;  %v9462_v7 = vpack.c.bf16 %v171_v41, %v159_v40  ;;  %v9500_v9 = vpack.c.bf16 %v10902_v50, %v10896_v47  ;;  %v9464_v31 = vpack.c.bf16 %v177_v37, %v165_v36  ;;  %v49_v26 = vld [vmem:[%s15050_s3 + $0x60] sm:$0xff] }
  0x1e   :  { %9489 = vmatpush1.bf16.msra.mxu1 %v9488_v39  ;;  %v9490_v59 = vpack.c.bf16 %v740_v46, %v728_v33  ;;  %349 = vmatprep.mubr.f32.mxu0 %v15061_v3  ;;  %v9466_v32 = vpack.c.bf16 %v195_v1, %v183_v55  ;;  %v1159_v40 = vand.u32 4294901760, %v42_v10  ;;  %v1163_v41 = vand.u32 4294901760, %v50_v20  ;;  %v11025_v46 = vld [vmem:[%s15050_s3 + $0x38] sm:$0xff] }
  0x1f   :  { %v9492_v0 = vpack.c.bf16 %v746_v57, %v734_v56  ;;  %804 = vmatprep.mubr.f32.mxu1 %v15061_v3  ;;  %v9468_v24 = vpack.c.bf16 %v201_v11, %v189_v6  ;;  %v1161_v27 = vand.u32 4294901760, %v41_v25  ;;  %v1165_v36 = vand.u32 4294901760, %v49_v26 }
  0x20   :  { %9491 = vmatprep.subr.bf16.mxu1 %v9490_v59  ;;  %9453 = vmatpush1.bf16.msra.mxu0 %v9452_v53  ;;  %v11001_v37 = vsub.f32 %v42_v10, %v1159_v40  ;;  %v11003_v55 = vsub.f32 %v50_v20, %v1163_v41  ;;  %v1167_v1 = vand.u32 4294901760, %v58_v16  ;;  %v1171_v33 = vand.u32 4294901760, %v66_v22  ;;  %v11030_v53 = vld [vmem:[%s15050_s3 + $0x78] sm:$0xff] }
  0x21   :  { %9455 = vmatprep.subr.bf16.mxu0 %v10773_v15  ;;  %v9510_v6 = vpack.c.bf16 %v714_v48, %v702_v38  ;;  %v11018_v11 = vsub.f32 %v41_v25, %v1161_v27  ;;  %v11020_v34 = vsub.f32 %v49_v26, %v1165_v36  ;;  %v1169_v35 = vand.u32 4294901760, %v57_v29 }
  0x22   :  { %9493 = vmatpush1.bf16.msra.mxu1 %v9492_v0  ;;  %v1173_v39 = vand.u32 4294901760, %v65_v30  ;;  %v11033_v43 = vsub.f32 %v58_v16, %v1167_v1  ;;  %v11035_v44 = vsub.f32 %v66_v22, %v1171_v33  ;;  %v1245_v38 = vand.u32 4294901760, %v11001_v37 }
  0x23   :  { %352 = vmatmul.mubr.f32.vlgmr.msra.gmra.mrb[0].mxu0 %v10845_v52  ;;  %9495 = vmatprep.subr.bf16.mxu1 %v9494_v63  ;;  %v1257_v48 = vand.u32 4294901760, %v11003_v55  ;;  %v9512_v56 = vpack.c.bf16 %v720_v58, %v708_v54  ;;  %v9516_v57 = vpack.c.bf16 %v744_v18, %v732_v12  ;;  %v11053_v59 = vpack.c.bf16 %v1163_v41, %v1159_v40  ;;  %v11120_v40 = vld [vmem:[%s15050_s3 + $0xf0] sm:$0xff] }
  0x24   :  { %9457 = vmatpush1.bf16.msra.mxu0 %v10783_v21  ;;  %430 = vmatprep.mubr.f32.mxu0 %v15061_v3  ;;  %v11055_v0 = vpack.c.bf16 %v1165_v36, %v1161_v27  ;;  %v1702_v51 = vand.u32 4294901760, %v11025_v46  ;;  %v1706_v61 = vand.u32 4294901760, %v11030_v53  ;;  %v11071_v47 = vsub.f32 %v57_v29, %v1169_v35 }
  0x25   :  { %806 = vmatmul.mubr.f32.vlgmr.msra.gmra.mrb[2].mxu1 %v10826_v45  ;;  %9459 = vmatprep.subr.bf16.mxu0 %v10787_v23  ;;  %v11073_v50 = vsub.f32 %v65_v30, %v1173_v39  ;;  %v1251_v54 = vand.u32 4294901760, %v11018_v11  ;;  %v1263_v58 = vand.u32 4294901760, %v11020_v34  ;;  %v1258_v12 = vsub.f32 %v11003_v55, %v1257_v48 }
  0x26   :  { %9497 = vmatpush1.bf16.msra.mxu1 %v9496_v4  ;;  %892 = vmatprep.mubr.f32.mxu1 %v15061_v3  ;;  %v1269_v18 = vand.u32 4294901760, %v11033_v43  ;;  %v1281_v63 = vand.u32 4294901760, %v11035_v44  ;;  %v11098_v4 = vpack.c.bf16 %v1171_v33, %v1167_v1  ;;  %v11108_v10 = vsub.f32 %v11030_v53, %v1706_v61 }
  0x27   :  { %9499 = vmatprep.subr.bf16.mxu1 %v9498_v5  ;;  %v11100_v5 = vpack.c.bf16 %v1173_v39, %v1169_v35  ;;  %v1252_v41 = vsub.f32 %v11018_v11, %v1251_v54  ;;  %v1264_v25 = vsub.f32 %v11020_v34, %v1263_v58  ;;  %v1275_v26 = vand.u32 4294901760, %v11071_v47 }
  0x28   :  { %9461 = vmatpush1.bf16.msra.mxu0 %v10800_v28  ;;  %v1287_v16 = vand.u32 4294901760, %v11073_v50  ;;  %v1282_v27 = vsub.f32 %v11035_v44, %v1281_v63  ;;  %v1716_v29 = vand.u32 4294901760, %v11120_v40  ;;  %v1800_v39 = vand.u32 4294901760, %v11108_v10 }
  0x29   :  { %9463 = vmatprep.subr.bf16.mxu0 %v9462_v7  ;;  %v1708_v7 = vand.u32 4294901760, %v11067_v17  ;;  %v1265_v53 = vand.u32 4294901760, %v1264_v25 }
  0x2a   :  { %9501 = vmatpush1.bf16.msra.mxu1 %v9500_v9  ;;  %v11105_v9 = vsub.f32 %v11025_v46, %v1702_v51  ;;  %v1253_v46 = vand.u32 4294901760, %v1252_v41 }
  0x2b   :  { %434 = vmatmul.mubr.f32.vlgmr.msra.gmra.mrb[0].mxu0 %v10859_v62  ;;  %9503 = vmatprep.subr.bf16.mxu1 %v10820_v42  ;;  %v11142_v1 = vsub.f32 %v11067_v17, %v1708_v7  ;;  %v1283_v17 = vand.u32 4294901760, %v1282_v27 }
  0x2c   :  { %9465 = vmatpush1.bf16.msra.mxu0 %v9464_v31  ;;  %528 = vmatprep.mubr.f32.mxu0 %v15061_v3  ;;  %v1788_v35 = vand.u32 4294901760, %v11105_v9 }
  0x2d   :  { %895 = vmatmul.mubr.f32.vlgmr.msra.gmra.mrb[2].mxu1 %v10845_v52  ;;  %9467 = vmatprep.subr.bf16.mxu0 %v9466_v32  ;;  %v11115_v32 = vld [vmem:[%s15050_s3 + $0xb0] sm:$0xff] }
  0x2e   :  { %9505 = vmatpush1.bf16.msra.mxu1 %v10854_v60  ;;  %973 = vmatprep.mubr.f32.mxu1 %v15061_v3  ;;  %v1712_v33 = vand.u32 4294901760, %v11115_v32 }
  0x2f   :  { %9507 = vmatprep.subr.bf16.mxu1 %v10878_v13 }
  0x30   :  { %9469 = vmatpush1.bf16.msra.mxu0 %v9468_v24  ;;  %v1259_v24 = vand.u32 4294901760, %v1258_v12  ;;  %v1806_v12 = vand.u32 4294901760, %v11142_v1 }
  0x31   :  { %9471 = vmatprep.subr.bf16.mxu0 %v10773_v15  ;;  %v9514_v15 = vpack.c.bf16 %v738_v8, %v726_v2  ;;  %v11080_v2 = vld [vmem:[%s15050_s3 + $0xb8] sm:$0xff] }
  0x32   :  { %9509 = vmatpush1.bf16.msra.mxu1 %v10900_v49  ;;  %v11085_v8 = vld [vmem:[%s15050_s3 + $0xf8] sm:$0xff]  ;;  %v1710_v20 = vand.u32 4294901760, %v11080_v2  ;;  %v1807_v27 = vsub.f32 %v11142_v1, %v1806_v12 }
  0x33   :  { %530 = vmatmul.mubr.f32.vlgmr.msra.gmra.mrb[0].mxu0 %v10826_v45  ;;  %9511 = vmatprep.subr.bf16.mxu1 %v9510_v6  ;;  %v1714_v31 = vand.u32 4294901760, %v11085_v8 }
  0x34   :  { %9473 = vmatpush1.bf16.msra.mxu0 %v10783_v21  ;;  %608 = vmatprep.mubr.f32.mxu0 %v15061_v3  ;;  %v1246_v21 = vsub.f32 %v11001_v37, %v1245_v38  ;;  %v11149_v30 = vsub.f32 %v11080_v2, %v1710_v20  ;;  %v11171_v2 = vsub.f32 %v11115_v32, %v1712_v33 }
  0x35   :  { %977 = vmatmul.mubr.f32.vlgmr.msra.gmra.mrb[2].mxu1 %v10859_v62  ;;  %9475 = vmatprep.subr.bf16.mxu0 %v10787_v23  ;;  %v1704_v23 = vand.u32 4294901760, %v11062_v14  ;;  %v11152_v6 = vsub.f32 %v11085_v8, %v1714_v31  ;;  %v11174_v8 = vsub.f32 %v11120_v40, %v1716_v29  ;;  %v9536_v40 = vpack.c.bf16 %v1265_v53, %v1253_v46 }
  0x36   :  { %9513 = vmatpush1.bf16.msra.mxu1 %v9512_v56  ;;  %1071 = vmatprep.mubr.f32.mxu1 %v15061_v3  ;;  %v1247_v22 = vand.u32 4294901760, %v1246_v21  ;;  %v1288_v56 = vsub.f32 %v11073_v50, %v1287_v16  ;;  %v1818_v46 = vand.u32 4294901760, %v11171_v2 }
  0x37   :  { %9515 = vmatprep.subr.bf16.mxu1 %v9514_v15  ;;  %v11139_v36 = vsub.f32 %v11062_v14, %v1704_v23  ;;  %v1824_v32 = vand.u32 4294901760, %v11152_v6  ;;  %v1830_v53 = vand.u32 4294901760, %v11174_v8 }
  0x38   :  { %9477 = vmatpush1.bf16.msra.mxu0 %v10800_v28  ;;  %v1270_v28 = vsub.f32 %v11033_v43, %v1269_v18  ;;  %v9534_v15 = vpack.c.bf16 %v1259_v24, %v1247_v22  ;;  %v1289_v25 = vand.u32 4294901760, %v1288_v56  ;;  %v11188_v22 = vpack.c.bf16 %v1708_v7, %v1704_v23 }
  0x39   :  { %9527 = vmatprep.subr.bf16.mxu0 %v11053_v59  ;;  %v1794_v21 = vand.u32 4294901760, %v11139_v36  ;;  %v11190_v24 = vpack.c.bf16 %v1714_v31, %v1710_v20  ;;  %v1825_v20 = vsub.f32 %v11152_v6, %v1824_v32  ;;  %v9542_v56 = vpack.c.bf16 %v11003_v55, %v11001_v37 }
  0x3a   :  { %9517 = vmatpush1.bf16.msra.mxu1 %v9516_v57  ;;  %v11166_v57 = vpack.c.bf16 %v1706_v61, %v1702_v51  ;;  %v1271_v14 = vand.u32 4294901760, %v1270_v28  ;;  %v1789_v51 = vsub.f32 %v11105_v9, %v1788_v35  ;;  %v1812_v61 = vand.u32 4294901760, %v11149_v30 }
  0x3b   :  { %610 = vmatmul.mubr.f32.vlgmr.msra.gmra.mrb[0].mxu0 %v10826_v45  ;;  %9519 = vmatprep.subr.bf16.mxu1 %v10820_v42  ;;  %v1276_v42 = vsub.f32 %v11071_v47, %v1275_v26  ;;  %v1795_v28 = vsub.f32 %v11139_v36, %v1794_v21  ;;  %v9560_v37 = vpack.c.bf16 %v1263_v58, %v1251_v54 }
  0x3c   :  { %9529 = vmatpush1.bf16.msra.mxu0 %v11055_v0  ;;  %1231 = vmatprep.mubr.f32.mxu0 %v15061_v3  ;;  %v1790_v23 = vand.u32 4294901760, %v1789_v51  ;;  %v1831_v51 = vsub.f32 %v11174_v8, %v1830_v53  ;;  %v9562_v55 = vpack.c.bf16 %v1281_v63, %v1269_v18  ;;  %v9564_v54 = vpack.c.bf16 %v1287_v16, %v1275_v26  ;;  %v2261_v63 = vld [vmem:[%s15052_s4 + $0x80] sm:$0xff] }
  0x3d   :  { %1073 = vmatmul.mubr.f32.vlgmr.msra.gmra.mrb[2].mxu1 %v10826_v45  ;;  %9531 = vmatprep.subr.bf16.mxu0 %v11098_v4  ;;  %v1277_v41 = vand.u32 4294901760, %v1276_v42  ;;  %v11211_v42 = vpack.c.bf16 %v1716_v29, %v1712_v33  ;;  %v9606_v16 = vpack.c.bf16 %v1800_v39, %v1788_v35 }
  0x3e   :  { %9521 = vmatpush1.bf16.msra.mxu1 %v10854_v60  ;;  %1151 = vmatprep.mubr.f32.mxu1 %v15061_v3  ;;  %v1801_v60 = vsub.f32 %v11108_v10, %v1800_v39 }
  0x3f   :  { %9523 = vmatprep.subr.bf16.mxu1 %v10878_v13  ;;  %v9538_v13 = vpack.c.bf16 %v1283_v17, %v1271_v14  ;;  %v9540_v31 = vpack.c.bf16 %v1289_v25, %v1277_v41  ;;  %v1808_v14 = vand.u32 4294901760, %v1807_v27  ;;  %v1819_v17 = vsub.f32 %v11171_v2, %v1818_v46 }
  0x40   :  { %9533 = vmatpush1.bf16.msra.mxu0 %v11100_v5  ;;  %v1802_v7 = vand.u32 4294901760, %v1801_v60  ;;  %v1826_v60 = vand.u32 4294901760, %v1825_v20  ;;  %v9546_v41 = vpack.c.bf16 %v11035_v44, %v11033_v43  ;;  %v9592_v20 = vpack.c.bf16 %v11142_v1, %v11139_v36 }
  0x41   :  { %9535 = vmatprep.subr.bf16.mxu0 %v9534_v15  ;;  %v1796_v15 = vand.u32 4294901760, %v1795_v28  ;;  %v1832_v28 = vand.u32 4294901760, %v1831_v51  ;;  %v35_v51 = vld [vmem:[%s15053_s1] sm:$0xff]  ;;  %v9612_v36 = vpack.c.bf16 %v1830_v53, %v1818_v46  ;;  %v11360_v53 = vld [vmem:[%s15052_s4 + $0x10] sm:$0xff] }
  0x42   :  { %9525 = vmatpush1.bf16.msra.mxu1 %v10900_v49  ;;  %v1813_v49 = vsub.f32 %v11149_v30, %v1812_v61  ;;  %v9582_v33 = vpack.c.bf16 %v1802_v7, %v1790_v23  ;;  %v9548_v23 = vpack.c.bf16 %v11073_v50, %v11071_v47  ;;  %v2278_v43 = vsel %vm69_vm0, %v35_v51, 0 }
  0x43   :  { %1237 = vmatmul.mubr.f32.vlgmr.msra.gmra.mrb[2].mxu0 %v10887_v19  ;;  %9575 = vmatprep.subr.bf16.mxu1 %v11166_v57  ;;  %v9584_v25 = vpack.c.bf16 %v1808_v14, %v1796_v15  ;;  %v9596_v15 = vpack.c.bf16 %v11174_v8, %v11171_v2  ;;  %v2254_v14 = vld [vmem:[%s15052_s4 + $0x48] sm:$0xff]  ;;  %v11303_v26 = vand.u32 4294901760, %v2278_v43 }
  0x44   :  { %9537 = vmatpush1.bf16.msra.mxu0 %v9536_v40  ;;  %1347 = vmatprep.mubr.f32.mxu0 %v15061_v3  ;;  %v1814_v29 = vand.u32 4294901760, %v1813_v49  ;;  %v9544_v40 = vpack.c.bf16 %v11020_v34, %v11018_v11  ;;  %v9590_v49 = vpack.c.bf16 %v11108_v10, %v11105_v9  ;;  %v2262_v11 = vld [vmem:[%s15052_s4 + $0x88] sm:$0xff]  ;;  %v2256_v9 = vld [vmem:[%s15052_s4 + $0x58] sm:$0xff]  ;;  %v9610_v10 = vpack.c.bf16 %v1824_v32, %v1812_v61 }
  0x45   :  { %1153 = vmatmul.mubr.f32.vlgmr.msra.gmra.mrb[2].mxu1 %v10826_v45  ;;  %9539 = vmatprep.subr.bf16.mxu0 %v9538_v13  ;;  %v1820_v13 = vand.u32 4294901760, %v1819_v17  ;;  %v2270_v34 = vld [vmem:[%s15052_s4 + $0xc8] sm:$0xff]  ;;  %v2288_v47 = vand.u32 4294901760, %v2262_v11  ;;  %v2827_v61 = vand.u32 4294901760, %v2256_v9 }
  0x46   :  { %9577 = vmatpush1.bf16.msra.mxu1 %v11188_v22  ;;  %1774 = vmatprep.mubr.f32.mxu1 %v15061_v3  ;;  %v9586_v27 = vpack.c.bf16 %v1826_v60, %v1814_v29  ;;  %v2269_v29 = vld [vmem:[%s15052_s4 + $0xc0] sm:$0xff]  ;;  %v2292_v50 = vand.u32 4294901760, %v2270_v34 }
  0x47   :  { %9579 = vmatprep.subr.bf16.mxu1 %v11190_v24  ;;  %v9588_v7 = vpack.c.bf16 %v1832_v28, %v1820_v13  ;;  %v2248_v13 = vld [vmem:[%s15052_s4 + $0x18] sm:$0xff]  ;;  %v11336_v39 = vsub.f32 %v2262_v11, %v2288_v47  ;;  %v11365_v28 = vld [vmem:[%s15052_s4 + $0x50] sm:$0xff] }
  0x48   :  { %9541 = vmatpush1.bf16.msra.mxu0 %v9540_v31  ;;  %v2246_v31 = vld [vmem:[%s15052_s4 + $0x8] sm:$0xff] }
  0x49   :  { %9543 = vmatprep.subr.bf16.mxu0 %v9542_v56  ;;  %v9558_v56 = vpack.c.bf16 %v1257_v48, %v1245_v38  ;;  %v2280_v17 = vand.u32 4294901760, %v2246_v31  ;;  %v2284_v38 = vand.u32 4294901760, %v2254_v14  ;;  %v2245_v48 = vld [vmem:[%s15052_s4] sm:$0xff] }
  0x4a   :  { %9581 = vmatpush1.bf16.msra.mxu1 %v11211_v42  ;;  %v2282_v58 = vand.u32 4294901760, %v2245_v48 }
  0x4b   :  { %1349 = vmatmul.mubr.f32.vlgmr.msra.gmra.mrb[2].mxu0 %v10826_v45  ;;  %9583 = vmatprep.subr.bf16.mxu1 %v9582_v33  ;;  %v2253_v33 = vld [vmem:[%s15052_s4 + $0x40] sm:$0xff]  ;;  %v11287_v44 = vsub.f32 %v2246_v31, %v2280_v17  ;;  %v11301_v60 = vsub.f32 %v2254_v14, %v2284_v38  ;;  %v11345_v2 = vpack.c.bf16 %v2284_v38, %v2280_v17 }
  0x4c   :  { %9545 = vmatpush1.bf16.msra.mxu0 %v9544_v40  ;;  %1435 = vmatprep.mubr.f32.mxu0 %v15061_v3  ;;  %v2286_v18 = vand.u32 4294901760, %v2253_v33  ;;  %v2290_v40 = vand.u32 4294901760, %v2261_v63  ;;  %v11331_v1 = vsub.f32 %v2245_v48, %v2282_v58  ;;  %v11409_v48 = vld [vmem:[%s15052_s4 + $0x90] sm:$0xff] }
  0x4d   :  { %1780 = vmatmul.mubr.f32.vlgmr.msra.gmra.mrb[4].mxu1 %v10887_v19  ;;  %9547 = vmatprep.subr.bf16.mxu0 %v9546_v41  ;;  %v9594_v19 = vpack.c.bf16 %v11152_v6, %v11149_v30  ;;  %v2294_v41 = vand.u32 4294901760, %v2269_v29  ;;  %v11341_v30 = vsub.f32 %v2278_v43, %v11303_v26  ;;  %v2378_v6 = vand.u32 4294901760, %v11301_v60 }
  0x4e   :  { %9585 = vmatpush1.bf16.msra.mxu1 %v9584_v25  ;;  %1890 = vmatprep.mubr.f32.mxu1 %v15061_v3  ;;  %v2366_v25 = vand.u32 4294901760, %v11287_v44  ;;  %v11333_v35 = vsub.f32 %v2253_v33, %v2286_v18  ;;  %v11347_v8 = vpack.c.bf16 %v2286_v18, %v2282_v58  ;;  %v11414_v33 = vld [vmem:[%s15052_s4 + $0xd0] sm:$0xff] }
  0x4f   :  { %9587 = vmatprep.subr.bf16.mxu1 %v9586_v27  ;;  %v11352_v32 = vpack.c.bf16 %v2294_v41, %v2290_v40  ;;  %v11369_v27 = vsub.f32 %v2261_v63, %v2290_v40  ;;  %v2379_v31 = vsub.f32 %v11301_v60, %v2378_v6 }
  0x50   :  { %9549 = vmatpush1.bf16.msra.mxu0 %v9548_v23  ;;  %v2367_v46 = vsub.f32 %v11287_v44, %v2366_v25  ;;  %v11371_v23 = vsub.f32 %v2269_v29, %v2294_v41 }
  0x51   :  { %9551 = vmatprep.subr.bf16.mxu0 %v11053_v59  ;;  %v2396_v43 = vand.u32 4294901760, %v11369_v27  ;;  %v2380_v18 = vand.u32 4294901760, %v2379_v31 }
  0x52   :  { %9589 = vmatpush1.bf16.msra.mxu1 %v9588_v7  ;;  %v2372_v7 = vand.u32 4294901760, %v11331_v1  ;;  %v2368_v51 = vand.u32 4294901760, %v2367_v46 }
  0x53   :  { %1438 = vmatmul.mubr.f32.vlgmr.msra.gmra.mrb[2].mxu0 %v10845_v52  ;;  %9591 = vmatprep.subr.bf16.mxu1 %v9590_v49  ;;  %v2384_v49 = vand.u32 4294901760, %v11333_v35 }
  0x54   :  { %9553 = vmatpush1.bf16.msra.mxu0 %v11055_v0  ;;  %1516 = vmatprep.mubr.f32.mxu0 %v15061_v3  ;;  %v2373_v11 = vsub.f32 %v11331_v1, %v2372_v7 }
  0x55   :  { %1892 = vmatmul.mubr.f32.vlgmr.msra.gmra.mrb[4].mxu1 %v10826_v45  ;;  %9555 = vmatprep.subr.bf16.mxu0 %v11098_v4 }
  0x56   :  { %9593 = vmatpush1.bf16.msra.mxu1 %v9592_v20  ;;  %1978 = vmatprep.mubr.f32.mxu1 %v15061_v3  ;;  %v11378_v20 = vld [vmem:[%s15052_s4 + $0x98] sm:$0xff] }
  0x57   :  { %9595 = vmatprep.subr.bf16.mxu1 %v9594_v19  ;;  %v11383_v19 = vld [vmem:[%s15052_s4 + $0xd8] sm:$0xff] }
  0x58   :  { %9557 = vmatpush1.bf16.msra.mxu0 %v11100_v5  ;;  %v2835_v38 = vand.u32 4294901760, %v11383_v19 }
  0x59   :  { %9559 = vmatprep.subr.bf16.mxu0 %v9558_v56  ;;  %v2390_v56 = vand.u32 4294901760, %v11336_v39 }
  0x5a   :  { %9597 = vmatpush1.bf16.msra.mxu1 %v9596_v15  ;;  %v11448_v40 = vsub.f32 %v11383_v19, %v2835_v38 }
  0x5b   :  { %1520 = vmatmul.mubr.f32.vlgmr.msra.gmra.mrb[2].mxu0 %v10859_v62  ;;  %9599 = vmatprep.subr.bf16.mxu1 %v11166_v57 }
  0x5c   :  { %9561 = vmatpush1.bf16.msra.mxu0 %v9560_v37  ;;  %1614 = vmatprep.mubr.f32.mxu0 %v15061_v3  ;;  %v11402_v37 = vsub.f32 %v2256_v9, %v2827_v61  ;;  %v2374_v9 = vand.u32 4294901760, %v2373_v11  ;;  %v2945_v11 = vand.u32 4294901760, %v11448_v40 }
  0x5d   :  { %1981 = vmatmul.mubr.f32.vlgmr.msra.gmra.mrb[4].mxu1 %v10845_v52  ;;  %9563 = vmatprep.subr.bf16.mxu0 %v9562_v55  ;;  %v9608_v52 = vpack.c.bf16 %v1806_v12, %v1794_v21  ;;  %v11338_v21 = vsub.f32 %v2270_v34, %v2292_v50  ;;  %v2823_v12 = vand.u32 4294901760, %v2248_v13  ;;  %v2831_v55 = vand.u32 4294901760, %v11378_v20 }
  0x5e   :  { %9601 = vmatpush1.bf16.msra.mxu1 %v11188_v22  ;;  %2059 = vmatprep.mubr.f32.mxu1 %v15061_v3  ;;  %v2385_v34 = vsub.f32 %v11333_v35, %v2384_v49 }
  0x5f   :  { %9603 = vmatprep.subr.bf16.mxu1 %v11190_v24  ;;  %v2402_v15 = vand.u32 4294901760, %v11338_v21  ;;  %v11396_v14 = vpack.c.bf16 %v2827_v61, %v2823_v12  ;;  %v11398_v17 = vsub.f32 %v2248_v13, %v2823_v12  ;;  %v15060_v13 = vand.u32 4294901760, %v11402_v37 }
  0x60   :  { %9565 = vmatpush1.bf16.msra.mxu0 %v9564_v54  ;;  %v2408_v54 = vand.u32 4294901760, %v11371_v23  ;;  %v9630_v61 = vpack.c.bf16 %v2380_v18, %v2368_v51 }
  0x61   :  { %9567 = vmatprep.subr.bf16.mxu0 %v11053_v59  ;;  %v11350_v59 = vpack.c.bf16 %v2292_v50, %v2288_v47  ;;  %v2403_v63 = vsub.f32 %v11338_v21, %v2402_v15  ;;  %v2833_v50 = vand.u32 4294901760, %v11409_v48  ;;  %v2909_v41 = vand.u32 4294901760, %v11398_v17 }
  0x62   :  { %9605 = vmatpush1.bf16.msra.mxu1 %v11211_v42 }
  0x63   :  { %1616 = vmatmul.mubr.f32.vlgmr.msra.gmra.mrb[2].mxu0 %v10826_v45  ;;  %9607 = vmatprep.subr.bf16.mxu1 %v9606_v16  ;;  %v2837_v16 = vand.u32 4294901760, %v11414_v33  ;;  %v2910_v51 = vsub.f32 %v11398_v17, %v2909_v41 }
  0x64   :  { %9569 = vmatpush1.bf16.msra.mxu0 %v11055_v0  ;;  %1694 = vmatprep.mubr.f32.mxu0 %v15061_v3  ;;  %v11388_v0 = vand.u32 4294901760, %v11341_v30 }
  0x65   :  { %2063 = vmatmul.mubr.f32.vlgmr.msra.gmra.mrb[4].mxu1 %v10859_v62  ;;  %9571 = vmatprep.subr.bf16.mxu0 %v11098_v4  ;;  %v2825_v62 = vand.u32 4294901760, %v11360_v53  ;;  %v2829_v4 = vand.u32 4294901760, %v11365_v28 }
  0x66   :  { %9609 = vmatpush1.bf16.msra.mxu1 %v9608_v52  ;;  %2157 = vmatprep.mubr.f32.mxu1 %v15061_v3  ;;  %v2356_v58 = vsub.f32 %v11341_v30, %v11388_v0  ;;  %v11445_v52 = vsub.f32 %v11378_v20, %v2831_v55  ;;  %v11470_v20 = vsub.f32 %v11414_v33, %v2837_v16 }
  0x67   :  { %9611 = vmatprep.subr.bf16.mxu1 %v9610_v10  ;;  %v11435_v29 = vsub.f32 %v11360_v53, %v2825_v62  ;;  %v11438_v47 = vsub.f32 %v11365_v28, %v2829_v4  ;;  %v2386_v10 = vand.u32 4294901760, %v2385_v34  ;;  %v2404_v53 = vand.u32 4294901760, %v2403_v63 }
  0x68   :  { %9573 = vmatpush1.bf16.msra.mxu0 %v11100_v5  ;;  %v2391_v5 = vsub.f32 %v11336_v39, %v2390_v56  ;;  %v11462_v12 = vand.u32 4294901760, %v2356_v58  ;;  %v11467_v28 = vsub.f32 %v11409_v48, %v2833_v50  ;;  %v2933_v48 = vand.u32 4294901760, %v11445_v52 }
  0x69   :  { %9623 = vmatprep.subr.bf16.mxu0 %v11345_v2  ;;  %v2915_v19 = vand.u32 4294901760, %v11435_v29  ;;  %v2927_v31 = vand.u32 4294901760, %v11438_v47  ;;  %v9632_v33 = vpack.c.bf16 %v2386_v10, %v2374_v9  ;;  %v11484_v18 = vpack.c.bf16 %v2829_v4, %v2825_v62 }
  0x6a   :  { %9613 = vmatpush1.bf16.msra.mxu1 %v9612_v36  ;;  %v2409_v36 = vsub.f32 %v11371_v23, %v2408_v54  ;;  %v2392_v46 = vand.u32 4294901760, %v2391_v5  ;;  %v11486_v5 = vpack.c.bf16 %v2835_v38, %v2831_v55  ;;  %v2939_v9 = vand.u32 4294901760, %v11467_v28 }
  0x6b   :  { %1696 = vmatmul.mubr.f32.vlgmr.msra.gmra.mrb[2].mxu0 %v10826_v45  ;;  %9615 = vmatprep.subr.bf16.mxu1 %v11166_v57  ;;  %v2397_v57 = vsub.f32 %v11369_v27, %v2396_v43  ;;  %v2916_v63 = vsub.f32 %v11435_v29, %v2915_v19  ;;  %v2951_v10 = vand.u32 4294901760, %v11470_v20  ;;  %v2911_v62 = vand.u32 4294901760, %v2910_v51 }
  0x6c   :  { %9625 = vmatpush1.bf16.msra.mxu0 %v11347_v8  ;;  %2352 = vmatprep.mubr.f32.mxu0 %v15061_v3  ;;  %v2410_v58 = vand.u32 4294901760, %v2409_v36  ;;  %v2946_v55 = vsub.f32 %v11448_v40, %v2945_v11  ;;  %v9638_v36 = vpack.c.bf16 %v11301_v60, %v11287_v44  ;;  %v9656_v44 = vpack.c.bf16 %v2384_v49, %v2372_v7 }
  0x6d   :  { %2159 = vmatmul.mubr.f32.vlgmr.msra.gmra.mrb[4].mxu1 %v10826_v45  ;;  %9627 = vmatprep.subr.bf16.mxu0 %v11350_v59  ;;  %v2398_v34 = vand.u32 4294901760, %v2397_v57  ;;  %v11507_v57 = vpack.c.bf16 %v2837_v16, %v2833_v50  ;;  %v9658_v60 = vpack.c.bf16 %v2402_v15, %v2390_v56 }
  0x6e   :  { %9617 = vmatpush1.bf16.msra.mxu1 %v11188_v22  ;;  %2237 = vmatprep.mubr.f32.mxu1 %v15061_v3  ;;  %v2922_v22 = vsub.f32 %v11402_v37, %v15060_v13  ;;  %v2928_v13 = vsub.f32 %v11438_v47, %v2927_v31  ;;  %v2947_v51 = vand.u32 4294901760, %v2946_v55  ;;  %v9690_v55 = vpack.c.bf16 %v11448_v40, %v11445_v52  ;;  %v11651_v40 = vld [vmem:[%s15052_s4 + $0x70] sm:$0xff] }
  0x6f   :  { %9619 = vmatprep.subr.bf16.mxu1 %v11190_v24  ;;  %v9634_v24 = vpack.c.bf16 %v2404_v53, %v2392_v46  ;;  %v9636_v38 = vpack.c.bf16 %v2410_v58, %v2398_v34  ;;  %v2940_v53 = vsub.f32 %v11467_v28, %v2939_v9 }
  0x70   :  { %9629 = vmatpush1.bf16.msra.mxu0 %v11352_v32  ;;  %v2923_v4 = vand.u32 4294901760, %v2922_v22  ;;  %v2929_v46 = vand.u32 4294901760, %v2928_v13  ;;  %v9640_v22 = vpack.c.bf16 %v11333_v35, %v11331_v1  ;;  %v9642_v13 = vpack.c.bf16 %v11338_v21, %v11336_v39  ;;  %v2266_v1 = vld [vmem:[%s15052_s4 + $0xa8] sm:$0xff] }
  0x71   :  { %9631 = vmatprep.subr.bf16.mxu0 %v9630_v61  ;;  %v2917_v61 = vand.u32 4294901760, %v2916_v63  ;;  %v2941_v34 = vand.u32 4294901760, %v2940_v53  ;;  %v9644_v63 = vpack.c.bf16 %v11371_v23, %v11369_v27  ;;  %v2249_v53 = vld [vmem:[%s15052_s4 + $0x20] sm:$0xff]  ;;  %v2274_v35 = vld [vmem:[%s15052_s4 + $0xe8] sm:$0xff]  ;;  %v9660_v39 = vpack.c.bf16 %v2408_v54, %v2396_v43 }
  0x72   :  { %9621 = vmatpush1.bf16.msra.mxu1 %v11211_v42  ;;  %v2934_v42 = vsub.f32 %v11445_v52, %v2933_v48  ;;  %v9678_v50 = vpack.c.bf16 %v2923_v4, %v2911_v62  ;;  %v9686_v4 = vpack.c.bf16 %v11402_v37, %v11398_v17  ;;  %v3368_v21 = vand.u32 4294901760, %v2249_v53  ;;  %v2265_v27 = vld [vmem:[%s15052_s4 + $0xa0] sm:$0xff]  ;;  %v11646_v52 = vld [vmem:[%s15052_s4 + $0x30] sm:$0xff] }
  0x73   :  { %2358 = vmatmul.mubr.f32.vlgmr.msra.gmra.mrb[4].mxu0 %v11462_v12  ;;  %9671 = vmatprep.subr.bf16.mxu1 %v11396_v14  ;;  %v3374_v15 = vand.u32 4294901760, %v2266_v1  ;;  %v2273_v23 = vld [vmem:[%s15052_s4 + $0xe0] sm:$0xff]  ;;  %v15349_v43 = vand.u32 4294901760, %v11402_v37 }
  0x74   :  { %9633 = vmatpush1.bf16.msra.mxu0 %v9632_v33  ;;  %2468 = vmatprep.mubr.f32.mxu0 %v15061_v3  ;;  %v2935_v16 = vand.u32 4294901760, %v2934_v42  ;;  %v9680_v33 = vpack.c.bf16 %v2929_v46, %v2917_v61  ;;  %v9688_v42 = vpack.c.bf16 %v11438_v47, %v11435_v29  ;;  %v2250_v61 = vld [vmem:[%s15052_s4 + $0x28] sm:$0xff] }
  0x75   :  { %2239 = vmatmul.mubr.f32.vlgmr.msra.gmra.mrb[4].mxu1 %v10826_v45  ;;  %9635 = vmatprep.subr.bf16.mxu0 %v9634_v24  ;;  %v2952_v45 = vsub.f32 %v11470_v20, %v2951_v10  ;;  %v2258_v46 = vld [vmem:[%s15052_s4 + $0x68] sm:$0xff]  ;;  %v9702_v54 = vpack.c.bf16 %v15349_v43, %v2909_v41  ;;  %v11617_v17 = vsub.f32 %v2266_v1, %v3374_v15 }
  0x76   :  { %9673 = vmatpush1.bf16.msra.mxu1 %v11484_v18  ;;  %2895 = vmatprep.mubr.f32.mxu1 %v15061_v3  ;;  %v9682_v24 = vpack.c.bf16 %v2947_v51, %v2935_v16  ;;  %v11602_v16 = vsub.f32 %v2249_v53, %v3368_v21 }
  0x77   :  { %9675 = vmatprep.subr.bf16.mxu1 %v11486_v5  ;;  %v2953_v58 = vand.u32 4294901760, %v2952_v45  ;;  %v2257_v45 = vld [vmem:[%s15052_s4 + $0x60] sm:$0xff] }
  0x78   :  { %9637 = vmatpush1.bf16.msra.mxu0 %v9636_v38  ;;  %v9654_v38 = vpack.c.bf16 %v2378_v6, %v2366_v25  ;;  %v3366_v25 = vand.u32 4294901760, %v2250_v61  ;;  %v3370_v6 = vand.u32 4294901760, %v2258_v46  ;;  %v3372_v7 = vand.u32 4294901760, %v2257_v45 }
  0x79   :  { %9639 = vmatprep.subr.bf16.mxu0 %v9638_v36  ;;  %v9684_v62 = vpack.c.bf16 %v2953_v58, %v2941_v34  ;;  %v9692_v36 = vpack.c.bf16 %v11470_v20, %v11467_v28  ;;  %v11614_v34 = vld [vmem:[%s15052_s4 + $0x78] sm:$0xff] }
  0x7a   :  { %9677 = vmatpush1.bf16.msra.mxu1 %v11507_v57  ;;  %v11585_v49 = vsub.f32 %v2250_v61, %v3366_v25  ;;  %v11587_v56 = vsub.f32 %v2258_v46, %v3370_v6  ;;  %v11604_v51 = vsub.f32 %v2257_v45, %v3372_v7  ;;  %v3913_v47 = vand.u32 4294901760, %v11614_v34 }
  0x7b   :  { %2470 = vmatmul.mubr.f32.vlgmr.msra.gmra.mrb[4].mxu0 %v11303_v26  ;;  %9679 = vmatprep.subr.bf16.mxu1 %v9678_v50  ;;  %v3378_v50 = vand.u32 4294901760, %v2274_v35 }
  0x7c   :  { %9641 = vmatpush1.bf16.msra.mxu0 %v9640_v22  ;;  %2556 = vmatprep.mubr.f32.mxu0 %v15061_v3  ;;  %v3376_v22 = vand.u32 4294901760, %v2265_v27  ;;  %v3452_v41 = vand.u32 4294901760, %v11585_v49  ;;  %v3464_v58 = vand.u32 4294901760, %v11587_v56  ;;  %v11692_v46 = vsub.f32 %v11614_v34, %v3913_v47 }
  0x7d   :  { %2901 = vmatmul.mubr.f32.vlgmr.msra.gmra.mrb[6].mxu1 %v11462_v12  ;;  %9643 = vmatprep.subr.bf16.mxu0 %v9642_v13  ;;  %v3380_v13 = vand.u32 4294901760, %v2273_v23  ;;  %v11619_v37 = vsub.f32 %v2274_v35, %v3378_v50 }
  0x7e   :  { %9681 = vmatpush1.bf16.msra.mxu1 %v9680_v33  ;;  %3011 = vmatprep.mubr.f32.mxu1 %v15061_v3  ;;  %v11609_v33 = vld [vmem:[%s15052_s4 + $0x38] sm:$0xff]  ;;  %v11655_v28 = vsub.f32 %v2265_v27, %v3376_v22 }
  0x7f   :  { %9683 = vmatprep.subr.bf16.mxu1 %v9682_v24  ;;  %v9704_v24 = vpack.c.bf16 %v2927_v31, %v2915_v19  ;;  %v3909_v29 = vand.u32 4294901760, %v11609_v33  ;;  %v11657_v20 = vsub.f32 %v2273_v23, %v3380_v13  ;;  %v3458_v19 = vand.u32 4294901760, %v11602_v16 }
  0x80   :  { %9645 = vmatpush1.bf16.msra.mxu0 %v9644_v63  ;;  %v9708_v63 = vpack.c.bf16 %v2951_v10, %v2939_v9  ;;  %v3470_v31 = vand.u32 4294901760, %v11604_v51  ;;  %v3465_v9 = vsub.f32 %v11587_v56, %v3464_v58  ;;  %v3476_v10 = vand.u32 4294901760, %v11617_v17 }
  0x81   :  { %9647 = vmatprep.subr.bf16.mxu0 %v11345_v2  ;;  %v11689_v61 = vsub.f32 %v11609_v33, %v3909_v29  ;;  %v3459_v53 = vsub.f32 %v11602_v16, %v3458_v19  ;;  %v3482_v1 = vand.u32 4294901760, %v11655_v28  ;;  %v3494_v35 = vand.u32 4294901760, %v11657_v20 }
  0x82   :  { %9685 = vmatpush1.bf16.msra.mxu1 %v9684_v62  ;;  %v11637_v62 = vpack.c.bf16 %v3370_v6, %v3366_v25  ;;  %v11699_v25 = vld [vmem:[%s15052_s4 + $0xb0] sm:$0xff]  ;;  %v3471_v45 = vsub.f32 %v11604_v51, %v3470_v31 }
  0x83   :  { %2559 = vmatmul.mubr.f32.vlgmr.msra.gmra.mrb[4].mxu0 %v11341_v30  ;;  %9687 = vmatprep.subr.bf16.mxu1 %v9686_v4  ;;  %v11639_v4 = vpack.c.bf16 %v3372_v7, %v3368_v21  ;;  %v11704_v6 = vld [vmem:[%s15052_s4 + $0xf0] sm:$0xff]  ;;  %v3466_v21 = vand.u32 4294901760, %v3465_v9  ;;  %v3919_v27 = vand.u32 4294901760, %v11699_v25  ;;  %v3460_v33 = vand.u32 4294901760, %v3459_v53 }
  0x84   :  { %9649 = vmatpush1.bf16.msra.mxu0 %v11347_v8  ;;  %2637 = vmatprep.mubr.f32.mxu0 %v15061_v3  ;;  %v3923_v23 = vand.u32 4294901760, %v11704_v6  ;;  %v3472_v34 = vand.u32 4294901760, %v3471_v45 }
  0x85   :  { %3013 = vmatmul.mubr.f32.vlgmr.msra.gmra.mrb[6].mxu1 %v11303_v26  ;;  %9651 = vmatprep.subr.bf16.mxu0 %v11350_v59 }
  0x86   :  { %9689 = vmatpush1.bf16.msra.mxu1 %v9688_v42  ;;  %3099 = vmatprep.mubr.f32.mxu1 %v15061_v3  ;;  %v3488_v42 = vand.u32 4294901760, %v11619_v37 }
  0x87   :  { %9691 = vmatprep.subr.bf16.mxu1 %v9690_v55  ;;  %v11682_v55 = vpack.c.bf16 %v3378_v50, %v3374_v15 }
  0x88   :  { %9653 = vmatpush1.bf16.msra.mxu0 %v11352_v32  ;;  %v3489_v7 = vsub.f32 %v11619_v37, %v3488_v42 }
  0x89   :  { %9655 = vmatprep.subr.bf16.mxu0 %v9654_v38  ;;  %v11684_v38 = vpack.c.bf16 %v3380_v13, %v3376_v22  ;;  %v3995_v22 = vand.u32 4294901760, %v11689_v61  ;;  %v4007_v13 = vand.u32 4294901760, %v11692_v46 }
  0x8a   :  { %9693 = vmatpush1.bf16.msra.mxu1 %v9692_v36  ;;  %v3915_v36 = vand.u32 4294901760, %v11651_v40 }
  0x8b   :  { %2641 = vmatmul.mubr.f32.vlgmr.msra.gmra.mrb[4].mxu0 %v11388_v0  ;;  %9695 = vmatprep.subr.bf16.mxu1 %v11396_v14 }
  0x8c   :  { %9657 = vmatpush1.bf16.msra.mxu0 %v9656_v44  ;;  %2735 = vmatprep.mubr.f32.mxu0 %v15061_v3  ;;  %v11726_v50 = vsub.f32 %v11651_v40, %v3915_v36  ;;  %v3490_v40 = vand.u32 4294901760, %v3489_v7 }
  0x8d   :  { %3102 = vmatmul.mubr.f32.vlgmr.msra.gmra.mrb[6].mxu1 %v11341_v30  ;;  %9659 = vmatprep.subr.bf16.mxu0 %v9658_v60 }
  0x8e   :  { %9697 = vmatpush1.bf16.msra.mxu1 %v11484_v18  ;;  %3180 = vmatprep.mubr.f32.mxu1 %v15061_v3  ;;  %v4013_v9 = vand.u32 4294901760, %v11726_v50 }
  0x8f   :  { %9699 = vmatprep.subr.bf16.mxu1 %v11486_v5 }
  0x90   :  { %9661 = vmatpush1.bf16.msra.mxu0 %v9660_v39  ;;  %v4014_v7 = vsub.f32 %v11726_v50, %v4013_v9 }
  0x91   :  { %9663 = vmatprep.subr.bf16.mxu0 %v11345_v2  ;;  %v9706_v2 = vpack.c.bf16 %v2945_v11, %v2933_v48  ;;  %v11664_v48 = vld [vmem:[%s15052_s4 + $0xb8] sm:$0xff] }
  0x92   :  { %9701 = vmatpush1.bf16.msra.mxu1 %v11507_v57  ;;  %v11669_v11 = vld [vmem:[%s15052_s4 + $0xf8] sm:$0xff]  ;;  %v3917_v44 = vand.u32 4294901760, %v11664_v48 }
  0x93   :  { %2737 = vmatmul.mubr.f32.vlgmr.msra.gmra.mrb[4].mxu0 %v11303_v26  ;;  %9703 = vmatprep.subr.bf16.mxu1 %v9702_v54  ;;  %v3921_v60 = vand.u32 4294901760, %v11669_v11 }
  0x94   :  { %9665 = vmatpush1.bf16.msra.mxu0 %v11347_v8  ;;  %2815 = vmatprep.mubr.f32.mxu0 %v15061_v3  ;;  %v3453_v8 = vsub.f32 %v11585_v49, %v3452_v41  ;;  %v11733_v43 = vsub.f32 %v11664_v48, %v3917_v44  ;;  %v11755_v48 = vsub.f32 %v11699_v25, %v3919_v27 }
  0x95   :  { %3184 = vmatmul.mubr.f32.vlgmr.msra.gmra.mrb[6].mxu1 %v11388_v0  ;;  %9667 = vmatprep.subr.bf16.mxu0 %v11350_v59  ;;  %v3911_v59 = vand.u32 4294901760, %v11646_v52  ;;  %v11736_v54 = vsub.f32 %v11669_v11, %v3921_v60  ;;  %v11758_v11 = vsub.f32 %v11704_v6, %v3923_v23  ;;  %v9728_v6 = vpack.c.bf16 %v3472_v34, %v3460_v33 }
  0x96   :  { %9705 = vmatpush1.bf16.msra.mxu1 %v9704_v24  ;;  %3278 = vmatprep.mubr.f32.mxu1 %v15061_v3  ;;  %v3454_v39 = vand.u32 4294901760, %v3453_v8  ;;  %v3495_v24 = vsub.f32 %v11657_v20, %v3494_v35  ;;  %v4025_v33 = vand.u32 4294901760, %v11755_v48 }
  0x97   :  { %9707 = vmatprep.subr.bf16.mxu1 %v9706_v2  ;;  %v11723_v15 = vsub.f32 %v11646_v52, %v3911_v59  ;;  %v4031_v25 = vand.u32 4294901760, %v11736_v54  ;;  %v4037_v34 = vand.u32 4294901760, %v11758_v11 }
  0x98   :  { %9669 = vmatpush1.bf16.msra.mxu0 %v11352_v32  ;;  %v3477_v32 = vsub.f32 %v11617_v17, %v3476_v10  ;;  %v9726_v2 = vpack.c.bf16 %v3466_v21, %v3454_v39  ;;  %v3496_v45 = vand.u32 4294901760, %v3495_v24  ;;  %v11772_v39 = vpack.c.bf16 %v3915_v36, %v3911_v59 }
  0x99   :  { %9719 = vmatprep.subr.bf16.mxu0 %v11637_v62  ;;  %v4001_v8 = vand.u32 4294901760, %v11723_v15  ;;  %v11774_v21 = vpack.c.bf16 %v3921_v60, %v3917_v44  ;;  %v4032_v44 = vsub.f32 %v11736_v54, %v4031_v25  ;;  %v9734_v24 = vpack.c.bf16 %v11587_v56, %v11585_v49 }
  0x9a   :  { %9709 = vmatpush1.bf16.msra.mxu1 %v9708_v63  ;;  %v11750_v63 = vpack.c.bf16 %v3913_v47, %v3909_v29  ;;  %v3478_v52 = vand.u32 4294901760, %v3477_v32  ;;  %v3996_v29 = vsub.f32 %v11689_v61, %v3995_v22  ;;  %v4019_v47 = vand.u32 4294901760, %v11733_v43 }
  0x9b   :  { %2817 = vmatmul.mubr.f32.vlgmr.msra.gmra.mrb[4].mxu0 %v11303_v26  ;;  %9711 = vmatprep.subr.bf16.mxu1 %v11396_v14  ;;  %v3483_v14 = vsub.f32 %v11655_v28, %v3482_v1  ;;  %v4002_v32 = vsub.f32 %v11723_v15, %v4001_v8  ;;  %v9754_v49 = vpack.c.bf16 %v3488_v42, %v3476_v10 }
  0x9c   :  { %9721 = vmatpush1.bf16.msra.mxu0 %v11639_v4  ;;  %3438 = vmatprep.mubr.f32.mxu0 %v15061_v3  ;;  %v3997_v59 = vand.u32 4294901760, %v3996_v29  ;;  %v4038_v29 = vsub.f32 %v11758_v11, %v4037_v34  ;;  %v9756_v56 = vpack.c.bf16 %v3494_v35, %v3482_v1  ;;  %v9804_v10 = vpack.c.bf16 %v4037_v34, %v4025_v33  ;;  %v11915_v1 = vld [vmem:[%s15054_s5 + $0x10] sm:$0xff]  ;;  %v11920_v35 = vld [vmem:[%s15054_s5 + $0x18] sm:$0xff] }
  0x9d   :  { %3280 = vmatmul.mubr.f32.vlgmr.msra.gmra.mrb[6].mxu1 %v11303_v26  ;;  %9723 = vmatprep.subr.bf16.mxu0 %v11682_v55  ;;  %v3484_v53 = vand.u32 4294901760, %v3483_v14  ;;  %v11795_v14 = vpack.c.bf16 %v3923_v23, %v3919_v27 }
  0x9e   :  { %9713 = vmatpush1.bf16.msra.mxu1 %v11484_v18  ;;  %3358 = vmatprep.mubr.f32.mxu1 %v15061_v3  ;;  %v4008_v18 = vsub.f32 %v11692_v46, %v4007_v13 }
  0x9f   :  { %9715 = vmatprep.subr.bf16.mxu1 %v11486_v5  ;;  %v9730_v5 = vpack.c.bf16 %v3490_v40, %v3478_v52  ;;  %v9732_v60 = vpack.c.bf16 %v3496_v45, %v3484_v53  ;;  %v4015_v52 = vand.u32 4294901760, %v4014_v7  ;;  %v4026_v40 = vsub.f32 %v11755_v48, %v4025_v33 }
  0xa0   :  { %9725 = vmatpush1.bf16.msra.mxu0 %v11684_v38  ;;  %v4009_v36 = vand.u32 4294901760, %v4008_v18  ;;  %v4033_v18 = vand.u32 4294901760, %v4032_v44  ;;  %v9738_v53 = vpack.c.bf16 %v11619_v37, %v11617_v17  ;;  %v9784_v44 = vpack.c.bf16 %v11726_v50, %v11723_v15  ;;  %v11874_v17 = vld [vmem:[%s15054_s5 + $0x88] sm:$0xff]  ;;  %v11879_v37 = vld [vmem:[%s15054_s5] sm:$0xff] }
  0xa1   :  { %9727 = vmatprep.subr.bf16.mxu0 %v9726_v2  ;;  %v4003_v2 = vand.u32 4294901760, %v4002_v32  ;;  %v4039_v32 = vand.u32 4294901760, %v4038_v29 }
  0xa2   :  { %9717 = vmatpush1.bf16.msra.mxu1 %v11507_v57  ;;  %v4020_v57 = vsub.f32 %v11733_v43, %v4019_v47  ;;  %v9774_v27 = vpack.c.bf16 %v4009_v36, %v3997_v59  ;;  %v9740_v59 = vpack.c.bf16 %v11657_v20, %v11655_v28  ;;  %v4647_v28 = vand.u32 4294901760, %v11874_v17  ;;  %v11891_v20 = vld [vmem:[%s15054_s5 + $0x8] sm:$0xff] }
  0xa3   :  { %3444 = vmatmul.mubr.f32.vlgmr.msra.gmra.mrb[6].mxu0 %v11462_v12  ;;  %9767 = vmatprep.subr.bf16.mxu1 %v11750_v63  ;;  %v9776_v45 = vpack.c.bf16 %v4015_v52, %v4003_v2  ;;  %v9752_v2 = vpack.c.bf16 %v3470_v31, %v3458_v19  ;;  %v4596_v19 = vand.u32 4294901760, %v11879_v37  ;;  %v11902_v31 = vld [vmem:[%s15054_s5 + $0x98] sm:$0xff]  ;;  %v4599_v42 = vand.u32 4294901760, %v11891_v20 }
  0xa4   :  { %9729 = vmatpush1.bf16.msra.mxu0 %v9728_v6  ;;  %3554 = vmatprep.mubr.f32.mxu0 %v15061_v3  ;;  %v4021_v23 = vand.u32 4294901760, %v4020_v57  ;;  %v9736_v6 = vpack.c.bf16 %v11604_v51, %v11602_v16  ;;  %v9782_v57 = vpack.c.bf16 %v11692_v46, %v11689_v61  ;;  %v9798_v16 = vpack.c.bf16 %v4007_v13, %v3995_v22 }
  0xa5   :  { %3360 = vmatmul.mubr.f32.vlgmr.msra.gmra.mrb[6].mxu1 %v11303_v26  ;;  %9731 = vmatprep.subr.bf16.mxu0 %v9730_v5  ;;  %v4027_v5 = vand.u32 4294901760, %v4026_v40  ;;  %v9800_v51 = vpack.c.bf16 %v4013_v9, %v4001_v8  ;;  %v4653_v46 = vand.u32 4294901760, %v11902_v31  ;;  %v11931_v50 = vsub.f32 %v11874_v17, %v4647_v28 }
  0xa6   :  { %9769 = vmatpush1.bf16.msra.mxu1 %v11772_v39  ;;  %3981 = vmatprep.mubr.f32.mxu1 %v15061_v3  ;;  %v9778_v7 = vpack.c.bf16 %v4033_v18, %v4021_v23  ;;  %v11944_v22 = vsub.f32 %v11891_v20, %v4599_v42 }
  0xa7   :  { %9771 = vmatprep.subr.bf16.mxu1 %v11774_v21  ;;  %v9780_v36 = vpack.c.bf16 %v4039_v32, %v4027_v5  ;;  %v15085_v8 = vand.u32 4294901760, %v11931_v50 }
  0xa8   :  { %9733 = vmatpush1.bf16.msra.mxu0 %v9732_v60  ;;  %v9750_v60 = vpack.c.bf16 %v3464_v58, %v3452_v41  ;;  %v9802_v41 = vpack.c.bf16 %v4031_v25, %v4019_v47  ;;  %v15080_v25 = vand.u32 4294901760, %v11944_v22 }
  0xa9   :  { %9735 = vmatprep.subr.bf16.mxu0 %v9734_v24  ;;  %v9788_v24 = vpack.c.bf16 %v11758_v11, %v11755_v48  ;;  %v11954_v48 = vsub.f32 %v11902_v31, %v4653_v46  ;;  %v4605_v11 = vand.u32 4294901760, %v11920_v35  ;;  %v4830_v52 = vsub.f32 %v11931_v50, %v15085_v8  ;;  %v12090_v31 = vld [vmem:[%s15054_s5 + $0x38] sm:$0xff]  ;;  %v4474_v8 = vld [vmem:[%s15054_s5 + $0x70] sm:$0xff] }
  0xaa   :  { %9773 = vmatpush1.bf16.msra.mxu1 %v11795_v14 }
  0xab   :  { %3556 = vmatmul.mubr.f32.vlgmr.msra.gmra.mrb[6].mxu0 %v11303_v26  ;;  %9775 = vmatprep.subr.bf16.mxu1 %v9774_v27  ;;  %v11974_v33 = vsub.f32 %v11920_v35, %v4605_v11  ;;  %v4718_v27 = vsub.f32 %v11944_v22, %v15080_v25 }
  0xac   :  { %9737 = vmatpush1.bf16.msra.mxu0 %v9736_v6  ;;  %3642 = vmatprep.mubr.f32.mxu0 %v15061_v3 }
  0xad   :  { %3987 = vmatmul.mubr.f32.vlgmr.msra.gmra.mrb[8].mxu1 %v11462_v12  ;;  %9739 = vmatprep.subr.bf16.mxu0 %v9738_v53  ;;  %v9786_v12 = vpack.c.bf16 %v11736_v54, %v11733_v43  ;;  %v11936_v43 = vsub.f32 %v11879_v37, %v4596_v19  ;;  %v4602_v54 = vand.u32 4294901760, %v11915_v1  ;;  %v15076_v6 = vand.u32 4294901760, %v11974_v33  ;;  %v12000_v53 = vld [vmem:[%s15054_s5 + $0xa0] sm:$0xff] }
  0xae   :  { %9777 = vmatpush1.bf16.msra.mxu1 %v9776_v45  ;;  %4097 = vmatprep.mubr.f32.mxu1 %v15061_v3  ;;  %v4831_v45 = vand.u32 4294901760, %v4830_v52  ;;  %v12059_v52 = vld [vmem:[%s15054_s5 + $0x30] sm:$0xff] }
  0xaf   :  { %9779 = vmatprep.subr.bf16.mxu1 %v9778_v7  ;;  %v15084_v9 = vand.u32 4294901760, %v11936_v43  ;;  %v11965_v47 = vsub.f32 %v11915_v1, %v4602_v54  ;;  %v12008_v7 = vld [vmem:[%s15054_s5 + $0xa8] sm:$0xff] }
  0xb0   :  { %9741 = vmatpush1.bf16.msra.mxu0 %v9740_v59  ;;  %v4719_v59 = vand.u32 4294901760, %v4718_v27 }
  0xb1   :  { %9743 = vmatprep.subr.bf16.mxu0 %v11637_v62  ;;  %v4711_v40 = vsub.f32 %v11936_v43, %v15084_v9  ;;  %v15077_v29 = vand.u32 4294901760, %v11965_v47 }
  0xb2   :  { %9781 = vmatpush1.bf16.msra.mxu1 %v9780_v36 }
  0xb3   :  { %3645 = vmatmul.mubr.f32.vlgmr.msra.gmra.mrb[6].mxu0 %v11341_v30  ;;  %9783 = vmatprep.subr.bf16.mxu1 %v9782_v57  ;;  %v4712_v5 = vand.u32 4294901760, %v4711_v40  ;;  %v4725_v32 = vsub.f32 %v11965_v47, %v15077_v29  ;;  %v12289_v29 = vld [vmem:[%s15054_s5 + $0x60] sm:$0xff] }
  0xb4   :  { %9745 = vmatpush1.bf16.msra.mxu0 %v11639_v4  ;;  %3723 = vmatprep.mubr.f32.mxu0 %v15061_v3 }
  0xb5   :  { %4099 = vmatmul.mubr.f32.vlgmr.msra.gmra.mrb[8].mxu1 %v11303_v26  ;;  %9747 = vmatprep.subr.bf16.mxu0 %v11682_v55 }
  0xb6   :  { %9785 = vmatpush1.bf16.msra.mxu1 %v9784_v44  ;;  %4185 = vmatprep.mubr.f32.mxu1 %v15061_v3  ;;  %v4732_v44 = vsub.f32 %v11974_v33, %v15076_v6 }
  0xb7   :  { %9787 = vmatprep.subr.bf16.mxu1 %v9786_v12  ;;  %v12016_v12 = vld [vmem:[%s15054_s5 + $0x20] sm:$0xff] }
  0xb8   :  { %9749 = vmatpush1.bf16.msra.mxu0 %v11684_v38 }
  0xb9   :  { %9751 = vmatprep.subr.bf16.mxu0 %v9750_v60  ;;  %v12021_v60 = vld [vmem:[%s15054_s5 + $0x28] sm:$0xff] }
  0xba   :  { %9789 = vmatpush1.bf16.msra.mxu1 %v9788_v24 }
  0xbb   :  { %3727 = vmatmul.mubr.f32.vlgmr.msra.gmra.mrb[6].mxu0 %v11388_v0  ;;  %9791 = vmatprep.subr.bf16.mxu1 %v11750_v63 }
  0xbc   :  { %9753 = vmatpush1.bf16.msra.mxu0 %v9752_v2  ;;  %3821 = vmatprep.mubr.f32.mxu0 %v15061_v3  ;;  %v4726_v2 = vand.u32 4294901760, %v4725_v32 }
  0xbd   :  { %4188 = vmatmul.mubr.f32.vlgmr.msra.gmra.mrb[8].mxu1 %v11341_v30  ;;  %9755 = vmatprep.subr.bf16.mxu0 %v9754_v49  ;;  %v11869_v30 = vld [vmem:[%s15054_s5 + $0x80] sm:$0xff] }
  0xbe   :  { %9793 = vmatpush1.bf16.msra.mxu1 %v11772_v39  ;;  %4266 = vmatprep.mubr.f32.mxu1 %v15061_v3  ;;  %v4644_v58 = vand.u32 4294901760, %v11869_v30 }
  0xbf   :  { %9795 = vmatprep.subr.bf16.mxu1 %v11774_v21 }
  0xc0   :  { %9757 = vmatpush1.bf16.msra.mxu0 %v9756_v56  ;;  %v11926_v15 = vsub.f32 %v11869_v30, %v4644_v58  ;;  %v12029_v49 = vpack.c.bf16 %v4647_v28, %v4644_v58  ;;  %v4656_v56 = vand.u32 4294901760, %v12000_v53  ;;  %v12041_v30 = vld [vmem:[%s15054_s5 + $0xb8] sm:$0xff]  ;;  %v12052_v58 = vpack.c.bf16 %v4599_v42, %v4596_v19 }
  0xc1   :  { %9759 = vmatprep.subr.bf16.mxu0 %v11637_v62  ;;  %v11897_v62 = vld [vmem:[%s15054_s5 + $0x90] sm:$0xff]  ;;  %v4608_v28 = vand.u32 4294901760, %v12016_v12 }
  0xc2   :  { %9797 = vmatpush1.bf16.msra.mxu1 %v11795_v14  ;;  %v4650_v61 = vand.u32 4294901760, %v11897_v62  ;;  %v12046_v17 = vsub.f32 %v12000_v53, %v4656_v56  ;;  %15350 = vst [vmem:[#allocation3_spill] sm:$0xff] %v12052_v58 }
  0xc3   :  { %3823 = vmatmul.mubr.f32.vlgmr.msra.gmra.mrb[6].mxu0 %v11303_v26  ;;  %9799 = vmatprep.subr.bf16.mxu1 %v9798_v16  ;;  %v12035_v16 = vld [vmem:[%s15054_s5 + $0xb0] sm:$0xff] }
  0xc4   :  { %9761 = vmatpush1.bf16.msra.mxu0 %v11639_v4  ;;  %3901 = vmatprep.mubr.f32.mxu0 %v15061_v3  ;;  %v11949_v13 = vsub.f32 %v11897_v62, %v4650_v61  ;;  %v15086_v4 = vand.u32 4294901760, %v11926_v15  ;;  %v12072_v20 = vpack.c.bf16 %v4653_v46, %v4650_v61  ;;  %v4662_v19 = vand.u32 4294901760, %v12035_v16 }
  0xc5   :  { %4270 = vmatmul.mubr.f32.vlgmr.msra.gmra.mrb[8].mxu1 %v11388_v0  ;;  %9763 = vmatprep.subr.bf16.mxu0 %v11682_v55  ;;  %v15078_v55 = vand.u32 4294901760, %v11954_v48  ;;  %v15073_v42 = vand.u32 4294901760, %v12046_v17  ;;  %v4665_v62 = vand.u32 4294901760, %v12041_v30  ;;  %v12103_v46 = vpack.c.bf16 %v4605_v11, %v4602_v54 }
  0xc6   :  { %9801 = vmatpush1.bf16.msra.mxu1 %v9800_v51  ;;  %4364 = vmatprep.mubr.f32.mxu1 %v15061_v3  ;;  %v15079_v0 = vand.u32 4294901760, %v11949_v13  ;;  %v4823_v34 = vsub.f32 %v11926_v15, %v15086_v4  ;;  %v9848_v51 = vpack.c.bf16 %v4719_v59, %v4712_v5  ;;  %15351 = vst [vmem:[#allocation4_spill] sm:$0xff] %v12072_v20  ;;  %v4617_v54 = vand.u32 4294901760, %v12090_v31 }
  0xc7   :  { %9803 = vmatprep.subr.bf16.mxu1 %v9802_v41  ;;  %v4844_v18 = vsub.f32 %v11954_v48, %v15078_v55  ;;  %v12097_v61 = vsub.f32 %v12035_v16, %v4662_v19  ;;  %15354 = vst [vmem:[#allocation7_spill] sm:$0xff] %v12103_v46  ;;  %v12222_v16 = vld [vmem:[%s15054_s5 + $0x58] sm:$0xff] }
  0xc8   :  { %9765 = vmatpush1.bf16.msra.mxu0 %v11684_v38  ;;  %v4837_v23 = vsub.f32 %v11949_v13, %v15079_v0  ;;  %v4824_v38 = vand.u32 4294901760, %v4823_v34  ;;  %v4611_v34 = vand.u32 4294901760, %v12021_v60 }
  0xc9   :  { %v4845_v57 = vand.u32 4294901760, %v4844_v18  ;;  %9815 = vmatprep.subr.bf16.mxu0 %v12029_v49  ;;  %v4851_v18 = vsub.f32 %v12046_v17, %v15073_v42  ;;  %v15066_v35 = vand.u32 4294901760, %v12097_v61 }
  0xca   :  { %9805 = vmatpush1.bf16.msra.mxu1 %v9804_v10  ;;  %v4838_v36 = vand.u32 4294901760, %v4837_v23  ;;  %v9846_v24 = vpack.c.bf16 %v4831_v45, %v4824_v38  ;;  %v4733_v10 = vand.u32 4294901760, %v4732_v44  ;;  %v12084_v27 = vsub.f32 %v12021_v60, %v4611_v34  ;;  %v12143_v60 = vld [vmem:[%s15054_s5 + $0xc0] sm:$0xff] }
  0xcb   :  { %3903 = vmatmul.mubr.f32.vlgmr.msra.gmra.mrb[6].mxu0 %v11303_v26  ;;  %9807 = vmatprep.subr.bf16.mxu1 %v11750_v63  ;;  %v4659_v63 = vand.u32 4294901760, %v12008_v7  ;;  %v4614_v23 = vand.u32 4294901760, %v12059_v52  ;;  %v12112_v45 = vsub.f32 %v12041_v30, %v4665_v62  ;;  %v4852_v5 = vand.u32 4294901760, %v4851_v18  ;;  %v12159_v18 = vld [vmem:[%s15054_s5 + $0x40] sm:$0xff] }
  0xcc   :  { %v9850_v41 = vpack.c.bf16 %v4845_v57, %v4838_v36  ;;  %v12063_v40 = vpack.c.bf16 %v4733_v10, %v4726_v2  ;;  %9817 = vmatpush3.bf16.msra.mxu0 %v12052_v58  ;;  %15353 = vst [vmem:[#allocation6_spill] sm:$0xff] %v12084_v27  ;;  %v15069_v38 = vand.u32 4294901760, %v12084_v27  ;;  %v4865_v36 = vsub.f32 %v12097_v61, %v15066_v35 }
  0xcd   :  { %4366 = vmatmul.mubr.f32.vlgmr.msra.gmra.mrb[8].mxu1 %v11303_v26  ;;  %v12066_v37 = vsub.f32 %v12008_v7, %v4659_v63  ;;  %9819 = vmatprep.subr.bf16.mxu0 %v12072_v20  ;;  %v12123_v11 = vsub.f32 %v12059_v52, %v4614_v23  ;;  %v15064_v7 = vand.u32 4294901760, %v12112_v45  ;;  %v12138_v44 = vsub.f32 %v12090_v31, %v4617_v54 }
  0xce   :  { %9809 = vmatpush1.bf16.msra.mxu1 %v11772_v39  ;;  %4444 = vmatprep.mubr.f32.mxu1 %v15061_v3  ;;  %v12081_v39 = vsub.f32 %v12016_v12, %v4608_v28  ;;  %v12154_v31 = vpack.c.bf16 %v4659_v63, %v4656_v56  ;;  %v4866_v3 = vand.u32 4294901760, %v4865_v36 }
  0xcf   :  { %9811 = vmatprep.subr.bf16.mxu1 %v11774_v21  ;;  %v15072_v21 = vand.u32 4294901760, %v12066_v37  ;;  %v15063_v57 = vand.u32 4294901760, %v12123_v11  ;;  %v4872_v30 = vsub.f32 %v12112_v45, %v15064_v7 }
  0xd0   :  { %15352 = vst [vmem:[#allocation5_spill] sm:$0xff] %v12081_v39  ;;  %v15070_v53 = vand.u32 4294901760, %v12081_v39  ;;  %9821 = vmatpush3.bf16.msra.mxu0 %v12103_v46  ;;  %15355 = vst [vmem:[#allocation8_spill] sm:$0xff] %v12154_v31 }
  0xd1   :  { %v4858_v1 = vsub.f32 %v12066_v37, %v15072_v21  ;;  %v4873_v63 = vand.u32 4294901760, %v4872_v30  ;;  %9823 = vmatprep.subr.bf16.mxu0 %v12154_v31 }
  0xd2   :  { %9813 = vmatpush1.bf16.msra.mxu1 %v11795_v14  ;;  %v4739_v32 = vsub.f32 %v12081_v39, %v15070_v53  ;;  %v4746_v14 = vsub.f32 %v12084_v27, %v15069_v38 }
  0xd3   :  { %9847 = vmatprep.subr.bf16.mxu1 %v9846_v24  ;;  %v4859_v59 = vand.u32 4294901760, %v4858_v1  ;;  %v12148_v24 = vld [vmem:[%s15054_s5 + $0xc8] sm:$0xff]  ;;  %v9858_v30 = vpack.c.bf16 %v4873_v63, %v4866_v3 }
  0xd4   :  { %v4740_v2 = vand.u32 4294901760, %v4739_v32  ;;  %v4747_v10 = vand.u32 4294901760, %v4746_v14  ;;  %v15065_v32 = vand.u32 4294901760, %v12138_v44  ;;  %v12168_v14 = vld [vmem:[%s15054_s5 + $0x48] sm:$0xff] }
  0xd5   :  { %4446 = vmatmul.mubr.f32.vlgmr.msra.gmra.mrb[8].mxu1 %v11303_v26  ;;  %v9854_v1 = vpack.c.bf16 %v4859_v59, %v4852_v5  ;;  %v4753_v26 = vsub.f32 %v12123_v11, %v15063_v57  ;;  %v4671_v5 = vand.u32 4294901760, %v12148_v24  ;;  %v12176_v59 = vld [vmem:[%s15054_s5 + $0xd0] sm:$0xff] }
  0xd6   :  { %9849 = vmatpush3.bf16.msra.mxu1 %v9848_v51  ;;  %v9856_v56 = vpack.c.bf16 %v4747_v10, %v4740_v2  ;;  %v4668_v51 = vand.u32 4294901760, %v12143_v60  ;;  %v4760_v57 = vsub.f32 %v12138_v44, %v15065_v32  ;;  %v4620_v2 = vand.u32 4294901760, %v12159_v18  ;;  %v12189_v10 = vld [vmem:[%s15054_s5 + $0xd8] sm:$0xff] }
  0xd7   :  { %9851 = vmatprep.subr.bf16.mxu1 %v9850_v41  ;;  %v4754_v36 = vand.u32 4294901760, %v4753_v26  ;;  %v12183_v41 = vpack.c.bf16 %v4611_v34, %v4608_v28  ;;  %v12195_v26 = vsub.f32 %v12148_v24, %v4671_v5  ;;  %v4623_v32 = vand.u32 4294901760, %v12168_v14 }
  0xd8   :  { %v12192_v7 = vsub.f32 %v12143_v60, %v4668_v51  ;;  %v4761_v12 = vand.u32 4294901760, %v4760_v57  ;;  %v12201_v28 = vsub.f32 %v12159_v18, %v4620_v2  ;;  %v12205_v34 = vpack.c.bf16 %v4665_v62, %v4662_v19  ;;  %v12217_v57 = vld [vmem:[%s15054_s5 + $0x50] sm:$0xff] }
  0xd9   :  { %15356 = vst [vmem:[#allocation9_spill] sm:$0xff] %v12183_v41  ;;  %9825 = vmatpush3.bf16.msra.mxu0 %v12183_v41  ;;  %v15093_v3 = vand.u32 4294901760, %v12176_v59  ;;  %v15067_v24 = vand.u32 4294901760, %v12195_v26  ;;  %v12211_v63 = vsub.f32 %v12168_v14, %v4623_v32  ;;  %v12284_v6 = vpack.c.bf16 %v4671_v5, %v4668_v51 }
  0xda   :  { %9853 = vmatpush3.bf16.msra.mxu1 %v12063_v40  ;;  %15357 = vst [vmem:[#allocation10_spill] sm:$0xff] %v12205_v34  ;;  %v15068_v60 = vand.u32 4294901760, %v12192_v7  ;;  %v15092_v40 = vand.u32 4294901760, %v12189_v10  ;;  %v9860_v19 = vpack.c.bf16 %v4761_v12, %v4754_v36  ;;  %v15071_v62 = vand.u32 4294901760, %v12201_v28  ;;  %9827 = vmatprep.subr.bf16.mxu0 %v12205_v34 }
  0xdb   :  { %9855 = vmatprep.subr.bf16.mxu1 %v9854_v1  ;;  %v12229_v18 = vsub.f32 %v12176_v59, %v15093_v3  ;;  %v12233_v1 = vpack.c.bf16 %v4617_v54, %v4614_v23  ;;  %v4886_v36 = vsub.f32 %v12195_v26, %v15067_v24  ;;  %v15074_v12 = vand.u32 4294901760, %v12211_v63  ;;  %15360 = vst [vmem:[#allocation13_spill] sm:$0xff] %v12284_v6 }
  0xdc   :  { %v4879_v14 = vsub.f32 %v12192_v7, %v15068_v60  ;;  %v12245_v35 = vsub.f32 %v12189_v10, %v15092_v40  ;;  %v4767_v52 = vsub.f32 %v12201_v28, %v15071_v62  ;;  %v15091_v54 = vand.u32 4294901760, %v12217_v57  ;;  %v12261_v62 = vld [vmem:[%s15054_s5 + $0xe0] sm:$0xff] }
  0xdd   :  { %15358 = vst [vmem:[#allocation11_spill] sm:$0xff] %v12233_v1  ;;  %v15075_v23 = vand.u32 4294901760, %v12229_v18  ;;  %9829 = vmatpush3.bf16.msra.mxu0 %v12233_v1  ;;  %v15090_v24 = vand.u32 4294901760, %v12222_v16  ;;  %v4887_v38 = vand.u32 4294901760, %v4886_v36  ;;  %v4774_v53 = vsub.f32 %v12211_v63, %v15074_v12  ;;  %v12279_v36 = vld [vmem:[%s15054_s5 + $0xe8] sm:$0xff] }
  0xde   :  { %15359 = vst [vmem:[#allocation12_spill] sm:$0xff] %v12245_v35  ;;  %9857 = vmatpush3.bf16.msra.mxu1 %v9856_v56  ;;  %v4880_v60 = vand.u32 4294901760, %v4879_v14  ;;  %v15081_v56 = vand.u32 4294901760, %v12245_v35  ;;  %v4768_v21 = vand.u32 4294901760, %v4767_v52  ;;  %9831 = vmatprep.subr.bf16.mxu0 %v12284_v6  ;;  %v4638_v40 = vand.u32 4294901760, %v4474_v8 }
  0xdf   :  { %9859 = vmatprep.subr.bf16.mxu1 %v9858_v30  ;;  %v4893_v42 = vsub.f32 %v12229_v18, %v15075_v23  ;;  %v12269_v30 = vsub.f32 %v12217_v57, %v15091_v54  ;;  %v12274_v14 = vsub.f32 %v12222_v16, %v15090_v24  ;;  %v4775_v12 = vand.u32 4294901760, %v4774_v53  ;;  %v12297_v53 = vld [vmem:[%s15054_s5 + $0x68] sm:$0xff] }
  0xe0   :  { %v9862_v52 = vpack.c.bf16 %v4887_v38, %v4880_v60  ;;  %v4900_v23 = vsub.f32 %v12245_v35, %v15081_v56  ;;  %v15089_v38 = vand.u32 4294901760, %v12261_v62  ;;  %v15087_v60 = vand.u32 4294901760, %v12279_v36 }
  0xe1   :  { %v4894_v55 = vand.u32 4294901760, %v4893_v42  ;;  %v15083_v0 = vand.u32 4294901760, %v12269_v30  ;;  %v15082_v25 = vand.u32 4294901760, %v12274_v14  ;;  %v9864_v51 = vpack.c.bf16 %v4775_v12, %v4768_v21 }
  0xe2   :  { %9861 = vmatpush3.bf16.msra.mxu1 %v9860_v19  ;;  %v4901_v5 = vand.u32 4294901760, %v4900_v23  ;;  %v12301_v19 = vpack.c.bf16 %v4623_v32, %v4620_v2  ;;  %v15088_v21 = vand.u32 4294901760, %v12289_v29  ;;  %v12318_v32 = vsub.f32 %v12279_v36, %v15087_v60  ;;  %v12325_v23 = vld [vmem:[%s15054_s5 + $0xf0] sm:$0xff] }
  0xe3   :  { %9863 = vmatprep.subr.bf16.mxu1 %v9862_v52  ;;  %v4781_v42 = vsub.f32 %v12269_v30, %v15083_v0  ;;  %v4788_v56 = vsub.f32 %v12274_v14, %v15082_v25  ;;  %v12312_v52 = vsub.f32 %v12261_v62, %v15089_v38  ;;  %v4635_v2 = vand.u32 4294901760, %v12297_v53  ;;  %v12330_v25 = vld [vmem:[%s15054_s5 + $0xf8] sm:$0xff] }
  0xe4   :  { %15361 = vst [vmem:[#allocation14_spill] sm:$0xff] %v12301_v19  ;;  %v9866_v12 = vpack.c.bf16 %v4901_v5, %v4894_v55  ;;  %9833 = vmatpush3.bf16.msra.mxu0 %v12301_v19  ;;  %v12336_v9 = vsub.f32 %v12289_v29, %v15088_v21  ;;  %v15103_v60 = vand.u32 4294901760, %v12318_v32  ;;  %v4475_v21 = vld [vmem:[%s15054_s5 + $0x78] sm:$0xff]  ;;  %v12371_v1 = vsub.f32 %v4474_v8, %v4638_v40 }
  0xe5   :  { %v4782_v55 = vand.u32 4294901760, %v4781_v42  ;;  %v4789_v5 = vand.u32 4294901760, %v4788_v56  ;;  %v15098_v0 = vand.u32 4294901760, %v12312_v52  ;;  %v4686_v56 = vand.u32 4294901760, %v12325_v23 }
  0xe6   :  { %9865 = vmatpush3.bf16.msra.mxu1 %v9864_v51  ;;  %v12345_v51 = vsub.f32 %v12297_v53, %v4635_v2  ;;  %v4689_v42 = vand.u32 4294901760, %v12330_v25  ;;  %v15111_v54 = vand.u32 4294901760, %v12336_v9  ;;  %v4914_v53 = vsub.f32 %v12318_v32, %v15103_v60 }
  0xe7   :  { %v12341_v4 = vpop.f32.mrb[0].mxu1  ;;  %9867 = vmatprep.subr.bf16.mxu1 %v9866_v12  ;;  %v9868_v24 = vpack.c.bf16 %v4789_v5, %v4782_v55  ;;  %v4907_v12 = vsub.f32 %v12312_v52, %v15098_v0  ;;  %v12363_v19 = vsub.f32 %v12325_v23, %v4686_v56  ;;  %v4641_v0 = vand.u32 4294901760, %v4475_v21 }
  0xe8   :  { %v12352_v38 = vpop.f32.mrb[1].mxu1  ;;  %v15110_v3 = vand.u32 4294901760, %v12345_v51  ;;  %v12366_v6 = vsub.f32 %v12330_v25, %v4689_v42  ;;  %v4795_v5 = vsub.f32 %v12336_v9, %v15111_v54  ;;  %v4915_v34 = vand.u32 4294901760, %v4914_v53 }
  0xe9   :  { %v4908_v55 = vand.u32 4294901760, %v4907_v12  ;;  %v15114_v23 = vand.u32 4294901760, %v12363_v19  ;;  %v12379_v12 = vsub.f32 %v4475_v21, %v4641_v0 }
  0xea   :  { %9869 = vmatpush3.bf16.msra.mxu1 %v9868_v24  ;;  %v4802_v60 = vsub.f32 %v12345_v51, %v15110_v3  ;;  %v15115_v41 = vand.u32 4294901760, %v12366_v6  ;;  %v4796_v25 = vand.u32 4294901760, %v4795_v5  ;;  %v15118_v24 = vand.u32 4294901760, %v12371_v1 }
  0xeb   :  { %v9870_v31 = vpack.c.bf16 %v4915_v34, %v4908_v55  ;;  %v4921_v8 = vsub.f32 %v12363_v19, %v15114_v23  ;;  %v15119_v5 = vand.u32 4294901760, %v12379_v12  ;;  %v15362_v34 = vand.u32 4294901760, %v12176_v59 }
  0xec   :  { %v4803_v46 = vand.u32 4294901760, %v4802_v60  ;;  %v4928_v53 = vsub.f32 %v12366_v6, %v15115_v41  ;;  %v4809_v3 = vsub.f32 %v12371_v1, %v15118_v24  ;;  %v15363_v60 = vand.u32 4294901760, %v12189_v10 }
  0xed   :  { %9871 = vmatprep.subr.bf16.mxu1 %v9870_v31  ;;  %v4922_v21 = vand.u32 4294901760, %v4921_v8  ;;  %v4816_v41 = vsub.f32 %v12379_v12, %v15119_v5  ;;  %v15365_v24 = vand.u32 4294901760, %v12217_v57  ;;  %v15366_v31 = vand.u32 4294901760, %v12222_v16 }
  0xee   :  { %v9872_v54 = vpack.c.bf16 %v4803_v46, %v4796_v25  ;;  %v4929_v20 = vand.u32 4294901760, %v4928_v53  ;;  %v12395_v55 = vpack.c.bf16 %v15363_v60, %v15362_v34  ;;  %v4810_v23 = vand.u32 4294901760, %v4809_v3 }
  0xef   :  { %v12404_v46 = vpack.c.bf16 %v15366_v31, %v15365_v24  ;;  %v4817_v59 = vand.u32 4294901760, %v4816_v41  ;;  %v15368_v3 = vand.u32 4294901760, %v12261_v62  ;;  %v15369_v25 = vand.u32 4294901760, %v12279_v36 }
  0xf0   :  { %15364 = vst [vmem:[#allocation15_spill] sm:$0xff] %v12395_v55  ;;  %9873 = vmatpush3.bf16.msra.mxu1 %v9872_v54  ;;  %v9874_v58 = vpack.c.bf16 %v4929_v20, %v4922_v21  ;;  %9835 = vmatprep.subr.bf16.mxu0 %v12395_v55  ;;  %v15371_v20 = vand.u32 4294901760, %v12289_v29  ;;  %v12423_v41 = vpack.c.bf16 %v4641_v0, %v4638_v40 }
  0xf1   :  { %15367 = vst [vmem:[#allocation16_spill] sm:$0xff] %v12404_v46  ;;  %9837 = vmatpush3.bf16.msra.mxu0 %v12404_v46  ;;  %v9876_v10 = vpack.c.bf16 %v4817_v59, %v4810_v23  ;;  %v12412_v8 = vpack.c.bf16 %v15369_v25, %v15368_v3  ;;  %v9878_v29 = vpack.c.bf16 %v11931_v50, %v11926_v15 }
  0xf2   :  { %9875 = vmatprep.subr.bf16.mxu1 %v9874_v58  ;;  %v12416_v57 = vpack.c.bf16 %v4635_v2, %v15371_v20  ;;  %v12421_v58 = vpack.c.bf16 %v4689_v42, %v4686_v56  ;;  %v9880_v16 = vpack.c.bf16 %v11944_v22, %v11936_v43  ;;  %v9882_v62 = vpack.c.bf16 %v11954_v48, %v11949_v13  ;;  %v15377_v56 = vld [vmem:[#allocation3_spill] sm:$0xff] }
  0xf3   :  { %15370 = vst [vmem:[#allocation17_spill] sm:$0xff] %v12412_v8  ;;  %9839 = vmatprep.subr.bf16.mxu0 %v12412_v8  ;;  %v9884_v54 = vpack.c.bf16 %v11974_v33, %v11965_v47  ;;  %v9886_v0 = vpack.c.bf16 %v12066_v37, %v12046_v17  ;;  %v9888_v40 = vpack.c.bf16 %v12084_v27, %v12081_v39  ;;  %v15384_v39 = vld [vmem:[#allocation10_spill] sm:$0xff] }
  0xf4   :  { %15372 = vst [vmem:[#allocation18_spill] sm:$0xff] %v12416_v57  ;;  %9877 = vmatpush3.bf16.msra.mxu1 %v9876_v10  ;;  %15373 = vst [vmem:[#allocation19_spill] sm:$0xff] %v12421_v58 }
  0xf5   :  { %9911 = vmatprep.subr.bf16.mxu1 %v12029_v49  ;;  %9841 = vmatpush3.bf16.msra.mxu0 %v12416_v57 }
  0xf6   :  { %9843 = vmatprep.subr.bf16.mxu0 %v12421_v58 }
  0xf9   :  { %9845 = vmatpush3.bf16.msra.mxu0 %v12423_v41 }
  0xfa   :  { %9879 = vmatprep.subr.bf16.mxu0 %v9878_v29 }
 0x10e   :  { %v611_v23 = vpop.f32.mrb[0].mxu0 }
 0x10f   :  { %v10600_v53 = vadd.f32 %v611_v23, %v12341_v4  ;;  %v613_v21 = vpop.f32.mrb[1].mxu0 }
 0x110   :  { %v10601_v60 = vadd.f32 %v613_v21, %v12352_v38 }
 0x118   :  { %v1154_v3 = vpop.f32.mrb[2].mxu1 }
 0x119   :  { %v1156_v4 = vpop.f32.mrb[3].mxu1 }
 0x13e   :  { %v12461_v20 = vpop.f32.mrb[2].mxu0 }
 0x13f   :  { %v12463_v29 = vpop.f32.mrb[3].mxu0 }
 0x148   :  { %v12465_v23 = vpop.f32.mrb[4].mxu1 }
 0x149   :  { %15374 = vst [vmem:[#allocation20_spill] sm:$0xff] %v12465_v23  ;;  %v12467_v38 = vpop.f32.mrb[5].mxu1  ;;  %v15382_v23 = vld [vmem:[#allocation8_spill] sm:$0xff] }
 0x14a   :  { %15375 = vst [vmem:[#allocation21_spill] sm:$0xff] %v12467_v38  ;;  %v15381_v38 = vld [vmem:[#allocation7_spill] sm:$0xff] }
 0x16e   :  { %v2818_v21 = vpop.f32.mrb[4].mxu0 }
 0x16f   :  { %v4452_v5 = vmul.f32 %v10600_v53, %v2818_v21  ;;  %v2820_v31 = vpop.f32.mrb[5].mxu0 }
 0x170   :  { %v4453_v59 = vmul.f32 %v10601_v60, %v2820_v31  ;;  %v15378_v31 = vld [vmem:[#allocation4_spill] sm:$0xff] }
 0x171   :  { %v12469_v34 = vand.u32 4294901760, %v4452_v5 }
 0x172   :  { %v12471_v10 = vand.u32 4294901760, %v4453_v59 }
 0x173   :  { %15376 = vst [vmem:[#allocation22_spill] sm:$0xff] %v12469_v34  ;;  %v12474_v24 = vsub.f32 %v4452_v5, %v12469_v34 }
 0x174   :  { %v4692_v25 = vsub.f32 %v4453_v59, %v12471_v10  ;;  %4932 = vmatprep.mubr.f32.mxu1 %v12471_v10 }
 0x175   :  { %v15123_v42 = vand.u32 4294901760, %v12474_v24  ;;  %4934 = vmatmul.mubr.f32.vlgmr.msra.gmra.mrb[10].mxu1 %v12469_v34 }
 0x176   :  { %9913 = vmatpush3.bf16.msra.mxu1 %v15377_v56  ;;  %v4693_v53 = vand.u32 4294901760, %v4692_v25 }
 0x177   :  { %v4700_v60 = vsub.f32 %v12474_v24, %v15123_v42  ;;  %9915 = vmatprep.subr.bf16.mxu1 %v15378_v31  ;;  %v15383_v42 = vld [vmem:[#allocation9_spill] sm:$0xff] }
 0x178   :  { %v3361_v21 = vpop.f32.mrb[6].mxu1  ;;  %5176 = vmatprep.mubr.f32.mxu1 %v4693_v53  ;;  %v4694_v5 = vsub.f32 %v4692_v25, %v4693_v53  ;;  %v12498_v53 = vld [vmem:[%s15054_s5 + $0x150] sm:$0xff] }
 0x179   :  { %v12485_v2 = vmul.f32 %v3361_v21, %v1154_v3  ;;  %v3363_v59 = vpop.f32.mrb[7].mxu1  ;;  %v4701_v27 = vand.u32 4294901760, %v4700_v60  ;;  %v15385_v3 = vld [vmem:[#allocation11_spill] sm:$0xff]  ;;  %15387 = vst [vmem:[#allocation7_spill] sm:$0xff] %v12498_v53  ;;  %v15399_v21 = vpack.c.bf16 %v12195_v26, %v12192_v7 }
 0x17a   :  { %v12487_v36 = vmul.f32 %v3363_v59, %v1156_v4  ;;  %9917 = vmatpush3.bf16.msra.mxu1 %v15381_v38  ;;  %v4695_v34 = vand.u32 4294901760, %v4694_v5  ;;  %v15386_v4 = vld [vmem:[#allocation13_spill] sm:$0xff]  ;;  %v12530_v60 = vld [vmem:[%s15054_s5 + $0x168] sm:$0xff]  ;;  %v15395_v59 = vpack.c.bf16 %v12138_v44, %v12123_v11 }
 0x17b   :  { %15379 = vst [vmem:[#allocation3_spill] sm:$0xff] %v12485_v2  ;;  %9919 = vmatprep.subr.bf16.mxu1 %v15382_v23  ;;  %15394 = vst [vmem:[#allocation24_spill] sm:$0xff] %v12530_v60  ;;  %v12551_v5 = vld [vmem:[%s15054_s5 + $0x1f0] sm:$0xff] }
 0x17c   :  { %15380 = vst [vmem:[#allocation4_spill] sm:$0xff] %v12487_v36  ;;  %4696 = vmatprep.mubr.f32.mxu0 %v4695_v34  ;;  %v12516_v34 = vld [vmem:[%s15054_s5 + $0x1e8] sm:$0xff]  ;;  %15397 = vst [vmem:[#allocation26_spill] sm:$0xff] %v12551_v5 }
 0x17d   :  { %4702 = vmatmul.mubr.f32.vlgmr.msra.gmra.mrb[8].mxu0 %v4701_v27  ;;  %v12503_v27 = vld [vmem:[%s15054_s5 + $0x158] sm:$0xff]  ;;  %15391 = vst [vmem:[#allocation10_spill] sm:$0xff] %v12516_v34 }
 0x17e   :  { %9881 = vmatpush3.bf16.msra.mxu0 %v9880_v16  ;;  %9921 = vmatpush3.bf16.msra.mxu1 %v15383_v42  ;;  %15388 = vst [vmem:[#allocation8_spill] sm:$0xff] %v12503_v27  ;;  %v15389_v16 = vld [vmem:[#allocation14_spill] sm:$0xff] }
 0x17f   :  { %5069 = vmatprep.mubr.f32.mxu0 %v4692_v25  ;;  %9883 = vmatprep.subr.bf16.mxu0 %v9882_v62  ;;  %v15126_v62 = vand.u32 4294901760, %v12498_v53  ;;  %v15392_v25 = vpack.c.bf16 %v12112_v45, %v12097_v61 }
 0x180   :  { %9923 = vmatprep.subr.bf16.mxu1 %v15384_v39 }
 0x182   :  { %9885 = vmatpush3.bf16.msra.mxu0 %v9884_v54  ;;  %9925 = vmatpush3.bf16.msra.mxu1 %v15385_v3  ;;  %v15127_v54 = vand.u32 4294901760, %v12503_v27 }
 0x183   :  { %9887 = vmatprep.subr.bf16.mxu0 %v9886_v0  ;;  %9927 = vmatprep.subr.bf16.mxu1 %v15386_v4  ;;  %v12511_v0 = vld [vmem:[%s15054_s5 + $0x1e0] sm:$0xff]  ;;  %v12627_v4 = vld [vmem:[%s15054_s5 + $0x108] sm:$0xff] }
 0x184   :  { %15390 = vst [vmem:[#allocation9_spill] sm:$0xff] %v12511_v0  ;;  %v12546_v2 = vsub.f32 %v12503_v27, %v15127_v54  ;;  %v12567_v27 = vld [vmem:[%s15054_s5 + $0x170] sm:$0xff]  ;;  %v15403_v54 = vand.u32 4294901760, %v12516_v34 }
 0x185   :  { %15400 = vst [vmem:[#allocation28_spill] sm:$0xff] %v12567_v27 }
 0x186   :  { %9889 = vmatpush3.bf16.msra.mxu0 %v9888_v40  ;;  %9929 = vmatpush3.bf16.msra.mxu1 %v15389_v16  ;;  %v12525_v40 = vld [vmem:[%s15054_s5 + $0x160] sm:$0xff]  ;;  %v12587_v36 = vsub.f32 %v12516_v34, %v15403_v54  ;;  %v15404_v16 = vpack.c.bf16 %v12211_v63, %v12201_v28  ;;  %v15405_v54 = vpack.c.bf16 %v12245_v35, %v12229_v18 }
 0x187   :  { %9891 = vmatprep.subr.bf16.mxu0 %v15392_v25  ;;  %9931 = vmatprep.subr.bf16.mxu1 %v12395_v55  ;;  %15393 = vst [vmem:[#allocation23_spill] sm:$0xff] %v12525_v40  ;;  %v12541_v25 = vsub.f32 %v12498_v53, %v15126_v62  ;;  %v12572_v53 = vld [vmem:[%s15054_s5 + $0x178] sm:$0xff]  ;;  %v12611_v55 = vld [vmem:[%s15054_s5 + $0x100] sm:$0xff] }
 0x188   :  { %15401 = vst [vmem:[#allocation29_spill] sm:$0xff] %v12572_v53 }
 0x189   :  { %15396 = vst [vmem:[#allocation25_spill] sm:$0xff] %v12541_v25  ;;  %v15410_v34 = vand.u32 4294901760, %v12541_v25  ;;  %v15415_v25 = vpack.c.bf16 %v12274_v14, %v12269_v30 }
 0x18a   :  { %9893 = vmatpush3.bf16.msra.mxu0 %v15395_v59  ;;  %9933 = vmatpush3.bf16.msra.mxu1 %v12404_v46  ;;  %v12556_v59 = vld [vmem:[%s15054_s5 + $0x1f8] sm:$0xff]  ;;  %v15408_v46 = vand.u32 4294901760, %v12530_v60 }
 0x18b   :  { %15398 = vst [vmem:[#allocation27_spill] sm:$0xff] %v12556_v59  ;;  %9895 = vmatprep.subr.bf16.mxu0 %v15399_v21  ;;  %9935 = vmatprep.subr.bf16.mxu1 %v12412_v8  ;;  %v12577_v21 = vld [vmem:[%s15054_s5 + $0x180] sm:$0xff]  ;;  %v15402_v8 = vand.u32 4294901760, %v12511_v0 }
 0x18d   :  { %v12582_v62 = vsub.f32 %v12511_v0, %v15402_v8  ;;  %v15406_v0 = vand.u32 4294901760, %v12525_v40  ;;  %v15414_v8 = vand.u32 4294901760, %v12556_v59 }
 0x18e   :  { %9897 = vmatpush3.bf16.msra.mxu0 %v15404_v16  ;;  %9937 = vmatpush3.bf16.msra.mxu1 %v12416_v57  ;;  %v12606_v16 = vld [vmem:[%s15054_s5 + $0x188] sm:$0xff] }
 0x18f   :  { %9899 = vmatprep.subr.bf16.mxu0 %v15405_v54  ;;  %9939 = vmatprep.subr.bf16.mxu1 %v12421_v58  ;;  %v12616_v3 = vsub.f32 %v12525_v40, %v15406_v0  ;;  %v12621_v54 = vsub.f32 %v12530_v60, %v15408_v46  ;;  %v15411_v58 = vand.u32 4294901760, %v12546_v2  ;;  %v15413_v46 = vand.u32 4294901760, %v12551_v5 }
 0x190   :  { %v12645_v35 = vsub.f32 %v12556_v59, %v15414_v8  ;;  %v15416_v40 = vand.u32 4294901760, %v12567_v27  ;;  %v15418_v0 = vand.u32 4294901760, %v12572_v53 }
 0x191   :  { %15407 = vst [vmem:[#allocation30_spill] sm:$0xff] %v12616_v3  ;;  %15409 = vst [vmem:[#allocation31_spill] sm:$0xff] %v12621_v54  ;;  %v12633_v57 = vpack.c.bf16 %v15411_v58, %v15410_v34  ;;  %v12640_v60 = vsub.f32 %v12551_v5, %v15413_v46  ;;  %v15150_v34 = vand.u32 4294901760, %v12616_v3  ;;  %v15149_v58 = vand.u32 4294901760, %v12621_v54 }
 0x192   :  { %9901 = vmatpush3.bf16.msra.mxu0 %v15415_v25  ;;  %9941 = vmatpush3.bf16.msra.mxu1 %v12423_v41  ;;  %v12656_v46 = vsub.f32 %v12567_v27, %v15416_v40  ;;  %v12661_v8 = vsub.f32 %v12572_v53, %v15418_v0  ;;  %v15420_v40 = vand.u32 4294901760, %v12582_v62  ;;  %v15421_v27 = vand.u32 4294901760, %v12587_v36  ;;  %v12691_v25 = vld [vmem:[%s15054_s5 + $0x198] sm:$0xff] }
 0x193   :  { %15412 = vst [vmem:[#allocation32_spill] sm:$0xff] %v12633_v57  ;;  %v15419_v57 = vpack.c.bf16 %v12318_v32, %v12312_v52  ;;  %9975 = vmatprep.subr.bf16.mxu1 %v12029_v49  ;;  %v15423_v0 = vand.u32 4294901760, %v12474_v24  ;;  %v15424_v53 = vand.u32 4294901760, %v12577_v21  ;;  %v12686_v49 = vld [vmem:[%s15054_s5 + $0x190] sm:$0xff]  ;;  %v15437_v54 = vand.u32 4294901760, %v12640_v60 }
 0x194   :  { %15417 = vst [vmem:[#allocation33_spill] sm:$0xff] %v12656_v46  ;;  %v12674_v59 = vpack.c.bf16 %v15421_v27, %v15420_v40  ;;  %v15430_v27 = vand.u32 4294901760, %v12611_v55 }
 0x195   :  { %9903 = vmatprep.subr.bf16.mxu0 %v15419_v57  ;;  %5180 = vmatmul.mubr.f32.vlgmr.msra.gmra.mrb[12].mxu1 %v15423_v0  ;;  %v12681_v57 = vsub.f32 %v12577_v21, %v15424_v53  ;;  %v12699_v53 = vpack.c.bf16 %v15149_v58, %v15150_v34  ;;  %v15427_v0 = vpack.c.bf16 %v12345_v51, %v12336_v9  ;;  %v15438_v58 = vand.u32 4294901760, %v12645_v35 }
 0x196   :  { %15422 = vst [vmem:[#allocation34_spill] sm:$0xff] %v12674_v59  ;;  %9977 = vmatpush3.bf16.msra.mxu1 %v15377_v56  ;;  %v15428_v59 = vand.u32 4294901760, %v12606_v16  ;;  %v12713_v40 = vsub.f32 %v12611_v55, %v15430_v27  ;;  %5450 = vmatprep.mubr.f32.mxu1 %v12471_v10  ;;  %v15433_v56 = vand.u32 4294901760, %v11926_v15 }
 0x197   :  { %15425 = vst [vmem:[#allocation35_spill] sm:$0xff] %v12681_v57  ;;  %15426 = vst [vmem:[#allocation36_spill] sm:$0xff] %v12699_v53  ;;  %9905 = vmatpush3.bf16.msra.mxu0 %v15427_v0  ;;  %v15432_v0 = vpack.c.bf16 %v12366_v6, %v12363_v19  ;;  %v15435_v53 = vand.u32 4294901760, %v12627_v4  ;;  %v12734_v3 = vpack.c.bf16 %v15438_v58, %v15437_v54  ;;  %9979 = vmatprep.subr.bf16.mxu1 %v15378_v31 }
 0x198   :  { %v12708_v5 = vsub.f32 %v12606_v16, %v15428_v59  ;;  %15431 = vst [vmem:[#allocation38_spill] sm:$0xff] %v12713_v40  ;;  %v15434_v59 = vand.u32 4294901760, %v11931_v50  ;;  %v12742_v50 = vld [vmem:[%s15054_s5 + $0x110] sm:$0xff]  ;;  %v15443_v54 = vpack.c.bf16 %v12379_v12, %v12371_v1  ;;  %v15444_v31 = vand.u32 4294901760, %v11936_v43 }
 0x199   :  { %9907 = vmatprep.subr.bf16.mxu0 %v15432_v0  ;;  %v12728_v27 = vsub.f32 %v12627_v4, %v15435_v53  ;;  %15439 = vst [vmem:[#allocation40_spill] sm:$0xff] %v12734_v3  ;;  %v15440_v53 = vand.u32 4294901760, %v12656_v46  ;;  %v15445_v58 = vand.u32 4294901760, %v11944_v22  ;;  %v15157_v0 = vand.u32 4294901760, %v12681_v57 }
 0x19a   :  { %15429 = vst [vmem:[#allocation37_spill] sm:$0xff] %v12708_v5  ;;  %v9942_v34 = vpack.c.bf16 %v15434_v59, %v15433_v56  ;;  %v15441_v56 = vand.u32 4294901760, %v12661_v8  ;;  %9981 = vmatpush3.bf16.msra.mxu1 %v15381_v38  ;;  %v15156_v3 = vand.u32 4294901760, %v12708_v5  ;;  %v15155_v46 = vand.u32 4294901760, %v12713_v40 }
 0x19b   :  { %15436 = vst [vmem:[#allocation39_spill] sm:$0xff] %v12728_v27  ;;  %9909 = vmatpush3.bf16.msra.mxu0 %v15443_v54  ;;  %v9944_v15 = vpack.c.bf16 %v15445_v58, %v15444_v31  ;;  %9983 = vmatprep.subr.bf16.mxu1 %v15382_v23  ;;  %v15448_v22 = vand.u32 4294901760, %v12686_v49  ;;  %v15450_v58 = vand.u32 4294901760, %v12691_v25  ;;  %v15453_v23 = vand.u32 4294901760, %v11974_v33 }
 0x19c   :  { %v12748_v59 = vpack.c.bf16 %v15441_v56, %v15440_v53  ;;  %9943 = vmatprep.subr.bf16.mxu0 %v9942_v34  ;;  %v15446_v53 = vand.u32 4294901760, %v11949_v13  ;;  %v15447_v56 = vand.u32 4294901760, %v11954_v48  ;;  %v12781_v13 = vld [vmem:[%s15054_s5 + $0x118] sm:$0xff]  ;;  %v15452_v48 = vand.u32 4294901760, %v11965_v47 }
 0x19d   :  { %v12771_v31 = vsub.f32 %v12686_v49, %v15448_v22  ;;  %v12776_v34 = vsub.f32 %v12691_v25, %v15450_v58  ;;  %v15455_v22 = vand.u32 4294901760, %v12066_v37  ;;  %v5685_v38 = vsub.f32 %v12681_v57, %v15157_v0  ;;  %v12810_v37 = vld [vmem:[%s15054_s5 + $0x1a8] sm:$0xff] }
 0x19e   :  { %15442 = vst [vmem:[#allocation41_spill] sm:$0xff] %v12748_v59  ;;  %v9946_v54 = vpack.c.bf16 %v15447_v56, %v15446_v53  ;;  %5072 = vmatmul.mubr.f32.vlgmr.msra.gmra.mrb[10].mxu0 %v12474_v24  ;;  %v9948_v53 = vpack.c.bf16 %v15453_v23, %v15452_v48  ;;  %v15454_v56 = vand.u32 4294901760, %v12046_v17  ;;  %v3904_v58 = vpop.f32.mrb[6].mxu0  ;;  %v5692_v47 = vsub.f32 %v12708_v5, %v15156_v3  ;;  %v12805_v17 = vld [vmem:[%s15054_s5 + $0x1a0] sm:$0xff] }
 0x19f   :  { %15449 = vst [vmem:[#allocation42_spill] sm:$0xff] %v12771_v31  ;;  %15451 = vst [vmem:[#allocation43_spill] sm:$0xff] %v12776_v34  ;;  %9945 = vmatpush3.bf16.msra.mxu0 %v9944_v15  ;;  %5346 = vmatprep.mubr.f32.mxu0 %v12471_v10  ;;  %v5573_v33 = vsub.f32 %v12713_v40, %v15155_v46  ;;  %v12814_v24 = vmul.f32 %v3904_v58, %v12461_v20  ;;  %v3906_v10 = vpop.f32.mrb[7].mxu0  ;;  %v15457_v15 = vand.u32 4294901760, %v12728_v27  ;;  %v15463_v3 = vld [vmem:[#allocation6_spill] sm:$0xff] }
 0x1a0   :  { %v9950_v43 = vpack.c.bf16 %v15455_v22, %v15454_v56  ;;  %9985 = vmatpush3.bf16.msra.mxu1 %v15383_v42  ;;  %9947 = vmatprep.subr.bf16.mxu0 %v9946_v54  ;;  %v15458_v56 = vand.u32 4294901760, %v12742_v50  ;;  %v12826_v46 = vmul.f32 %v3906_v10, %v12463_v29  ;;  %v15159_v42 = vand.u32 4294901760, %v12771_v31  ;;  %v15461_v54 = vld [vmem:[#allocation5_spill] sm:$0xff] }
 0x1a1   :  { %15456 = vst [vmem:[#allocation44_spill] sm:$0xff] %v12814_v24  ;;  %v5580_v48 = vsub.f32 %v12728_v27, %v15457_v15  ;;  %9987 = vmatprep.subr.bf16.mxu1 %v15384_v39  ;;  %v15462_v58 = vand.u32 4294901760, %v15461_v54  ;;  %v15464_v15 = vand.u32 4294901760, %v15463_v3  ;;  %v15465_v23 = vand.u32 4294901760, %v12097_v61 }
 0x1a2   :  { %v12823_v22 = vsub.f32 %v12742_v50, %v15458_v56  ;;  %15460 = vst [vmem:[#allocation46_spill] sm:$0xff] %v12826_v46  ;;  %v15466_v24 = vand.u32 4294901760, %v12112_v45  ;;  %v15161_v59 = vand.u32 4294901760, %v12805_v17  ;;  %v15160_v29 = vand.u32 4294901760, %v12810_v37  ;;  %v12852_v45 = vld [vmem:[%s15054_s5 + $0x120] sm:$0xff] }
 0x1a3   :  { %v9952_v0 = vpack.c.bf16 %v15464_v15, %v15462_v58  ;;  %9949 = vmatpush3.bf16.msra.mxu0 %v9948_v53  ;;  %v15467_v39 = vand.u32 4294901760, %v12123_v11  ;;  %v15468_v10 = vand.u32 4294901760, %v12138_v44  ;;  %v15469_v54 = vand.u32 4294901760, %v12192_v7 }
 0x1a4   :  { %15459 = vst [vmem:[#allocation45_spill] sm:$0xff] %v12823_v22  ;;  %v9954_v56 = vpack.c.bf16 %v15466_v24, %v15465_v23  ;;  %v15470_v3 = vand.u32 4294901760, %v12195_v26  ;;  %v5686_v15 = vand.u32 4294901760, %v5685_v38  ;;  %v5693_v61 = vand.u32 4294901760, %v5692_v47  ;;  %v15471_v24 = vld [vmem:[#allocation11_spill] sm:$0xff]  ;;  %9951 = vmatprep.subr.bf16.mxu0 %v9950_v43  ;;  %v12869_v38 = vld [vmem:[%s15054_s5 + $0x1b0] sm:$0xff] }
 0x1a5   :  { %v9956_v20 = vpack.c.bf16 %v15468_v10, %v15467_v39  ;;  %9989 = vmatpush3.bf16.msra.mxu1 %v15471_v24  ;;  %v5574_v53 = vand.u32 4294901760, %v5573_v33  ;;  %v5581_v11 = vand.u32 4294901760, %v5580_v48  ;;  %v15472_v23 = vand.u32 4294901760, %v12781_v13  ;;  %v12864_v26 = vld [vmem:[%s15054_s5 + $0x128] sm:$0xff]  ;;  %v15474_v43 = vld [vmem:[#allocation13_spill] sm:$0xff] }
 0x1a6   :  { %v9958_v58 = vpack.c.bf16 %v15470_v3, %v15469_v54  ;;  %9991 = vmatprep.subr.bf16.mxu1 %v15474_v43  ;;  %v15475_v47 = vand.u32 4294901760, %v12201_v28  ;;  %v15476_v33 = vand.u32 4294901760, %v12211_v63  ;;  %v15477_v39 = vand.u32 4294901760, %v12229_v18  ;;  %v15478_v10 = vld [vmem:[#allocation12_spill] sm:$0xff] }
 0x1a7   :  { %v12859_v7 = vsub.f32 %v12781_v13, %v15472_v23  ;;  %v15479_v54 = vand.u32 4294901760, %v15478_v10  ;;  %v5699_v24 = vsub.f32 %v12771_v31, %v15159_v42  ;;  %v15480_v23 = vand.u32 4294901760, %v12776_v34  ;;  %9953 = vmatpush3.bf16.msra.mxu0 %v9952_v0 }
 0x1a8   :  { %v9960_v48 = vpack.c.bf16 %v15476_v33, %v15475_v47  ;;  %v15481_v43 = vand.u32 4294901760, %v12269_v30  ;;  %v15482_v28 = vand.u32 4294901760, %v12274_v14  ;;  %v12897_v18 = vsub.f32 %v12805_v17, %v15161_v59  ;;  %v12908_v30 = vld [vmem:[%s15054_s5 + $0x1b8] sm:$0xff]  ;;  %9955 = vmatprep.subr.bf16.mxu0 %v9954_v56 }
 0x1a9   :  { %15473 = vst [vmem:[#allocation5_spill] sm:$0xff] %v12859_v7  ;;  %v12880_v3 = vpack.c.bf16 %v15479_v54, %v15477_v39  ;;  %v5706_v44 = vsub.f32 %v12776_v34, %v15480_v23  ;;  %v12902_v47 = vsub.f32 %v12810_v37, %v15160_v29  ;;  %v15162_v33 = vand.u32 4294901760, %v12852_v45 }
 0x1aa   :  { %v12892_v63 = vpack.c.bf16 %v15482_v28, %v15481_v43  ;;  %15483 = vst [vmem:[#allocation6_spill] sm:$0xff] %v12897_v18  ;;  %v15485_v14 = vand.u32 4294901760, %v12312_v52  ;;  %v15486_v39 = vand.u32 4294901760, %v12318_v32  ;;  %v12916_v54 = vpack.c.bf16 %v5693_v61, %v5686_v15  ;;  %v15487_v28 = vld [vmem:[#allocation14_spill] sm:$0xff]  ;;  %v15503_v61 = vld [vmem:[#allocation16_spill] sm:$0xff] }
 0x1ab   :  { %15484 = vst [vmem:[#allocation11_spill] sm:$0xff] %v12902_v47  ;;  %v15164_v23 = vand.u32 4294901760, %v12864_v26  ;;  %v15163_v43 = vand.u32 4294901760, %v12869_v38  ;;  %9993 = vmatpush3.bf16.msra.mxu1 %v15487_v28  ;;  %v15488_v42 = vand.u32 4294901760, %v12336_v9  ;;  %v15489_v29 = vand.u32 4294901760, %v12345_v51  ;;  %9957 = vmatpush3.bf16.msra.mxu0 %v9956_v20 }
 0x1ac   :  { %v12914_v10 = vpack.c.bf16 %v15486_v39, %v15485_v14  ;;  %v12927_v52 = vpack.c.bf16 %v5581_v11, %v5574_v53  ;;  %v15490_v32 = vand.u32 4294901760, %v12823_v22  ;;  %v4447_v14 = vpop.f32.mrb[8].mxu1  ;;  %v15491_v39 = vld [vmem:[#allocation15_spill] sm:$0xff]  ;;  %v15492_v56 = vand.u32 4294901760, %v12363_v19  ;;  %v12946_v53 = vld [vmem:[%s15054_s5 + $0x130] sm:$0xff]  ;;  %v12951_v11 = vld [vmem:[%s15054_s5 + $0x138] sm:$0xff]  ;;  %9959 = vmatprep.subr.bf16.mxu0 %v9958_v58 }
 0x1ad   :  { %v12925_v0 = vpack.c.bf16 %v15489_v29, %v15488_v42  ;;  %9995 = vmatprep.subr.bf16.mxu1 %v15491_v39  ;;  %v15493_v9 = vand.u32 4294901760, %v12366_v6  ;;  %v5700_v51 = vand.u32 4294901760, %v5699_v24  ;;  %v5707_v42 = vand.u32 4294901760, %v5706_v44  ;;  %v4449_v6 = vpop.f32.mrb[9].mxu1  ;;  %v15505_v58 = vld [vmem:[#allocation4_spill] sm:$0xff] }
 0x1ae   :  { %v12932_v15 = vsub.f32 %v12823_v22, %v15490_v32  ;;  %v15494_v32 = vld [vmem:[#allocation20_spill] sm:$0xff]  ;;  %v12961_v24 = vsub.f32 %v12852_v45, %v15162_v33  ;;  %v15499_v59 = vand.u32 4294901760, %v12371_v1  ;;  %v15500_v44 = vand.u32 4294901760, %v12379_v12 }
 0x1af   :  { %v12940_v28 = vpack.c.bf16 %v15493_v9, %v15492_v56  ;;  %v12954_v19 = vmul.f32 %v4447_v14, %v15494_v32  ;;  %v12966_v56 = vld [vmem:[%s15054_s5 + $0x1c0] sm:$0xff]  ;;  %v12971_v14 = vld [vmem:[%s15054_s5 + $0x1c8] sm:$0xff]  ;;  %v15497_v9 = vld [vmem:[#allocation21_spill] sm:$0xff]  ;;  %v12985_v39 = vsub.f32 %v12864_v26, %v15164_v23  ;;  %v12990_v29 = vsub.f32 %v12869_v38, %v15163_v43  ;;  %9997 = vmatpush3.bf16.msra.mxu1 %v15503_v61 }
 0x1b0   :  { %15496 = vst [vmem:[#allocation12_spill] sm:$0xff] %v12961_v24  ;;  %v12974_v32 = vmul.f32 %v4449_v6, %v15497_v9  ;;  %v12980_v33 = vpack.c.bf16 %v15500_v44, %v15499_v59  ;;  %v5588_v20 = vand.u32 4294901760, %v12932_v15  ;;  %v15504_v1 = vand.u32 4294901760, %v12859_v7  ;;  %v13002_v44 = vld [vmem:[%s15054_s5 + $0x140] sm:$0xff]  ;;  %v13007_v61 = vld [vmem:[%s15054_s5 + $0x148] sm:$0xff]  ;;  %v15506_v9 = vld [vmem:[#allocation17_spill] sm:$0xff]  ;;  %9961 = vmatpush3.bf16.msra.mxu0 %v9960_v48 }
 0x1b1   :  { %15495 = vst [vmem:[#allocation13_spill] sm:$0xff] %v12954_v19  ;;  %15501 = vst [vmem:[#allocation15_spill] sm:$0xff] %v12985_v39  ;;  %v13010_v15 = vand.u32 4294901760, %v15505_v58  ;;  %9999 = vmatprep.subr.bf16.mxu1 %v15506_v9  ;;  %v13023_v59 = vld [vmem:[%s15054_s5 + $0x1d0] sm:$0xff]  ;;  %v13028_v19 = vld [vmem:[%s15054_s5 + $0x1d8] sm:$0xff]  ;;  %v10042_v9 = vpack.c.bf16 %v5707_v42, %v5700_v51  ;;  %v15509_v46 = vand.u32 4294901760, %v12902_v47  ;;  %9963 = vmatprep.subr.bf16.mxu0 %v12880_v3 }
 0x1b2   :  { %15498 = vst [vmem:[#allocation14_spill] sm:$0xff] %v12974_v32  ;;  %15502 = vst [vmem:[#allocation20_spill] sm:$0xff] %v12990_v29  ;;  %v5594_v12 = vsub.f32 %v12859_v7, %v15504_v1  ;;  %v15507_v1 = vand.u32 4294901760, %v12908_v30  ;;  %v15508_v32 = vand.u32 4294901760, %v12897_v18  ;;  %v15510_v51 = vld [vmem:[#allocation18_spill] sm:$0xff]  ;;  %v15511_v42 = vand.u32 4294901760, %v12946_v53 }
 0x1b3   :  { %v5720_v23 = vsub.f32 %v12902_v47, %v15509_v46  ;;  %10001 = vmatpush3.bf16.msra.mxu1 %v15510_v51  ;;  %v15512_v46 = vand.u32 4294901760, %v12951_v11  ;;  %v13057_v31 = vsub.f32 %v15505_v58, %v13010_v15  ;;  %v15513_v51 = vld [vmem:[#allocation19_spill] sm:$0xff]  ;;  %v15518_v58 = vand.u32 4294901760, %v12961_v24 }
 0x1b4   :  { %v13016_v43 = vsub.f32 %v12908_v30, %v15507_v1  ;;  %v5713_v1 = vsub.f32 %v12897_v18, %v15508_v32  ;;  %v13046_v32 = vsub.f32 %v12946_v53, %v15511_v42  ;;  %10003 = vmatprep.subr.bf16.mxu1 %v15513_v51  ;;  %v15514_v42 = vand.u32 4294901760, %v12966_v56  ;;  %9965 = vmatpush3.bf16.msra.mxu0 %v12892_v63 }
 0x1b5   :  { %v13051_v48 = vsub.f32 %v12951_v11, %v15512_v46  ;;  %v15516_v46 = vand.u32 4294901760, %v12971_v14  ;;  %v5595_v22 = vand.u32 4294901760, %v5594_v12  ;;  %v5721_v47 = vand.u32 4294901760, %v5720_v23  ;;  %9967 = vmatprep.subr.bf16.mxu0 %v12914_v10 }
 0x1b6   :  { %v13064_v7 = vsub.f32 %v12966_v56, %v15514_v42  ;;  %v5714_v34 = vand.u32 4294901760, %v5713_v1  ;;  %v5601_v18 = vsub.f32 %v12961_v24, %v15518_v58  ;;  %v15519_v51 = vand.u32 4294901760, %v12985_v39 }
 0x1b7   :  { %v13069_v6 = vsub.f32 %v12971_v14, %v15516_v46  ;;  %v15520_v42 = vand.u32 4294901760, %v12990_v29  ;;  %v15521_v46 = vand.u32 4294901760, %v13002_v44  ;;  %v15523_v23 = vand.u32 4294901760, %v13007_v61  ;;  %10005 = vmatpush3.bf16.msra.mxu1 %v12423_v41 }
 0x1b8   :  { %15515 = vst [vmem:[#allocation21_spill] sm:$0xff] %v13064_v7  ;;  %v5608_v3 = vsub.f32 %v12985_v39, %v15519_v51  ;;  %v15525_v51 = vand.u32 4294901760, %v13023_v59  ;;  %10039 = vmatprep.subr.bf16.mxu1 %v12916_v54  ;;  %v15529_v10 = vand.u32 4294901760, %v13016_v43  ;;  %v10044_v39 = vpack.c.bf16 %v5595_v22, %v5588_v20  ;;  %v15532_v54 = vld [vmem:[#allocation22_spill] sm:$0xff]  ;;  %9969 = vmatpush3.bf16.msra.mxu0 %v12925_v0 }
 0x1b9   :  { %15517 = vst [vmem:[#allocation16_spill] sm:$0xff] %v13069_v6  ;;  %v5727_v27 = vsub.f32 %v12990_v29, %v15520_v42  ;;  %v13084_v12 = vsub.f32 %v13002_v44, %v15521_v46  ;;  %v13089_v1 = vsub.f32 %v13007_v61, %v15523_v23  ;;  %v15527_v46 = vand.u32 4294901760, %v13028_v19  ;;  %9971 = vmatprep.subr.bf16.mxu0 %v12940_v28 }
 0x1ba   :  { %v13098_v42 = vsub.f32 %v13023_v59, %v15525_v51  ;;  %v5734_v23 = vsub.f32 %v13016_v43, %v15529_v10  ;;  %v15200_v63 = vand.u32 4294901760, %v13069_v6  ;;  %v15530_v51 = vand.u32 4294901760, %v12577_v21  ;;  %5452 = vmatmul.mubr.f32.vlgmr.msra.gmra.mrb[14].mxu1 %v15532_v54 }
 0x1bb   :  { %15522 = vst [vmem:[#allocation4_spill] sm:$0xff] %v13084_v12  ;;  %15524 = vst [vmem:[#allocation17_spill] sm:$0xff] %v13089_v1  ;;  %v13103_v29 = vsub.f32 %v13028_v19, %v15527_v46  ;;  %v15531_v24 = vand.u32 4294901760, %v12606_v16  ;;  %v10046_v46 = vpack.c.bf16 %v5721_v47, %v5714_v34  ;;  %v5602_v5 = vand.u32 4294901760, %v5601_v18  ;;  %10041 = vmatpush3.bf16.msra.mxu1 %v12927_v52 }
 0x1bc   :  { %15526 = vst [vmem:[#allocation18_spill] sm:$0xff] %v13098_v42  ;;  %v5609_v41 = vand.u32 4294901760, %v5608_v3  ;;  %v5728_v57 = vand.u32 4294901760, %v5727_v27  ;;  %v15199_v10 = vand.u32 4294901760, %v13084_v12  ;;  %v15196_v58 = vand.u32 4294901760, %v13089_v1  ;;  %5794 = vmatprep.mubr.f32.mxu1 %v13010_v15  ;;  %10043 = vmatprep.subr.bf16.mxu1 %v10042_v9 }
 0x1bd   :  { %15528 = vst [vmem:[#allocation19_spill] sm:$0xff] %v13103_v29  ;;  %v13116_v40 = vpack.c.bf16 %v15531_v24, %v15530_v51  ;;  %v15533_v21 = vand.u32 4294901760, %v13046_v32  ;;  %v15534_v34 = vand.u32 4294901760, %v13051_v48  ;;  %v15194_v18 = vand.u32 4294901760, %v13098_v42  ;;  %9973 = vmatpush3.bf16.msra.mxu0 %v12980_v33 }
 0x1be   :  { %v15195_v27 = vand.u32 4294901760, %v13103_v29  ;;  %v15535_v47 = vand.u32 4294901760, %v13057_v31  ;;  %v5735_v52 = vand.u32 4294901760, %v5734_v23  ;;  %v15536_v24 = vand.u32 4294901760, %v13064_v7 }
 0x1bf   :  { %v5615_v16 = vsub.f32 %v13046_v32, %v15533_v21  ;;  %v5622_v22 = vsub.f32 %v13051_v48, %v15534_v34  ;;  %v5748_v3 = vsub.f32 %v13069_v6, %v15200_v63  ;;  %v15537_v51 = vand.u32 4294901760, %v12611_v55  ;;  %10045 = vmatpush3.bf16.msra.mxu1 %v10044_v39  ;;  %10007 = vmatprep.subr.bf16.mxu0 %v13116_v40 }
 0x1c0   :  { %v5556_v0 = vsub.f32 %v13057_v31, %v15535_v47  ;;  %v5741_v20 = vsub.f32 %v13064_v7, %v15536_v24  ;;  %v15538_v21 = vand.u32 4294901760, %v12627_v4  ;;  %v10048_v28 = vpack.c.bf16 %v5609_v41, %v5602_v5  ;;  %10047 = vmatprep.subr.bf16.mxu1 %v10046_v46  ;;  %5348 = vmatmul.mubr.f32.vlgmr.msra.gmra.mrb[12].mxu0 %v15532_v54 }
 0x1c1   :  { %v15539_v9 = vand.u32 4294901760, %v12686_v49  ;;  %v15540_v23 = vand.u32 4294901760, %v12691_v25  ;;  %v5629_v24 = vsub.f32 %v13084_v12, %v15199_v10  ;;  %v5636_v55 = vsub.f32 %v13089_v1, %v15196_v58  ;;  %v13375_v10 = vld [vmem:[%s15054_s5 + $0x2e8] sm:$0xff] }
 0x1c2   :  { %v13146_v34 = vpack.c.bf16 %v15538_v21, %v15537_v51  ;;  %v5616_v4 = vand.u32 4294901760, %v5615_v16  ;;  %v5623_v33 = vand.u32 4294901760, %v5622_v22  ;;  %v5755_v5 = vsub.f32 %v13098_v42, %v15194_v18  ;;  %v15543_v18 = vld [vmem:[#allocation25_spill] sm:$0xff] }
 0x1c3   :  { %v13153_v47 = vpack.c.bf16 %v15540_v23, %v15539_v9  ;;  %v5762_v25 = vsub.f32 %v13103_v29, %v15195_v27  ;;  %v5557_v49 = vand.u32 4294901760, %v5556_v0  ;;  %v10050_v41 = vpack.c.bf16 %v5735_v52, %v5728_v57  ;;  %10049 = vmatpush3.bf16.msra.mxu1 %v10048_v28 }
 0x1c4   :  { %v5742_v51 = vand.u32 4294901760, %v5741_v20  ;;  %v5749_v21 = vand.u32 4294901760, %v5748_v3  ;;  %v15541_v39 = vand.u32 4294901760, %v12742_v50  ;;  %v15542_v16 = vand.u32 4294901760, %v12781_v13  ;;  %10009 = vmatpush3.bf16.msra.mxu0 %v13146_v34 }
 0x1c5   :  { %5558 = vmatprep.mubr.f32.mxu0 %v5557_v49  ;;  %v5630_v9 = vand.u32 4294901760, %v5629_v24  ;;  %v5637_v23 = vand.u32 4294901760, %v5636_v55  ;;  %v15544_v27 = vand.u32 4294901760, %v15543_v18  ;;  %v15545_v57 = vand.u32 4294901760, %v12546_v2  ;;  %10011 = vmatprep.subr.bf16.mxu0 %v13153_v47 }
 0x1c6   :  { %v13173_v22 = vpack.c.bf16 %v15542_v16, %v15541_v39  ;;  %v10052_v50 = vpack.c.bf16 %v5623_v33, %v5616_v4  ;;  %v15546_v13 = vand.u32 4294901760, %v12805_v17  ;;  %v15547_v54 = vand.u32 4294901760, %v12810_v37  ;;  %10051 = vmatprep.subr.bf16.mxu1 %v10050_v41 }
 0x1c7   :  { %v5643_v46 = vsub.f32 %v15543_v18, %v15544_v27  ;;  %v5650_v0 = vsub.f32 %v12546_v2, %v15545_v57  ;;  %v5756_v20 = vand.u32 4294901760, %v5755_v5  ;;  %v5763_v3 = vand.u32 4294901760, %v5762_v25  ;;  %v15556_v57 = vld [vmem:[#allocation31_spill] sm:$0xff] }
 0x1c8   :  { %v13187_v52 = vpack.c.bf16 %v15547_v54, %v15546_v13  ;;  %v10054_v24 = vpack.c.bf16 %v5749_v21, %v5742_v51  ;;  %v15548_v27 = vand.u32 4294901760, %v12582_v62  ;;  %v15549_v49 = vand.u32 4294901760, %v12587_v36  ;;  %10013 = vmatpush3.bf16.msra.mxu0 %v13173_v22  ;;  %10053 = vmatpush3.bf16.msra.mxu1 %v10052_v50 }
 0x1c9   :  { %v15550_v4 = vand.u32 4294901760, %v12852_v45  ;;  %v15551_v17 = vand.u32 4294901760, %v12864_v26  ;;  %v10056_v37 = vpack.c.bf16 %v5637_v23, %v5630_v9  ;;  %v15552_v5 = vand.u32 4294901760, %v12869_v38  ;;  %v15554_v45 = vld [vmem:[#allocation30_spill] sm:$0xff] }
 0x1ca   :  { %v5769_v55 = vsub.f32 %v12582_v62, %v15548_v27  ;;  %v5776_v28 = vsub.f32 %v12587_v36, %v15549_v49  ;;  %v15553_v25 = vand.u32 4294901760, %v12908_v30  ;;  %v5644_v51 = vand.u32 4294901760, %v5643_v46  ;;  %10015 = vmatprep.subr.bf16.mxu0 %v13187_v52  ;;  %10055 = vmatprep.subr.bf16.mxu1 %v10054_v24 }
 0x1cb   :  { %v13199_v33 = vpack.c.bf16 %v15551_v17, %v15550_v4  ;;  %v5651_v21 = vand.u32 4294901760, %v5650_v0  ;;  %v10058_v39 = vpack.c.bf16 %v5763_v3, %v5756_v20  ;;  %v15555_v16 = vand.u32 4294901760, %v15554_v45  ;;  %v15564_v17 = vld [vmem:[#allocation33_spill] sm:$0xff] }
 0x1cc   :  { %v13206_v41 = vpack.c.bf16 %v15553_v25, %v15552_v5  ;;  %v15557_v13 = vand.u32 4294901760, %v15556_v57  ;;  %v5770_v38 = vand.u32 4294901760, %v5769_v55  ;;  %v5777_v23 = vand.u32 4294901760, %v5776_v28  ;;  %10057 = vmatpush3.bf16.msra.mxu1 %v10056_v37 }
 0x1cd   :  { %v5657_v26 = vsub.f32 %v15554_v45, %v15555_v16  ;;  %v15558_v30 = vand.u32 4294901760, %v12640_v60  ;;  %v15559_v0 = vand.u32 4294901760, %v12645_v35  ;;  %10017 = vmatpush3.bf16.msra.mxu0 %v13199_v33  ;;  %v15560_v54 = vand.u32 4294901760, %v12946_v53  ;;  %10059 = vmatprep.subr.bf16.mxu1 %v10058_v39 }
 0x1ce   :  { %v5664_v9 = vsub.f32 %v15556_v57, %v15557_v13  ;;  %v15561_v20 = vand.u32 4294901760, %v12951_v11  ;;  %v10060_v27 = vpack.c.bf16 %v5651_v21, %v5644_v51  ;;  %v15562_v24 = vand.u32 4294901760, %v12966_v56  ;;  %10019 = vmatprep.subr.bf16.mxu0 %v13206_v41 }
 0x1cf   :  { %v5783_v46 = vsub.f32 %v12640_v60, %v15558_v30  ;;  %v5790_v50 = vsub.f32 %v12645_v35, %v15559_v0  ;;  %v15563_v55 = vand.u32 4294901760, %v12971_v14  ;;  %v5658_v28 = vand.u32 4294901760, %v5657_v26  ;;  %v15573_v30 = vld [vmem:[#allocation3_spill] sm:$0xff] }
 0x1d0   :  { %v13226_v3 = vpack.c.bf16 %v15561_v20, %v15560_v54  ;;  %v5665_v4 = vand.u32 4294901760, %v5664_v9  ;;  %v15565_v5 = vand.u32 4294901760, %v15564_v17  ;;  %v15566_v11 = vand.u32 4294901760, %v12661_v8  ;;  %10061 = vmatpush3.bf16.msra.mxu1 %v10060_v27  ;;  %v15580_v27 = vld [vmem:[#allocation9_spill] sm:$0xff] }
 0x1d1   :  { %v13232_v49 = vpack.c.bf16 %v15563_v55, %v15562_v24  ;;  %v10062_v51 = vpack.c.bf16 %v5777_v23, %v5770_v38  ;;  %v5784_v56 = vand.u32 4294901760, %v5783_v46  ;;  %v5791_v21 = vand.u32 4294901760, %v5790_v50  ;;  %v15582_v55 = vld [vmem:[#allocation10_spill] sm:$0xff] }
 0x1d2   :  { %v5671_v53 = vsub.f32 %v15564_v17, %v15565_v5  ;;  %v5678_v25 = vsub.f32 %v12661_v8, %v15566_v11  ;;  %10021 = vmatpush3.bf16.msra.mxu0 %v13226_v3  ;;  %v15567_v14 = vand.u32 4294901760, %v13002_v44  ;;  %v15568_v37 = vand.u32 4294901760, %v13007_v61  ;;  %v15575_v61 = vld [vmem:[#allocation7_spill] sm:$0xff]  ;;  %v15587_v11 = vld [vmem:[#allocation24_spill] sm:$0xff] }
 0x1d3   :  { %v15570_v26 = vand.u32 4294901760, %v13023_v59  ;;  %v15571_v13 = vand.u32 4294901760, %v13028_v19  ;;  %v13255_v0 = vand.u32 4294901760, %v15573_v30  ;;  %10023 = vmatprep.subr.bf16.mxu0 %v13232_v49  ;;  %v10064_v39 = vpack.c.bf16 %v5665_v4, %v5658_v28  ;;  %10063 = vmatprep.subr.bf16.mxu1 %v10062_v51  ;;  %v15577_v59 = vld [vmem:[#allocation8_spill] sm:$0xff]  ;;  %v15585_v5 = vld [vmem:[#allocation23_spill] sm:$0xff] }
 0x1d4   :  { %v13246_v16 = vpack.c.bf16 %v15568_v37, %v15567_v14  ;;  %v5672_v38 = vand.u32 4294901760, %v5671_v53  ;;  %v5679_v23 = vand.u32 4294901760, %v5678_v25  ;;  %v10066_v44 = vpack.c.bf16 %v5791_v21, %v5784_v56  ;;  %v15589_v21 = vld [vmem:[#allocation26_spill] sm:$0xff]  ;;  %v15591_v37 = vld [vmem:[#allocation27_spill] sm:$0xff]  ;;  %15616 = vst [vmem:[#allocation23_spill] sm:$0xff] %v13375_v10 }
 0x1d5   :  { %v13252_v9 = vpack.c.bf16 %v15571_v13, %v15570_v26  ;;  %15574 = vst [vmem:[#allocation30_spill] sm:$0xff] %v13255_v0  ;;  %v15576_v46 = vand.u32 4294901760, %v15575_v61  ;;  %v15578_v50 = vand.u32 4294901760, %v15577_v59  ;;  %v13267_v54 = vsub.f32 %v15573_v30, %v13255_v0  ;;  %10065 = vmatpush3.bf16.msra.mxu1 %v10064_v39  ;;  %v15593_v30 = vld [vmem:[#allocation28_spill] sm:$0xff]  ;;  %v15598_v59 = vld [vmem:[#allocation35_spill] sm:$0xff] }
 0x1d6   :  { %15569 = vst [vmem:[#allocation22_spill] sm:$0xff] %v13246_v16  ;;  %10025 = vmatpush3.bf16.msra.mxu0 %v13246_v16  ;;  %v10068_v20 = vpack.c.bf16 %v5679_v23, %v5672_v38  ;;  %v15581_v24 = vand.u32 4294901760, %v15580_v27  ;;  %v15583_v28 = vand.u32 4294901760, %v15582_v55  ;;  %10067 = vmatprep.subr.bf16.mxu1 %v10066_v44  ;;  %v15586_v53 = vand.u32 4294901760, %v15585_v5  ;;  %v15595_v38 = vld [vmem:[#allocation29_spill] sm:$0xff]  ;;  %v15600_v27 = vld [vmem:[#allocation38_spill] sm:$0xff] }
 0x1d7   :  { %15572 = vst [vmem:[#allocation25_spill] sm:$0xff] %v13252_v9  ;;  %v13263_v19 = vpack.c.bf16 %v15578_v50, %v15576_v46  ;;  %10027 = vmatprep.subr.bf16.mxu0 %v13252_v9  ;;  %v15588_v25 = vand.u32 4294901760, %v15587_v11  ;;  %v15201_v56 = vand.u32 4294901760, %v13267_v54  ;;  %v15590_v14 = vand.u32 4294901760, %v15589_v21  ;;  %v15599_v50 = vld [vmem:[#allocation37_spill] sm:$0xff]  ;;  %v15602_v5 = vld [vmem:[#allocation42_spill] sm:$0xff] }
 0x1d8   :  { %v13274_v4 = vpack.c.bf16 %v15583_v28, %v15581_v24  ;;  %v15592_v26 = vand.u32 4294901760, %v15591_v37  ;;  %v15594_v39 = vand.u32 4294901760, %v15593_v30  ;;  %v15596_v23 = vand.u32 4294901760, %v15595_v38  ;;  %v15601_v24 = vld [vmem:[#allocation39_spill] sm:$0xff]  ;;  %v15605_v21 = vld [vmem:[#allocation5_spill] sm:$0xff]  ;;  %v15606_v37 = vld [vmem:[#allocation6_spill] sm:$0xff] }
 0x1d9   :  { %15579 = vst [vmem:[#allocation31_spill] sm:$0xff] %v13263_v19  ;;  %v13281_v51 = vpack.c.bf16 %v15588_v25, %v15586_v53  ;;  %10069 = vmatpush3.bf16.msra.mxu1 %v10068_v20  ;;  %v5562_v61 = vsub.f32 %v13267_v54, %v15201_v56  ;;  %v15597_v46 = vand.u32 4294901760, %v13057_v31  ;;  %v10070_v20 = vpack.c.bf16 %v15599_v50, %v15598_v59  ;;  %v15603_v53 = vld [vmem:[#allocation43_spill] sm:$0xff]  ;;  %v15604_v25 = vld [vmem:[#allocation45_spill] sm:$0xff] }
 0x1da   :  { %15584 = vst [vmem:[#allocation33_spill] sm:$0xff] %v13274_v4  ;;  %10029 = vmatpush3.bf16.msra.mxu0 %v13263_v19  ;;  %10103 = vmatprep.subr.bf16.mxu1 %v13116_v40  ;;  %v13290_v13 = vpack.c.bf16 %v15592_v26, %v15590_v14  ;;  %v13298_v44 = vpack.c.bf16 %v15596_v23, %v15594_v39  ;;  %v15607_v26 = vld [vmem:[#allocation11_spill] sm:$0xff]  ;;  %v13399_v56 = vld [vmem:[%s15054_s5 + $0x2f0] sm:$0xff] }
 0x1db   :  { %10031 = vmatprep.subr.bf16.mxu0 %v13274_v4  ;;  %v10072_v55 = vpack.c.bf16 %v15601_v24, %v15600_v27  ;;  %v5563_v28 = vand.u32 4294901760, %v5562_v61  ;;  %v10074_v11 = vpack.c.bf16 %v15603_v53, %v15602_v5  ;;  %v10076_v14 = vpack.c.bf16 %v15605_v21, %v15604_v25  ;;  %v13326_v39 = vld [vmem:[%s15054_s5 + $0x240] sm:$0xff]  ;;  %v13331_v38 = vld [vmem:[%s15054_s5 + $0x248] sm:$0xff]  ;;  %15619 = vst [vmem:[#allocation27_spill] sm:$0xff] %v13399_v56 }
 0x1dc   :  { %5796 = vmatmul.mubr.f32.vlgmr.msra.gmra.mrb[16].mxu1 %v13255_v0  ;;  %v10078_v30 = vpack.c.bf16 %v15607_v26, %v15606_v37  ;;  %15608 = vst [vmem:[#allocation3_spill] sm:$0xff] %v13326_v39  ;;  %15609 = vst [vmem:[#allocation7_spill] sm:$0xff] %v13331_v38  ;;  %v15611_v23 = vld [vmem:[#allocation15_spill] sm:$0xff]  ;;  %v10088_v63 = vpack.c.bf16 %v13089_v1, %v13084_v12  ;;  %v13404_v12 = vld [vmem:[%s15054_s5 + $0x2f8] sm:$0xff] }
 0x1dd   :  { %10105 = vmatpush3.bf16.msra.mxu1 %v13146_v34  ;;  %6038 = vmatprep.mubr.f32.mxu1 %v15597_v46  ;;  %v15197_v46 = vand.u32 4294901760, %v13326_v39  ;;  %15620 = vst [vmem:[#allocation28_spill] sm:$0xff] %v13404_v12  ;;  %v13417_v1 = vld [vmem:[%s15054_s5 + $0x278] sm:$0xff] }
 0x1de   :  { %10033 = vmatpush3.bf16.msra.mxu0 %v13281_v51  ;;  %10107 = vmatprep.subr.bf16.mxu1 %v13153_v47  ;;  %15622 = vst [vmem:[#allocation35_spill] sm:$0xff] %v13417_v1 }
 0x1df   :  { %10035 = vmatprep.subr.bf16.mxu0 %v13290_v13 }
 0x1e1   :  { %10109 = vmatpush3.bf16.msra.mxu1 %v13173_v22 }
 0x1e2   :  { %10037 = vmatpush3.bf16.msra.mxu0 %v13298_v44  ;;  %10111 = vmatprep.subr.bf16.mxu1 %v13187_v52 }
 0x1e3   :  { %10071 = vmatprep.subr.bf16.mxu0 %v10070_v20  ;;  %v15198_v20 = vand.u32 4294901760, %v13331_v38 }
 0x1e5   :  { %5564 = vmatmul.mubr.f32.vlgmr.msra.gmra.mrb[14].mxu0 %v5563_v28  ;;  %10113 = vmatpush3.bf16.msra.mxu1 %v13199_v33  ;;  %v13352_v58 = vsub.f32 %v13331_v38, %v15198_v20  ;;  %v13370_v20 = vld [vmem:[%s15054_s5 + $0x2e0] sm:$0xff] }
 0x1e6   :  { %10073 = vmatpush3.bf16.msra.mxu0 %v10072_v55  ;;  %5931 = vmatprep.mubr.f32.mxu0 %v13057_v31  ;;  %v15610_v31 = vld [vmem:[#allocation12_spill] sm:$0xff]  ;;  %15615 = vst [vmem:[#allocation10_spill] sm:$0xff] %v13370_v20  ;;  %v13385_v38 = vld [vmem:[%s15054_s5 + $0x260] sm:$0xff]  ;;  %v15628_v0 = vand.u32 4294901760, %v13370_v20 }
 0x1e7   :  { %10075 = vmatprep.subr.bf16.mxu0 %v10074_v11  ;;  %10115 = vmatprep.subr.bf16.mxu1 %v13206_v41  ;;  %v10080_v61 = vpack.c.bf16 %v15611_v23, %v15610_v31  ;;  %v15612_v55 = vld [vmem:[#allocation20_spill] sm:$0xff]  ;;  %v10084_v11 = vpack.c.bf16 %v13051_v48, %v13046_v32  ;;  %15617 = vst [vmem:[#allocation24_spill] sm:$0xff] %v13385_v38 }
 0x1e8   :  { %v10082_v28 = vpack.c.bf16 %v13016_v43, %v15612_v55 }
 0x1e9   :  { %10117 = vmatpush3.bf16.msra.mxu1 %v13226_v3 }
 0x1ea   :  { %10077 = vmatpush3.bf16.msra.mxu0 %v10076_v14  ;;  %10119 = vmatprep.subr.bf16.mxu1 %v13232_v49  ;;  %v13347_v14 = vsub.f32 %v13326_v39, %v15197_v46  ;;  %v10086_v46 = vpack.c.bf16 %v13069_v6, %v13064_v7  ;;  %v13390_v39 = vld [vmem:[%s15054_s5 + $0x268] sm:$0xff] }
 0x1eb   :  { %10079 = vmatprep.subr.bf16.mxu0 %v10078_v30  ;;  %v13357_v30 = vld [vmem:[%s15054_s5 + $0x250] sm:$0xff]  ;;  %15618 = vst [vmem:[#allocation26_spill] sm:$0xff] %v13390_v39 }
 0x1ec   :  { %15613 = vst [vmem:[#allocation8_spill] sm:$0xff] %v13357_v30  ;;  %v15626_v6 = vand.u32 4294901760, %v13357_v30 }
 0x1ed   :  { %10121 = vmatpush3.bf16.msra.mxu1 %v13246_v16 }
 0x1ee   :  { %10081 = vmatpush3.bf16.msra.mxu0 %v10080_v61  ;;  %v13362_v61 = vld [vmem:[%s15054_s5 + $0x258] sm:$0xff]  ;;  %10123 = vmatprep.subr.bf16.mxu1 %v13252_v9  ;;  %v10092_v9 = vpack.c.bf16 %v12546_v2, %v15543_v18  ;;  %v13433_v7 = vsub.f32 %v13357_v30, %v15626_v6  ;;  %v15218_v2 = vand.u32 4294901760, %v13399_v56 }
 0x1ef   :  { %15614 = vst [vmem:[#allocation9_spill] sm:$0xff] %v13362_v61  ;;  %10083 = vmatprep.subr.bf16.mxu0 %v10082_v28  ;;  %v13412_v28 = vld [vmem:[%s15054_s5 + $0x270] sm:$0xff] }
 0x1f0   :  { %15621 = vst [vmem:[#allocation29_spill] sm:$0xff] %v13412_v28  ;;  %v13485_v18 = vsub.f32 %v13399_v56, %v15218_v2 }
 0x1f1   :  { %10125 = vmatpush3.bf16.msra.mxu1 %v13263_v19  ;;  %v15623_v19 = vand.u32 4294901760, %v13347_v14 }
 0x1f2   :  { %10085 = vmatpush3.bf16.msra.mxu0 %v10084_v11  ;;  %v10090_v11 = vpack.c.bf16 %v13103_v29, %v13098_v42  ;;  %10127 = vmatprep.subr.bf16.mxu1 %v13274_v4  ;;  %v15624_v29 = vand.u32 4294901760, %v13352_v58  ;;  %v15627_v4 = vand.u32 4294901760, %v13362_v61 }
 0x1f3   :  { %10087 = vmatprep.subr.bf16.mxu0 %v10086_v46 }
 0x1f4   :  { %v13428_v42 = vpack.c.bf16 %v15624_v29, %v15623_v19  ;;  %v13438_v16 = vsub.f32 %v13362_v61, %v15627_v4  ;;  %v13445_v29 = vsub.f32 %v13370_v20, %v15628_v0  ;;  %v15629_v19 = vand.u32 4294901760, %v13375_v10  ;;  %v13468_v4 = vld [vmem:[%s15054_s5 + $0x288] sm:$0xff] }
 0x1f5   :  { %10129 = vmatpush3.bf16.msra.mxu1 %v13281_v51  ;;  %v10096_v0 = vpack.c.bf16 %v15556_v57, %v15554_v45  ;;  %v15634_v57 = vand.u32 4294901760, %v13417_v1 }
 0x1f6   :  { %15625 = vst [vmem:[#allocation37_spill] sm:$0xff] %v13428_v42  ;;  %10089 = vmatpush3.bf16.msra.mxu0 %v10088_v63  ;;  %v13450_v6 = vsub.f32 %v13375_v10, %v15629_v19  ;;  %v10094_v63 = vpack.c.bf16 %v12587_v36, %v12582_v62  ;;  %10131 = vmatprep.subr.bf16.mxu1 %v13290_v13  ;;  %v13463_v19 = vld [vmem:[%s15054_s5 + $0x280] sm:$0xff]  ;;  %v15631_v36 = vand.u32 4294901760, %v13390_v39  ;;  %v15632_v42 = vand.u32 4294901760, %v13404_v12 }
 0x1f7   :  { %10091 = vmatprep.subr.bf16.mxu0 %v10090_v11  ;;  %v15630_v11 = vand.u32 4294901760, %v13385_v38  ;;  %v13502_v2 = vsub.f32 %v13417_v1, %v15634_v57  ;;  %v13518_v57 = vld [vmem:[%s15054_s5 + $0x208] sm:$0xff] }
 0x1f8   :  { %v13478_v62 = vsub.f32 %v13390_v39, %v15631_v36  ;;  %v13490_v10 = vsub.f32 %v13404_v12, %v15632_v42  ;;  %v15633_v39 = vand.u32 4294901760, %v13412_v28  ;;  %v10098_v42 = vpack.c.bf16 %v12645_v35, %v12640_v60 }
 0x1f9   :  { %v13473_v46 = vsub.f32 %v13385_v38, %v15630_v11  ;;  %v15222_v11 = vand.u32 4294901760, %v13445_v29  ;;  %15635 = vst [vmem:[#allocation38_spill] sm:$0xff] %v13502_v2  ;;  %10133 = vmatpush3.bf16.msra.mxu1 %v13298_v44  ;;  %v15636_v60 = vand.u32 4294901760, %v13433_v7  ;;  %v15637_v36 = vand.u32 4294901760, %v13438_v16 }
 0x1fa   :  { %10093 = vmatpush3.bf16.msra.mxu0 %v10092_v9  ;;  %v13497_v45 = vsub.f32 %v13412_v28, %v15633_v39  ;;  %10167 = vmatprep.subr.bf16.mxu1 %v13116_v40  ;;  %v13513_v39 = vld [vmem:[%s15054_s5 + $0x200] sm:$0xff]  ;;  %v15639_v40 = vand.u32 4294901760, %v13450_v6  ;;  %v15223_v28 = vand.u32 4294901760, %v13485_v18  ;;  %v10100_v35 = vpack.c.bf16 %v12661_v8, %v15564_v17 }
 0x1fb   :  { %10095 = vmatprep.subr.bf16.mxu0 %v10094_v63  ;;  %v13526_v9 = vpack.c.bf16 %v15637_v36, %v15636_v60  ;;  %v15641_v63 = vand.u32 4294901760, %v13267_v54  ;;  %v15228_v8 = vand.u32 4294901760, %v13513_v39  ;;  %v15647_v60 = vand.u32 4294901760, %v13490_v10 }
 0x1fc   :  { %v13532_v1 = vpack.c.bf16 %v15639_v40, %v15222_v11  ;;  %v15643_v40 = vand.u32 4294901760, %v13478_v62  ;;  %v15659_v17 = vand.u32 4294901760, %v15603_v53  ;;  %v15663_v53 = vand.u32 4294901760, %v15604_v25 }
 0x1fd   :  { %15638 = vst [vmem:[#allocation39_spill] sm:$0xff] %v13526_v9  ;;  %6042 = vmatmul.mubr.f32.vlgmr.msra.gmra.mrb[18].mxu1 %v15641_v63  ;;  %v15642_v9 = vand.u32 4294901760, %v13473_v46  ;;  %v15645_v63 = vand.u32 4294901760, %v15598_v59  ;;  %v13560_v36 = vpack.c.bf16 %v15647_v60, %v15223_v28  ;;  %v15653_v60 = vand.u32 4294901760, %v13497_v45 }
 0x1fe   :  { %15640 = vst [vmem:[#allocation42_spill] sm:$0xff] %v13532_v1  ;;  %10097 = vmatpush3.bf16.msra.mxu0 %v10096_v0  ;;  %10169 = vmatpush3.bf16.msra.mxu1 %v13146_v34  ;;  %v15646_v0 = vand.u32 4294901760, %v15599_v50  ;;  %v15649_v34 = vand.u32 4294901760, %v13463_v19  ;;  %v15651_v50 = vand.u32 4294901760, %v13468_v4  ;;  %v15658_v28 = vand.u32 4294901760, %v15602_v5  ;;  %v15686_v1 = vld [vmem:[#allocation25_spill] sm:$0xff] }
 0x1ff   :  { %v13546_v11 = vpack.c.bf16 %v15643_v40, %v15642_v9  ;;  %6312 = vmatprep.mubr.f32.mxu1 %v13010_v15  ;;  %15648 = vst [vmem:[#allocation45_spill] sm:$0xff] %v13560_v36  ;;  %10099 = vmatprep.subr.bf16.mxu0 %v10098_v42  ;;  %v13576_v40 = vld [vmem:[%s15054_s5 + $0x290] sm:$0xff]  ;;  %v15654_v42 = vand.u32 4294901760, %v13502_v2  ;;  %v15666_v25 = vand.u32 4294901760, %v15607_v26 }
 0x200   :  { %v10134_v12 = vpack.c.bf16 %v15646_v0, %v15645_v63  ;;  %10171 = vmatprep.subr.bf16.mxu1 %v13153_v47  ;;  %v13566_v59 = vsub.f32 %v13463_v19, %v15649_v34  ;;  %v13571_v9 = vsub.f32 %v13468_v4, %v15651_v50  ;;  %v15656_v63 = vand.u32 4294901760, %v15600_v27  ;;  %v13591_v50 = vld [vmem:[%s15054_s5 + $0x298] sm:$0xff] }
 0x201   :  { %15644 = vst [vmem:[#allocation43_spill] sm:$0xff] %v13546_v11  ;;  %v13582_v47 = vpack.c.bf16 %v15654_v42, %v15653_v60  ;;  %v15657_v0 = vand.u32 4294901760, %v15601_v24  ;;  %v10138_v60 = vpack.c.bf16 %v15659_v17, %v15658_v28  ;;  %v13601_v27 = vsub.f32 %v13513_v39, %v15228_v8 }
 0x202   :  { %15650 = vst [vmem:[#allocation5_spill] sm:$0xff] %v13566_v59  ;;  %15652 = vst [vmem:[#allocation6_spill] sm:$0xff] %v13571_v9  ;;  %10101 = vmatpush3.bf16.msra.mxu0 %v10100_v35  ;;  %10173 = vmatpush3.bf16.msra.mxu1 %v13173_v22  ;;  %v15661_v24 = vand.u32 4294901760, %v13518_v57  ;;  %v15225_v42 = vand.u32 4294901760, %v13576_v40  ;;  %v15226_v22 = vand.u32 4294901760, %v13571_v9  ;;  %v15227_v5 = vand.u32 4294901760, %v13591_v50 }
 0x203   :  { %15655 = vst [vmem:[#allocation11_spill] sm:$0xff] %v13582_v47  ;;  %v10136_v34 = vpack.c.bf16 %v15657_v0, %v15656_v63  ;;  %10135 = vmatprep.subr.bf16.mxu0 %v10134_v12  ;;  %15660 = vst [vmem:[#allocation12_spill] sm:$0xff] %v13601_v27  ;;  %10175 = vmatprep.subr.bf16.mxu1 %v13187_v52  ;;  %v15224_v12 = vand.u32 4294901760, %v13566_v59  ;;  %v15664_v28 = vand.u32 4294901760, %v15605_v21  ;;  %v13622_v52 = vld [vmem:[%s15054_s5 + $0x210] sm:$0xff]  ;;  %v13627_v63 = vld [vmem:[%s15054_s5 + $0x218] sm:$0xff] }
 0x204   :  { %v13606_v35 = vsub.f32 %v13518_v57, %v15661_v24  ;;  %v15230_v0 = vand.u32 4294901760, %v13601_v27  ;;  %v13644_v24 = vsub.f32 %v13576_v40, %v15225_v42  ;;  %v13661_v26 = vsub.f32 %v13591_v50, %v15227_v5 }
 0x205   :  { %5934 = vmatmul.mubr.f32.vlgmr.msra.gmra.mrb[16].mxu0 %v13267_v54  ;;  %v10140_v17 = vpack.c.bf16 %v15664_v28, %v15663_v53  ;;  %v13632_v54 = vld [vmem:[%s15054_s5 + $0x2a0] sm:$0xff]  ;;  %v13649_v53 = vld [vmem:[%s15054_s5 + $0x2a8] sm:$0xff]  ;;  %v15231_v28 = vand.u32 4294901760, %v13627_v63  ;;  %v15672_v5 = vand.u32 4294901760, %v13016_v43 }
 0x206   :  { %15662 = vst [vmem:[#allocation15_spill] sm:$0xff] %v13606_v35  ;;  %10137 = vmatpush3.bf16.msra.mxu0 %v10136_v34  ;;  %6208 = vmatprep.mubr.f32.mxu0 %v13010_v15  ;;  %v15665_v15 = vand.u32 4294901760, %v15606_v37  ;;  %v15229_v34 = vand.u32 4294901760, %v13606_v35  ;;  %15667 = vst [vmem:[#allocation20_spill] sm:$0xff] %v13644_v24  ;;  %v6554_v37 = vsub.f32 %v13571_v9, %v15226_v22  ;;  %v15233_v42 = vand.u32 4294901760, %v13649_v53  ;;  %v13691_v43 = vld [vmem:[%s15054_s5 + $0x228] sm:$0xff] }
 0x207   :  { %10177 = vmatpush3.bf16.msra.mxu1 %v13199_v33  ;;  %10139 = vmatprep.subr.bf16.mxu0 %v10138_v60  ;;  %v6547_v33 = vsub.f32 %v13566_v59, %v15224_v12  ;;  %15668 = vst [vmem:[#allocation47_spill] sm:$0xff] %v13661_v26  ;;  %v15232_v60 = vand.u32 4294901760, %v13622_v52  ;;  %v15671_v22 = vand.u32 4294901760, %v15612_v55  ;;  %v13696_v55 = vld [vmem:[%s15054_s5 + $0x2b0] sm:$0xff]  ;;  %v15685_v11 = vand.u32 4294901760, %v13644_v24  ;;  %v15693_v9 = vld [vmem:[#allocation19_spill] sm:$0xff] }
 0x208   :  { %v10142_v21 = vpack.c.bf16 %v15666_v25, %v15665_v15  ;;  %10179 = vmatprep.subr.bf16.mxu1 %v13206_v41  ;;  %v15669_v41 = vand.u32 4294901760, %v15610_v31  ;;  %v15670_v25 = vand.u32 4294901760, %v15611_v23  ;;  %v6435_v15 = vsub.f32 %v13601_v27, %v15230_v0 }
 0x209   :  { %v10146_v8 = vpack.c.bf16 %v15672_v5, %v15671_v22  ;;  %v6442_v31 = vsub.f32 %v13606_v35, %v15229_v34  ;;  %v15673_v22 = vand.u32 4294901760, %v13046_v32  ;;  %v15674_v5 = vand.u32 4294901760, %v13051_v48  ;;  %v13722_v48 = vld [vmem:[%s15054_s5 + $0x2b8] sm:$0xff] }
 0x20a   :  { %10141 = vmatpush3.bf16.msra.mxu0 %v10140_v17  ;;  %v10144_v12 = vpack.c.bf16 %v15670_v25, %v15669_v41  ;;  %v6555_v41 = vand.u32 4294901760, %v6554_v37  ;;  %v13707_v34 = vsub.f32 %v13622_v52, %v15232_v60  ;;  %v13712_v0 = vsub.f32 %v13627_v63, %v15231_v28  ;;  %v15680_v28 = vld [vmem:[#allocation22_spill] sm:$0xff]  ;;  %v15683_v25 = vld [vmem:[#allocation16_spill] sm:$0xff]  ;;  %v15689_v35 = vld [vmem:[#allocation17_spill] sm:$0xff] }
 0x20b   :  { %10181 = vmatpush3.bf16.msra.mxu1 %v13226_v3  ;;  %10143 = vmatprep.subr.bf16.mxu0 %v10142_v21  ;;  %v13686_v3 = vld [vmem:[%s15054_s5 + $0x220] sm:$0xff]  ;;  %v10148_v17 = vpack.c.bf16 %v15674_v5, %v15673_v22  ;;  %v6548_v21 = vand.u32 4294901760, %v6547_v33  ;;  %v13727_v33 = vsub.f32 %v13649_v53, %v15233_v42  ;;  %v15684_v23 = vand.u32 4294901760, %v15683_v25  ;;  %v15687_v37 = vld [vmem:[#allocation4_spill] sm:$0xff] }
 0x20c   :  { %10183 = vmatprep.subr.bf16.mxu1 %v13232_v49  ;;  %15675 = vst [vmem:[#allocation48_spill] sm:$0xff] %v13707_v34  ;;  %15676 = vst [vmem:[#allocation49_spill] sm:$0xff] %v13712_v0  ;;  %v15677_v49 = vand.u32 4294901760, %v13632_v54  ;;  %v6443_v36 = vand.u32 4294901760, %v6442_v31  ;;  %v6561_v42 = vsub.f32 %v13644_v24, %v15685_v11  ;;  %v15688_v22 = vand.u32 4294901760, %v15687_v37  ;;  %v13755_v11 = vld [vmem:[%s15054_s5 + $0x230] sm:$0xff] }
 0x20d   :  { %15679 = vst [vmem:[#allocation51_spill] sm:$0xff] %v13727_v33  ;;  %v15690_v5 = vand.u32 4294901760, %v15689_v35  ;;  %v13749_v25 = vpack.c.bf16 %v6555_v41, %v6548_v21  ;;  %v15695_v35 = vand.u32 4294901760, %v13661_v26  ;;  %v13771_v21 = vld [vmem:[%s15054_s5 + $0x2c0] sm:$0xff]  ;;  %v13776_v41 = vld [vmem:[%s15054_s5 + $0x2c8] sm:$0xff]  ;;  %v15710_v31 = vand.u32 4294901760, %v13727_v33 }
 0x20e   :  { %v13717_v32 = vsub.f32 %v13632_v54, %v15677_v49  ;;  %10145 = vmatpush3.bf16.msra.mxu0 %v10144_v12  ;;  %v15681_v49 = vld [vmem:[#allocation21_spill] sm:$0xff]  ;;  %v6436_v12 = vand.u32 4294901760, %v6435_v15  ;;  %v6562_v37 = vand.u32 4294901760, %v6561_v42 }
 0x20f   :  { %10185 = vmatpush3.bf16.msra.mxu1 %v15680_v28  ;;  %10147 = vmatprep.subr.bf16.mxu0 %v10146_v8  ;;  %v15682_v60 = vand.u32 4294901760, %v15681_v49  ;;  %v10152_v27 = vpack.c.bf16 %v15690_v5, %v15688_v22  ;;  %v15691_v28 = vld [vmem:[#allocation18_spill] sm:$0xff]  ;;  %v15694_v49 = vand.u32 4294901760, %v15693_v9  ;;  %v6568_v15 = vsub.f32 %v13661_v26, %v15695_v35  ;;  %v15705_v26 = vld [vmem:[#allocation33_spill] sm:$0xff] }
 0x210   :  { %15678 = vst [vmem:[#allocation50_spill] sm:$0xff] %v13717_v32  ;;  %10187 = vmatprep.subr.bf16.mxu1 %v15686_v1  ;;  %v15692_v8 = vand.u32 4294901760, %v15691_v28  ;;  %v13760_v1 = vld [vmem:[%s15054_s5 + $0x238] sm:$0xff]  ;;  %v15696_v22 = vand.u32 4294901760, %v13686_v3  ;;  %v15698_v28 = vand.u32 4294901760, %v13691_v43  ;;  %v6582_v56 = vsub.f32 %v13727_v33, %v15710_v31 }
 0x211   :  { %v10150_v47 = vpack.c.bf16 %v15684_v23, %v15682_v60  ;;  %v15702_v23 = vld [vmem:[#allocation31_spill] sm:$0xff]  ;;  %v15703_v9 = vld [vmem:[#allocation46_spill] sm:$0xff] }
 0x212   :  { %v10154_v59 = vpack.c.bf16 %v15694_v49, %v15692_v8  ;;  %10149 = vmatpush3.bf16.msra.mxu0 %v10148_v17  ;;  %v13782_v5 = vsub.f32 %v13686_v3, %v15696_v22  ;;  %v13787_v8 = vsub.f32 %v13691_v43, %v15698_v28  ;;  %v15700_v49 = vand.u32 4294901760, %v13696_v55  ;;  %v13816_v42 = vld [vmem:[%s15054_s5 + $0x2d8] sm:$0xff] }
 0x213   :  { %10189 = vmatpush3.bf16.msra.mxu1 %v15702_v23  ;;  %10151 = vmatprep.subr.bf16.mxu0 %v10150_v47  ;;  %v10232_v17 = vpack.c.bf16 %v6443_v36, %v6436_v12  ;;  %v13798_v60 = vand.u32 4294901760, %v15703_v9  ;;  %v15706_v28 = vand.u32 4294901760, %v13722_v48  ;;  %v13811_v36 = vld [vmem:[%s15054_s5 + $0x2d0] sm:$0xff]  ;;  %v15707_v12 = vand.u32 4294901760, %v13707_v34 }
 0x214   :  { %15697 = vst [vmem:[#allocation22_spill] sm:$0xff] %v13782_v5  ;;  %15699 = vst [vmem:[#allocation21_spill] sm:$0xff] %v13787_v8  ;;  %v13792_v35 = vsub.f32 %v13696_v55, %v15700_v49  ;;  %10191 = vmatprep.subr.bf16.mxu1 %v15705_v26  ;;  %v6569_v26 = vand.u32 4294901760, %v6568_v15  ;;  %v15709_v47 = vand.u32 4294901760, %v13717_v32 }
 0x215   :  { %15704 = vst [vmem:[#allocation25_spill] sm:$0xff] %v13798_v60  ;;  %v13804_v24 = vsub.f32 %v13722_v48, %v15706_v28  ;;  %v6449_v23 = vsub.f32 %v13707_v34, %v15707_v12  ;;  %v15708_v28 = vand.u32 4294901760, %v13712_v0  ;;  %v15711_v12 = vand.u32 4294901760, %v13755_v11 }
 0x216   :  { %15701 = vst [vmem:[#allocation16_spill] sm:$0xff] %v13792_v35  ;;  %v6575_v22 = vsub.f32 %v13717_v32, %v15709_v47  ;;  %10153 = vmatpush3.bf16.msra.mxu0 %v10152_v27  ;;  %v15712_v27 = vand.u32 4294901760, %v13760_v1  ;;  %v13848_v20 = vsub.f32 %v15703_v9, %v13798_v60  ;;  %v10234_v31 = vpack.c.bf16 %v6569_v26, %v6562_v37  ;;  %v15715_v9 = vld [vmem:[#allocation32_spill] sm:$0xff]  ;;  %v15719_v37 = vld [vmem:[#allocation34_spill] sm:$0xff] }
 0x217   :  { %v6456_v49 = vsub.f32 %v13712_v0, %v15708_v28  ;;  %10193 = vmatpush3.bf16.msra.mxu1 %v13281_v51  ;;  %10155 = vmatprep.subr.bf16.mxu0 %v10154_v59  ;;  %v13837_v28 = vsub.f32 %v13755_v11, %v15711_v12  ;;  %v15713_v59 = vand.u32 4294901760, %v13771_v21  ;;  %v6450_v38 = vand.u32 4294901760, %v6449_v23 }
 0x218   :  { %v13842_v47 = vsub.f32 %v13760_v1, %v15712_v27  ;;  %10195 = vmatprep.subr.bf16.mxu1 %v13290_v13  ;;  %v15714_v27 = vand.u32 4294901760, %v13776_v41  ;;  %v6576_v32 = vand.u32 4294901760, %v6575_v22  ;;  %v6583_v0 = vand.u32 4294901760, %v6582_v56 }
 0x219   :  { %v13855_v12 = vsub.f32 %v13771_v21, %v15713_v59  ;;  %v6457_v33 = vand.u32 4294901760, %v6456_v49  ;;  %v15716_v13 = vand.u32 4294901760, %v13782_v5  ;;  %v15717_v34 = vand.u32 4294901760, %v13787_v8 }
 0x21a   :  { %v13860_v15 = vsub.f32 %v13776_v41, %v15714_v27  ;;  %10157 = vmatpush3.bf16.msra.mxu0 %v15715_v9  ;;  %v15718_v61 = vand.u32 4294901760, %v13792_v35  ;;  %v15720_v49 = vand.u32 4294901760, %v13811_v36  ;;  %v15722_v23 = vand.u32 4294901760, %v13816_v42 }
 0x21b   :  { %v6463_v51 = vsub.f32 %v13782_v5, %v15716_v13  ;;  %v6470_v59 = vsub.f32 %v13787_v8, %v15717_v34  ;;  %10197 = vmatpush3.bf16.msra.mxu1 %v13298_v44  ;;  %10159 = vmatprep.subr.bf16.mxu0 %v15719_v37  ;;  %v15265_v13 = vand.u32 4294901760, %v13855_v12  ;;  %v10236_v56 = vpack.c.bf16 %v6457_v33, %v6450_v38 }
 0x21c   :  { %v6589_v27 = vsub.f32 %v13792_v35, %v15718_v61  ;;  %v13879_v26 = vsub.f32 %v13811_v36, %v15720_v49  ;;  %v13884_v34 = vsub.f32 %v13816_v42, %v15722_v23  ;;  %10231 = vmatprep.subr.bf16.mxu1 %v13749_v25  ;;  %v15724_v61 = vand.u32 4294901760, %v13804_v24  ;;  %v15727_v23 = vld [vmem:[#allocation30_spill] sm:$0xff]  ;;  %v15728_v25 = vld [vmem:[#allocation36_spill] sm:$0xff] }
 0x21d   :  { %v15266_v37 = vand.u32 4294901760, %v13860_v15  ;;  %v15725_v49 = vand.u32 4294901760, %v13463_v19  ;;  %v15726_v22 = vand.u32 4294901760, %v13468_v4  ;;  %v10238_v44 = vpack.c.bf16 %v6583_v0, %v6576_v32 }
 0x21e   :  { %15721 = vst [vmem:[#allocation4_spill] sm:$0xff] %v13879_v26  ;;  %15723 = vst [vmem:[#allocation17_spill] sm:$0xff] %v13884_v34  ;;  %v6596_v9 = vsub.f32 %v13804_v24, %v15724_v61  ;;  %6314 = vmatmul.mubr.f32.vlgmr.msra.gmra.mrb[20].mxu1 %v15727_v23  ;;  %10161 = vmatpush3.bf16.msra.mxu0 %v15728_v25  ;;  %v6464_v8 = vand.u32 4294901760, %v6463_v51  ;;  %v6471_v5 = vand.u32 4294901760, %v6470_v59  ;;  %v6590_v30 = vand.u32 4294901760, %v6589_v27 }
 0x21f   :  { %v13897_v35 = vpack.c.bf16 %v15726_v22, %v15725_v49  ;;  %10233 = vmatpush3.bf16.msra.mxu1 %v10232_v17  ;;  %6656 = vmatprep.mubr.f32.mxu1 %v13798_v60  ;;  %v15729_v61 = vand.u32 4294901760, %v13837_v28  ;;  %v15730_v19 = vand.u32 4294901760, %v13842_v47  ;;  %v15267_v33 = vand.u32 4294901760, %v13879_v26  ;;  %v15731_v49 = vld [vmem:[#allocation40_spill] sm:$0xff]  ;;  %v15828_v60 = vld [vmem:[#allocation49_spill] sm:$0xff] }
 0x220   :  { %10163 = vmatprep.subr.bf16.mxu0 %v15731_v49  ;;  %10235 = vmatprep.subr.bf16.mxu1 %v10234_v31  ;;  %v15732_v0 = vand.u32 4294901760, %v13848_v20  ;;  %v6597_v17 = vand.u32 4294901760, %v6596_v9  ;;  %v6603_v51 = vsub.f32 %v13855_v12, %v15265_v13  ;;  %v6610_v59 = vsub.f32 %v13860_v15, %v15266_v37  ;;  %v15736_v31 = vld [vmem:[#allocation41_spill] sm:$0xff] }
 0x221   :  { %v6477_v38 = vsub.f32 %v13837_v28, %v15729_v61  ;;  %v6484_v4 = vsub.f32 %v13842_v47, %v15730_v19  ;;  %v15733_v27 = vand.u32 4294901760, %v13513_v39  ;;  %v15734_v25 = vand.u32 4294901760, %v13518_v57 }
 0x222   :  { %v6418_v32 = vsub.f32 %v13848_v20, %v15732_v0  ;;  %10165 = vmatpush3.bf16.msra.mxu0 %v15736_v31  ;;  %v10240_v19 = vpack.c.bf16 %v6471_v5, %v6464_v8  ;;  %v15737_v49 = vand.u32 4294901760, %v13576_v40  ;;  %v15738_v9 = vand.u32 4294901760, %v13591_v50 }
 0x223   :  { %v13924_v61 = vpack.c.bf16 %v15734_v25, %v15733_v27  ;;  %v15740_v13 = vand.u32 4294901760, %v13347_v14  ;;  %v15741_v37 = vand.u32 4294901760, %v13352_v58  ;;  %10237 = vmatpush3.bf16.msra.mxu1 %v10236_v56  ;;  %10199 = vmatprep.subr.bf16.mxu0 %v13897_v35  ;;  %v6478_v57 = vand.u32 4294901760, %v6477_v38 }
 0x224   :  { %v13931_v0 = vpack.c.bf16 %v15738_v9, %v15737_v49  ;;  %v6485_v27 = vand.u32 4294901760, %v6484_v4  ;;  %v6617_v40 = vsub.f32 %v13879_v26, %v15267_v33  ;;  %v15742_v50 = vand.u32 4294901760, %v13884_v34  ;;  %10239 = vmatprep.subr.bf16.mxu1 %v10238_v44 }
 0x225   :  { %15735 = vst [vmem:[#allocation18_spill] sm:$0xff] %v13924_v61  ;;  %v6491_v22 = vsub.f32 %v13347_v14, %v15740_v13  ;;  %v6498_v39 = vsub.f32 %v13352_v58, %v15741_v37  ;;  %v6419_v8 = vand.u32 4294901760, %v6418_v32  ;;  %v10242_v13 = vpack.c.bf16 %v6597_v17, %v6590_v30  ;;  %6210 = vmatmul.mubr.f32.vlgmr.msra.gmra.mrb[18].mxu0 %v15727_v23 }
 0x226   :  { %15739 = vst [vmem:[#allocation19_spill] sm:$0xff] %v13931_v0  ;;  %v6624_v5 = vsub.f32 %v13884_v34, %v15742_v50  ;;  %v6604_v25 = vand.u32 4294901760, %v6603_v51  ;;  %v6611_v31 = vand.u32 4294901760, %v6610_v59  ;;  %v15743_v56 = vand.u32 4294901760, %v13622_v52  ;;  %10201 = vmatpush3.bf16.msra.mxu0 %v13924_v61 }
 0x227   :  { %v15744_v37 = vand.u32 4294901760, %v13627_v63  ;;  %6420 = vmatprep.mubr.f32.mxu0 %v6419_v8  ;;  %v6492_v4 = vand.u32 4294901760, %v6491_v22  ;;  %v6499_v49 = vand.u32 4294901760, %v6498_v39  ;;  %v15746_v9 = vand.u32 4294901760, %v13433_v7  ;;  %10241 = vmatpush3.bf16.msra.mxu1 %v10240_v19 }
 0x228   :  { %v15747_v30 = vand.u32 4294901760, %v13438_v16  ;;  %10203 = vmatprep.subr.bf16.mxu0 %v13931_v0  ;;  %v10244_v52 = vpack.c.bf16 %v6485_v27, %v6478_v57  ;;  %v15748_v63 = vand.u32 4294901760, %v13632_v54  ;;  %v15749_v23 = vand.u32 4294901760, %v13649_v53  ;;  %10243 = vmatprep.subr.bf16.mxu1 %v10242_v13 }
 0x229   :  { %v13951_v38 = vpack.c.bf16 %v15744_v37, %v15743_v56  ;;  %v6505_v44 = vsub.f32 %v13433_v7, %v15746_v9  ;;  %v6618_v22 = vand.u32 4294901760, %v6617_v40  ;;  %v6625_v51 = vand.u32 4294901760, %v6624_v5 }
 0x22a   :  { %v6512_v32 = vsub.f32 %v13438_v16, %v15747_v30  ;;  %v13965_v17 = vpack.c.bf16 %v15749_v23, %v15748_v63  ;;  %v10246_v59 = vpack.c.bf16 %v6611_v31, %v6604_v25  ;;  %v15751_v39 = vand.u32 4294901760, %v13445_v29 }
 0x22b   :  { %15745 = vst [vmem:[#allocation31_spill] sm:$0xff] %v13951_v38  ;;  %v15752_v8 = vand.u32 4294901760, %v13450_v6  ;;  %v15753_v57 = vand.u32 4294901760, %v13686_v3  ;;  %v15754_v54 = vand.u32 4294901760, %v13691_v43  ;;  %10205 = vmatpush3.bf16.msra.mxu0 %v13951_v38  ;;  %v10248_v53 = vpack.c.bf16 %v6499_v49, %v6492_v4  ;;  %10245 = vmatpush3.bf16.msra.mxu1 %v10244_v52 }
 0x22c   :  { %15750 = vst [vmem:[#allocation46_spill] sm:$0xff] %v13965_v17  ;;  %v6631_v50 = vsub.f32 %v13445_v29, %v15751_v39  ;;  %v15755_v40 = vand.u32 4294901760, %v13696_v55  ;;  %v15756_v5 = vand.u32 4294901760, %v13722_v48  ;;  %v6506_v25 = vand.u32 4294901760, %v6505_v44  ;;  %10207 = vmatprep.subr.bf16.mxu0 %v13965_v17  ;;  %10247 = vmatprep.subr.bf16.mxu1 %v10246_v59 }
 0x22d   :  { %v6638_v19 = vsub.f32 %v13450_v6, %v15752_v8  ;;  %v13977_v27 = vpack.c.bf16 %v15754_v54, %v15753_v57  ;;  %v6513_v31 = vand.u32 4294901760, %v6512_v32  ;;  %v10250_v56 = vpack.c.bf16 %v6625_v51, %v6618_v22  ;;  %v15761_v32 = vld [vmem:[#allocation44_spill] sm:$0xff] }
 0x22e   :  { %v13984_v13 = vpack.c.bf16 %v15756_v5, %v15755_v40  ;;  %v15757_v3 = vand.u32 4294901760, %v13473_v46  ;;  %v15758_v37 = vand.u32 4294901760, %v13478_v62  ;;  %v6632_v55 = vand.u32 4294901760, %v6631_v50 }
 0x22f   :  { %v6639_v49 = vand.u32 4294901760, %v6638_v19  ;;  %v15759_v48 = vand.u32 4294901760, %v13485_v18  ;;  %v15760_v44 = vand.u32 4294901760, %v13490_v10  ;;  %v14000_v52 = vand.u32 4294901760, %v15761_v32  ;;  %10209 = vmatpush3.bf16.msra.mxu0 %v13977_v27  ;;  %10249 = vmatpush3.bf16.msra.mxu1 %v10248_v53  ;;  %v15770_v53 = vld [vmem:[#allocation3_spill] sm:$0xff] }
 0x230   :  { %v6519_v43 = vsub.f32 %v13473_v46, %v15757_v3  ;;  %v6526_v4 = vsub.f32 %v13478_v62, %v15758_v37  ;;  %v15763_v63 = vand.u32 4294901760, %v13755_v11  ;;  %v15764_v23 = vand.u32 4294901760, %v13760_v1  ;;  %10211 = vmatprep.subr.bf16.mxu0 %v13984_v13  ;;  %10251 = vmatprep.subr.bf16.mxu1 %v10250_v56 }
 0x231   :  { %v6645_v9 = vsub.f32 %v13485_v18, %v15759_v48  ;;  %v6652_v30 = vsub.f32 %v13490_v10, %v15760_v44  ;;  %15762 = vst [vmem:[#allocation33_spill] sm:$0xff] %v14000_v52  ;;  %v10252_v51 = vpack.c.bf16 %v6513_v31, %v6506_v25  ;;  %v15765_v59 = vand.u32 4294901760, %v13771_v21  ;;  %v15772_v31 = vld [vmem:[#allocation7_spill] sm:$0xff]  ;;  %v15776_v44 = vld [vmem:[#allocation8_spill] sm:$0xff] }
 0x232   :  { %v14007_v22 = vpack.c.bf16 %v15764_v23, %v15763_v63  ;;  %v15766_v39 = vand.u32 4294901760, %v13776_v41  ;;  %v6520_v8 = vand.u32 4294901760, %v6519_v43  ;;  %v6527_v19 = vand.u32 4294901760, %v6526_v4 }
 0x233   :  { %v15767_v57 = vand.u32 4294901760, %v13497_v45  ;;  %v15768_v1 = vand.u32 4294901760, %v13502_v2  ;;  %v10254_v40 = vpack.c.bf16 %v6639_v49, %v6632_v55  ;;  %v6646_v21 = vand.u32 4294901760, %v6645_v9  ;;  %10253 = vmatpush3.bf16.msra.mxu1 %v10252_v51 }
 0x234   :  { %v14013_v50 = vpack.c.bf16 %v15766_v39, %v15765_v59  ;;  %v6653_v5 = vand.u32 4294901760, %v6652_v30  ;;  %v14024_v41 = vsub.f32 %v15761_v32, %v14000_v52  ;;  %10213 = vmatpush3.bf16.msra.mxu0 %v14007_v22  ;;  %v15771_v25 = vand.u32 4294901760, %v15770_v53  ;;  %v15778_v32 = vld [vmem:[#allocation9_spill] sm:$0xff]  ;;  %v15782_v39 = vld [vmem:[#allocation23_spill] sm:$0xff] }
 0x235   :  { %v6533_v11 = vsub.f32 %v13497_v45, %v15767_v57  ;;  %v6540_v54 = vsub.f32 %v13502_v2, %v15768_v1  ;;  %v15773_v3 = vand.u32 4294901760, %v15772_v31  ;;  %v10256_v37 = vpack.c.bf16 %v6527_v19, %v6520_v8  ;;  %10255 = vmatprep.subr.bf16.mxu1 %v10254_v40  ;;  %v14058_v57 = vld [vmem:[%s15054_s5 + $0x380] sm:$0xff]  ;;  %v14078_v40 = vld [vmem:[%s15054_s5 + $0x390] sm:$0xff]  ;;  %v14093_v53 = vld [vmem:[%s15054_s5 + $0x318] sm:$0xff] }
 0x236   :  { %15769 = vst [vmem:[#allocation32_spill] sm:$0xff] %v14024_v41  ;;  %10215 = vmatprep.subr.bf16.mxu0 %v14013_v50  ;;  %v15774_v56 = vand.u32 4294901760, %v13811_v36  ;;  %v15775_v4 = vand.u32 4294901760, %v13816_v42  ;;  %v10258_v9 = vpack.c.bf16 %v6653_v5, %v6646_v21  ;;  %v15777_v30 = vand.u32 4294901760, %v15776_v44  ;;  %v15780_v42 = vld [vmem:[#allocation10_spill] sm:$0xff]  ;;  %15784 = vst [vmem:[#allocation34_spill] sm:$0xff] %v14058_v57 }
 0x237   :  { %v14031_v43 = vpack.c.bf16 %v15773_v3, %v15771_v25  ;;  %v6534_v49 = vand.u32 4294901760, %v6533_v11  ;;  %v6541_v48 = vand.u32 4294901760, %v6540_v54  ;;  %v15779_v63 = vand.u32 4294901760, %v15778_v32  ;;  %10257 = vmatpush3.bf16.msra.mxu1 %v10256_v37  ;;  %v14063_v11 = vld [vmem:[%s15054_s5 + $0x388] sm:$0xff]  ;;  %v14068_v1 = vld [vmem:[%s15054_s5 + $0x300] sm:$0xff]  ;;  %15788 = vst [vmem:[#allocation41_spill] sm:$0xff] %v14078_v40 }
 0x238   :  { %v14038_v55 = vpack.c.bf16 %v15775_v4, %v15774_v56  ;;  %v15268_v51 = vand.u32 4294901760, %v14024_v41  ;;  %v15781_v59 = vand.u32 4294901760, %v15780_v42  ;;  %v15783_v8 = vand.u32 4294901760, %v15782_v39  ;;  %15785 = vst [vmem:[#allocation30_spill] sm:$0xff] %v14063_v11  ;;  %15786 = vst [vmem:[#allocation36_spill] sm:$0xff] %v14068_v1  ;;  %10259 = vmatprep.subr.bf16.mxu1 %v10258_v9  ;;  %v14073_v54 = vld [vmem:[%s15054_s5 + $0x308] sm:$0xff] }
 0x239   :  { %10217 = vmatpush3.bf16.msra.mxu0 %v14031_v43  ;;  %v14045_v23 = vpack.c.bf16 %v15779_v63, %v15777_v30  ;;  %v10260_v36 = vpack.c.bf16 %v6541_v48, %v6534_v49  ;;  %15787 = vst [vmem:[#allocation40_spill] sm:$0xff] %v14073_v54  ;;  %v14083_v21 = vld [vmem:[%s15054_s5 + $0x398] sm:$0xff]  ;;  %v14088_v5 = vld [vmem:[%s15054_s5 + $0x310] sm:$0xff]  ;;  %15791 = vst [vmem:[#allocation7_spill] sm:$0xff] %v14093_v53  ;;  %v15270_v4 = vand.u32 4294901760, %v14058_v57  ;;  %v15269_v49 = vand.u32 4294901760, %v14063_v11 }
 0x23a   :  { %10219 = vmatprep.subr.bf16.mxu0 %v14038_v55  ;;  %v14053_v19 = vpack.c.bf16 %v15783_v8, %v15781_v59  ;;  %15789 = vst [vmem:[#allocation44_spill] sm:$0xff] %v14083_v21  ;;  %15790 = vst [vmem:[#allocation3_spill] sm:$0xff] %v14088_v5  ;;  %v15792_v25 = vld [vmem:[#allocation24_spill] sm:$0xff]  ;;  %v15794_v3 = vld [vmem:[#allocation26_spill] sm:$0xff]  ;;  %v15271_v48 = vand.u32 4294901760, %v14068_v1  ;;  %v6424_v9 = vsub.f32 %v14024_v41, %v15268_v51 }
 0x23b   :  { %v15793_v31 = vand.u32 4294901760, %v15792_v25  ;;  %v15795_v37 = vand.u32 4294901760, %v15794_v3  ;;  %10261 = vmatpush3.bf16.msra.mxu1 %v10260_v36  ;;  %v15796_v63 = vld [vmem:[#allocation27_spill] sm:$0xff]  ;;  %v15798_v59 = vld [vmem:[#allocation28_spill] sm:$0xff]  ;;  %v15804_v30 = vld [vmem:[#allocation5_spill] sm:$0xff]  ;;  %v15815_v36 = vand.u32 4294901760, %v14078_v40 }
 0x23c   :  { %10295 = vmatprep.subr.bf16.mxu1 %v13897_v35  ;;  %v15797_v42 = vand.u32 4294901760, %v15796_v63  ;;  %v15799_v39 = vand.u32 4294901760, %v15798_v59  ;;  %v15805_v32 = vld [vmem:[#allocation6_spill] sm:$0xff]  ;;  %v14149_v59 = vsub.f32 %v14063_v11, %v15269_v49  ;;  %v6425_v49 = vand.u32 4294901760, %v6424_v9  ;;  %v15858_v2 = vld [vmem:[#allocation16_spill] sm:$0xff] }
 0x23d   :  { %10221 = vmatpush3.bf16.msra.mxu0 %v14045_v23  ;;  %v14100_v56 = vpack.c.bf16 %v15795_v37, %v15793_v31  ;;  %v15800_v31 = vld [vmem:[#allocation29_spill] sm:$0xff]  ;;  %v15802_v37 = vld [vmem:[#allocation35_spill] sm:$0xff]  ;;  %v10262_v44 = vpack.c.bf16 %v15805_v32, %v15804_v30  ;;  %v14177_v25 = vsub.f32 %v14078_v40, %v15815_v36  ;;  %v15819_v9 = vand.u32 4294901760, %v14088_v5 }
 0x23e   :  { %10223 = vmatprep.subr.bf16.mxu0 %v14053_v19  ;;  %v14117_v8 = vpack.c.bf16 %v15799_v39, %v15797_v42  ;;  %v15801_v3 = vand.u32 4294901760, %v15800_v31  ;;  %v15803_v33 = vand.u32 4294901760, %v15802_v37  ;;  %v14132_v63 = vld [vmem:[%s15054_s5 + $0x3a0] sm:$0xff]  ;;  %v14137_v42 = vld [vmem:[%s15054_s5 + $0x3a8] sm:$0xff]  ;;  %6658 = vmatmul.mubr.f32.vlgmr.msra.gmra.mrb[22].mxu1 %v14000_v52  ;;  %v14154_v39 = vsub.f32 %v14068_v1, %v15271_v48  ;;  %v14224_v40 = vld [vmem:[%s15054_s5 + $0x3b8] sm:$0xff] }
 0x23f   :  { %15806 = vst [vmem:[#allocation8_spill] sm:$0xff] %v14132_v63  ;;  %15807 = vst [vmem:[#allocation9_spill] sm:$0xff] %v14137_v42  ;;  %v14159_v31 = vld [vmem:[%s15054_s5 + $0x320] sm:$0xff]  ;;  %10297 = vmatpush3.bf16.msra.mxu1 %v13924_v61  ;;  %v15812_v37 = vand.u32 4294901760, %v13848_v20  ;;  %v15817_v1 = vand.u32 4294901760, %v14083_v21  ;;  %v14229_v36 = vld [vmem:[%s15054_s5 + $0x330] sm:$0xff] }
 0x240   :  { %v14125_v51 = vpack.c.bf16 %v15803_v33, %v15801_v3  ;;  %v14144_v33 = vsub.f32 %v14058_v57, %v15270_v4  ;;  %15809 = vst [vmem:[#allocation23_spill] sm:$0xff] %v14154_v39  ;;  %15810 = vst [vmem:[#allocation24_spill] sm:$0xff] %v14159_v31  ;;  %v14164_v3 = vld [vmem:[%s15054_s5 + $0x328] sm:$0xff]  ;;  %v15813_v4 = vand.u32 4294901760, %v14073_v54  ;;  %10299 = vmatprep.subr.bf16.mxu1 %v13931_v0  ;;  %v15863_v41 = vand.u32 4294901760, %v14224_v40 }
 0x241   :  { %10225 = vmatpush3.bf16.msra.mxu0 %v14100_v56  ;;  %15811 = vst [vmem:[#allocation26_spill] sm:$0xff] %v14164_v3  ;;  %6900 = vmatprep.mubr.f32.mxu1 %v15812_v37  ;;  %15816 = vst [vmem:[#allocation28_spill] sm:$0xff] %v14177_v25  ;;  %v14182_v52 = vsub.f32 %v14083_v21, %v15817_v1  ;;  %v14189_v37 = vsub.f32 %v14088_v5, %v15819_v9  ;;  %v15823_v1 = vld [vmem:[#allocation12_spill] sm:$0xff]  ;;  %v15824_v21 = vld [vmem:[#allocation15_spill] sm:$0xff] }
 0x242   :  { %15808 = vst [vmem:[#allocation10_spill] sm:$0xff] %v14144_v33  ;;  %v14172_v48 = vsub.f32 %v14073_v54, %v15813_v4  ;;  %10227 = vmatprep.subr.bf16.mxu0 %v14117_v8  ;;  %v15821_v4 = vand.u32 4294901760, %v14093_v53  ;;  %v10264_v11 = vpack.c.bf16 %v15824_v21, %v15823_v1  ;;  %v15825_v57 = vld [vmem:[#allocation20_spill] sm:$0xff]  ;;  %v15826_v32 = vld [vmem:[#allocation47_spill] sm:$0xff]  ;;  %v15830_v9 = vld [vmem:[#allocation50_spill] sm:$0xff]  ;;  %v15850_v1 = vand.u32 4294901760, %v14154_v39 }
 0x243   :  { %15818 = vst [vmem:[#allocation29_spill] sm:$0xff] %v14182_v52  ;;  %15820 = vst [vmem:[#allocation35_spill] sm:$0xff] %v14189_v37  ;;  %v10266_v0 = vpack.c.bf16 %v15826_v32, %v15825_v57  ;;  %v15827_v5 = vld [vmem:[#allocation48_spill] sm:$0xff]  ;;  %10301 = vmatpush3.bf16.msra.mxu1 %v13951_v38  ;;  %v15831_v30 = vld [vmem:[#allocation51_spill] sm:$0xff]  ;;  %v15835_v57 = vand.u32 4294901760, %v14132_v63 }
 0x244   :  { %15814 = vst [vmem:[#allocation27_spill] sm:$0xff] %v14172_v48  ;;  %v14194_v54 = vsub.f32 %v14093_v53, %v15821_v4  ;;  %v10268_v4 = vpack.c.bf16 %v15828_v60, %v15827_v5  ;;  %v14213_v21 = vld [vmem:[%s15054_s5 + $0x3b0] sm:$0xff]  ;;  %v10270_v32 = vpack.c.bf16 %v15831_v30, %v15830_v9  ;;  %15832 = vst [vmem:[#allocation54_spill] sm:$0xff] %v14224_v40  ;;  %10303 = vmatprep.subr.bf16.mxu1 %v13965_v17  ;;  %v14252_v38 = vld [vmem:[%s15054_s5 + $0x3c0] sm:$0xff] }
 0x245   :  { %10229 = vmatpush3.bf16.msra.mxu0 %v14125_v51  ;;  %15829 = vst [vmem:[#allocation53_spill] sm:$0xff] %v14213_v21  ;;  %15833 = vst [vmem:[#allocation55_spill] sm:$0xff] %v14229_v36  ;;  %v14242_v30 = vsub.f32 %v14132_v63, %v15835_v57  ;;  %v15837_v9 = vand.u32 4294901760, %v14137_v42  ;;  %v14257_v60 = vld [vmem:[%s15054_s5 + $0x3c8] sm:$0xff]  ;;  %v15841_v53 = vand.u32 4294901760, %v14159_v31  ;;  %v15843_v63 = vand.u32 4294901760, %v14164_v3 }
 0x246   :  { %15822 = vst [vmem:[#allocation52_spill] sm:$0xff] %v14194_v54  ;;  %10263 = vmatprep.subr.bf16.mxu0 %v10262_v44  ;;  %v14234_v44 = vld [vmem:[%s15054_s5 + $0x338] sm:$0xff]  ;;  %15839 = vst [vmem:[#allocation59_spill] sm:$0xff] %v14252_v38  ;;  %v14277_v17 = vld [vmem:[%s15054_s5 + $0x348] sm:$0xff] }
 0x247   :  { %15834 = vst [vmem:[#allocation56_spill] sm:$0xff] %v14234_v44  ;;  %15836 = vst [vmem:[#allocation57_spill] sm:$0xff] %v14242_v30  ;;  %v14247_v5 = vsub.f32 %v14137_v42, %v15837_v9  ;;  %v14262_v57 = vsub.f32 %v14159_v31, %v15841_v53  ;;  %v14267_v9 = vsub.f32 %v14164_v3, %v15843_v63  ;;  %v14272_v42 = vld [vmem:[%s15054_s5 + $0x340] sm:$0xff]  ;;  %v15848_v53 = vand.u32 4294901760, %v14149_v59 }
 0x248   :  { %15840 = vst [vmem:[#allocation60_spill] sm:$0xff] %v14257_v60  ;;  %6426 = vmatmul.mubr.f32.vlgmr.msra.gmra.mrb[20].mxu0 %v6425_v49  ;;  %15845 = vst [vmem:[#allocation63_spill] sm:$0xff] %v14272_v42  ;;  %v15847_v49 = vand.u32 4294901760, %v14144_v33  ;;  %v15851_v63 = vand.u32 4294901760, %v14172_v48  ;;  %10305 = vmatpush3.bf16.msra.mxu1 %v13977_v27  ;;  %v10274_v33 = vpack.c.bf16 %v13804_v24, %v15858_v2  ;;  %v14463_v48 = vld [vmem:[%s15054_s5 + $0x378] sm:$0xff] }
 0x249   :  { %15838 = vst [vmem:[#allocation58_spill] sm:$0xff] %v14247_v5  ;;  %15842 = vst [vmem:[#allocation61_spill] sm:$0xff] %v14262_v57  ;;  %10265 = vmatpush3.bf16.msra.mxu0 %v10264_v11  ;;  %6793 = vmatprep.mubr.f32.mxu0 %v13848_v20  ;;  %v15855_v20 = vand.u32 4294901760, %v14177_v25  ;;  %v15306_v25 = vand.u32 4294901760, %v14242_v30 }
 0x24a   :  { %15844 = vst [vmem:[#allocation62_spill] sm:$0xff] %v14267_v9  ;;  %15846 = vst [vmem:[#allocation64_spill] sm:$0xff] %v14277_v17  ;;  %v14283_v31 = vpack.c.bf16 %v15848_v53, %v15847_v49  ;;  %v14289_v3 = vpack.c.bf16 %v15851_v63, %v15850_v1  ;;  %10267 = vmatprep.subr.bf16.mxu0 %v10266_v0  ;;  %v15853_v49 = vld [vmem:[#allocation22_spill] sm:$0xff]  ;;  %v15854_v53 = vld [vmem:[#allocation21_spill] sm:$0xff]  ;;  %v15856_v63 = vand.u32 4294901760, %v14182_v52  ;;  %10307 = vmatprep.subr.bf16.mxu1 %v13984_v13 }
 0x24b   :  { %v15860_v1 = vand.u32 4294901760, %v14194_v54  ;;  %v15862_v52 = vand.u32 4294901760, %v14213_v21  ;;  %v14330_v54 = vsub.f32 %v14224_v40, %v15863_v41  ;;  %v15867_v41 = vand.u32 4294901760, %v14257_v60  ;;  %v14429_v40 = vld [vmem:[%s15054_s5 + $0x368] sm:$0xff]  ;;  %15884 = vst [vmem:[#allocation77_spill] sm:$0xff] %v14463_v48 }
 0x24c   :  { %15849 = vst [vmem:[#allocation65_spill] sm:$0xff] %v14283_v31  ;;  %15852 = vst [vmem:[#allocation66_spill] sm:$0xff] %v14289_v3  ;;  %v10272_v31 = vpack.c.bf16 %v15854_v53, %v15853_v49  ;;  %v14305_v61 = vpack.c.bf16 %v15856_v63, %v15855_v20  ;;  %v15859_v3 = vand.u32 4294901760, %v14189_v37  ;;  %v15865_v63 = vand.u32 4294901760, %v14234_v44  ;;  %10309 = vmatpush3.bf16.msra.mxu1 %v14007_v22 }
 0x24d   :  { %10269 = vmatpush3.bf16.msra.mxu0 %v10268_v4  ;;  %v14325_v0 = vsub.f32 %v14213_v21, %v15862_v52  ;;  %v15866_v52 = vand.u32 4294901760, %v14252_v38  ;;  %v14351_v20 = vsub.f32 %v14257_v60, %v15867_v41  ;;  %10311 = vmatprep.subr.bf16.mxu1 %v14013_v50  ;;  %v15872_v41 = vand.u32 4294901760, %v14262_v57  ;;  %15880 = vst [vmem:[#allocation73_spill] sm:$0xff] %v14429_v40  ;;  %v14444_v57 = vld [vmem:[%s15054_s5 + $0x3f8] sm:$0xff] }
 0x24e   :  { %15857 = vst [vmem:[#allocation22_spill] sm:$0xff] %v14305_v61  ;;  %v14316_v11 = vpack.c.bf16 %v15860_v1, %v15859_v3  ;;  %v15864_v3 = vand.u32 4294901760, %v14229_v36  ;;  %v14340_v61 = vsub.f32 %v14234_v44, %v15865_v63  ;;  %10271 = vmatprep.subr.bf16.mxu0 %v10270_v32  ;;  %v15870_v32 = vand.u32 4294901760, %v14272_v42  ;;  %15882 = vst [vmem:[#allocation75_spill] sm:$0xff] %v14444_v57 }
 0x24f   :  { %v14346_v4 = vsub.f32 %v14252_v38, %v15866_v52  ;;  %v15871_v52 = vand.u32 4294901760, %v14277_v17  ;;  %v15873_v60 = vand.u32 4294901760, %v14267_v9  ;;  %v15892_v30 = vand.u32 4294901760, %v14351_v20 }
 0x250   :  { %15861 = vst [vmem:[#allocation21_spill] sm:$0xff] %v14316_v11  ;;  %v14335_v1 = vsub.f32 %v14229_v36, %v15864_v3  ;;  %v15868_v3 = vand.u32 4294901760, %v14247_v5  ;;  %v14363_v63 = vsub.f32 %v14272_v42, %v15870_v32  ;;  %v14383_v32 = vld [vmem:[%s15054_s5 + $0x3d0] sm:$0xff]  ;;  %v14403_v42 = vld [vmem:[%s15054_s5 + $0x358] sm:$0xff]  ;;  %v14408_v36 = vld [vmem:[%s15054_s5 + $0x3e0] sm:$0xff]  ;;  %10313 = vmatpush3.bf16.msra.mxu1 %v14031_v43 }
 0x251   :  { %v14368_v38 = vsub.f32 %v14277_v17, %v15871_v52  ;;  %v14374_v44 = vpack.c.bf16 %v15873_v60, %v15872_v41  ;;  %v14388_v52 = vld [vmem:[%s15054_s5 + $0x3d8] sm:$0xff]  ;;  %v14393_v60 = vld [vmem:[%s15054_s5 + $0x350] sm:$0xff]  ;;  %10273 = vmatpush3.bf16.msra.mxu0 %v10272_v31  ;;  %v10280_v41 = vpack.c.bf16 %v13352_v58, %v13347_v14  ;;  %15876 = vst [vmem:[#allocation69_spill] sm:$0xff] %v14403_v42  ;;  %15877 = vst [vmem:[#allocation70_spill] sm:$0xff] %v14408_v36  ;;  %v8597_v31 = vpop.f32.mrb[10].mxu1 }
 0x252   :  { %v14357_v11 = vpack.c.bf16 %v15868_v3, %v15306_v25  ;;  %v10276_v3 = vpack.c.bf16 %v13842_v47, %v13837_v28  ;;  %v10278_v25 = vpack.c.bf16 %v13860_v15, %v13855_v12  ;;  %15875 = vst [vmem:[#allocation68_spill] sm:$0xff] %v14393_v60  ;;  %v14413_v58 = vld [vmem:[%s15054_s5 + $0x3e8] sm:$0xff]  ;;  %10275 = vmatprep.subr.bf16.mxu0 %v10274_v33  ;;  %v14434_v33 = vld [vmem:[%s15054_s5 + $0x3f0] sm:$0xff]  ;;  %v8598_v5 = vpop.f32.mrb[11].mxu1  ;;  %v15888_v9 = vand.u32 4294901760, %v14335_v1 }
 0x253   :  { %15874 = vst [vmem:[#allocation67_spill] sm:$0xff] %v14374_v44  ;;  %15878 = vst [vmem:[#allocation71_spill] sm:$0xff] %v14413_v58  ;;  %v10282_v14 = vpack.c.bf16 %v13884_v34, %v13879_v26  ;;  %v14424_v44 = vld [vmem:[%s15054_s5 + $0x360] sm:$0xff]  ;;  %10315 = vmatprep.subr.bf16.mxu1 %v14038_v55  ;;  %v14450_v39 = vadd.f32 %v8598_v5, %v8597_v31  ;;  %v14458_v34 = vld [vmem:[%s15054_s5 + $0x370] sm:$0xff]  ;;  %v15886_v31 = vand.u32 4294901760, %v14330_v54  ;;  %v15889_v17 = vand.u32 4294901760, %v14340_v61 }
 0x254   :  { %15869 = vst [vmem:[#allocation16_spill] sm:$0xff] %v14357_v11  ;;  %15879 = vst [vmem:[#allocation72_spill] sm:$0xff] %v14424_v44  ;;  %10317 = vmatpush3.bf16.msra.mxu1 %v14045_v23  ;;  %v15891_v37 = vand.u32 4294901760, %v14346_v4 }
 0x255   :  { %15881 = vst [vmem:[#allocation74_spill] sm:$0xff] %v14434_v33  ;;  %10277 = vmatpush3.bf16.msra.mxu0 %v10276_v3  ;;  %15883 = vst [vmem:[#allocation76_spill] sm:$0xff] %v14458_v34  ;;  %v15885_v3 = vand.u32 4294901760, %v14325_v0  ;;  %v14477_v11 = vpack.c.bf16 %v15889_v17, %v15888_v9  ;;  %10319 = vmatprep.subr.bf16.mxu1 %v14053_v19  ;;  %v15896_v17 = vand.u32 4294901760, %v14363_v63  ;;  %v15897_v9 = vand.u32 4294901760, %v14368_v38 }
 0x256   :  { %10279 = vmatprep.subr.bf16.mxu0 %v10278_v25  ;;  %v14483_v26 = vpack.c.bf16 %v15892_v30, %v15891_v37  ;;  %v10284_v25 = vpack.c.bf16 %v13438_v16, %v13433_v7  ;;  %v15899_v30 = vand.u32 4294901760, %v14388_v52  ;;  %v15900_v7 = vand.u32 4294901760, %v14393_v60 }
 0x257   :  { %v14471_v21 = vpack.c.bf16 %v15886_v31, %v15885_v3  ;;  %15890 = vst [vmem:[#allocation79_spill] sm:$0xff] %v14477_v11  ;;  %v10286_v3 = vpack.c.bf16 %v13450_v6, %v13445_v29  ;;  %v15894_v31 = vand.u32 4294901760, %v14383_v32  ;;  %v14499_v11 = vpack.c.bf16 %v15897_v9, %v15896_v17 }
 0x258   :  { %15893 = vst [vmem:[#allocation80_spill] sm:$0xff] %v14483_v26  ;;  %v14504_v37 = vsub.f32 %v14388_v52, %v15899_v30  ;;  %v14509_v16 = vsub.f32 %v14393_v60, %v15900_v7  ;;  %v15903_v9 = vand.u32 4294901760, %v14408_v36  ;;  %v15905_v29 = vand.u32 4294901760, %v14424_v44  ;;  %10321 = vmatpush3.bf16.msra.mxu1 %v14100_v56  ;;  %v15949_v60 = vld [vmem:[#allocation46_spill] sm:$0xff] }
 0x259   :  { %15887 = vst [vmem:[#allocation78_spill] sm:$0xff] %v14471_v21  ;;  %v14493_v5 = vsub.f32 %v14383_v32, %v15894_v31  ;;  %15898 = vst [vmem:[#allocation82_spill] sm:$0xff] %v14499_v11  ;;  %10281 = vmatpush3.bf16.msra.mxu0 %v10280_v41  ;;  %v15901_v31 = vand.u32 4294901760, %v14403_v42  ;;  %v15904_v11 = vand.u32 4294901760, %v14413_v58  ;;  %v15906_v41 = vand.u32 4294901760, %v14429_v40  ;;  %10323 = vmatprep.subr.bf16.mxu1 %v14117_v8 }
 0x25a   :  { %v14521_v30 = vsub.f32 %v14408_v36, %v15903_v9  ;;  %v14531_v6 = vsub.f32 %v14424_v44, %v15905_v29  ;;  %10283 = vmatprep.subr.bf16.mxu0 %v10282_v14  ;;  %v15907_v9 = vand.u32 4294901760, %v14434_v33  ;;  %v8562_v29 = vpop.f32.mrb[8].mxu0  ;;  %v10288_v14 = vpack.c.bf16 %v13478_v62, %v13473_v46  ;;  %v15944_v36 = vld [vmem:[#allocation31_spill] sm:$0xff] }
 0x25b   :  { %15895 = vst [vmem:[#allocation81_spill] sm:$0xff] %v14493_v5  ;;  %v14516_v17 = vsub.f32 %v14403_v42, %v15901_v31  ;;  %v14526_v7 = vsub.f32 %v14413_v58, %v15904_v11  ;;  %v14537_v31 = vsub.f32 %v14429_v40, %v15906_v41  ;;  %v15909_v11 = vand.u32 4294901760, %v14444_v57 }
 0x25c   :  { %v14542_v26 = vsub.f32 %v14434_v33, %v15907_v9  ;;  %v10290_v41 = vpack.c.bf16 %v13490_v10, %v13485_v18  ;;  %v8528_v9 = vld [vmem:[%s15055_s6] ss:$0 sm:$0xff]  ;;  %v8563_v33 = vpop.f32.mrb[9].mxu0  ;;  %v15913_v46 = vand.u32 4294901760, %v14463_v48  ;;  %v15336_v40 = vand.u32 4294901760, %v14521_v30  ;;  %10325 = vmatpush3.bf16.msra.mxu1 %v14125_v51 }
 0x25d   :  { %15902 = vst [vmem:[#allocation83_spill] sm:$0xff] %v14516_v17  ;;  %v14547_v21 = vsub.f32 %v14444_v57, %v15909_v11  ;;  %v15911_v57 = vand.u32 4294901760, %v14458_v34  ;;  %v8564_v18 = vadd.f32 %v8563_v33, %v8562_v29  ;;  %10285 = vmatpush3.bf16.msra.mxu0 %v10284_v25  ;;  %v15335_v62 = vand.u32 4294901760, %v14516_v17  ;;  %10359 = vmatprep.subr.bf16.mxu1 %v13897_v35  ;;  %v15922_v35 = vld [vmem:[#allocation38_spill] sm:$0xff] }
 0x25e   :  { %15908 = vst [vmem:[#allocation84_spill] sm:$0xff] %v14542_v26  ;;  %v14568_v10 = vsub.f32 %v14463_v48, %v15913_v46  ;;  %10287 = vmatprep.subr.bf16.mxu0 %v10286_v3  ;;  %v15337_v11 = vand.u32 4294901760, %v14531_v6  ;;  %v15915_v33 = vand.u32 4294901760, %v14493_v5  ;;  %v15916_v25 = vand.u32 4294901760, %v14504_v37 }
 0x25f   :  { %15910 = vst [vmem:[#allocation85_spill] sm:$0xff] %v14547_v21  ;;  %v14563_v58 = vsub.f32 %v14458_v34, %v15911_v57  ;;  %v4704_v48 = vadd.f32 %v8564_v18, %v8528_v9  ;;  %v15918_v44 = vand.u32 4294901760, %v14509_v16  ;;  %v15920_v34 = vand.u32 4294901760, %v14526_v7  ;;  %v15931_v18 = vld [vmem:[#allocation25_spill] sm:$0xff] }
 0x260   :  { %15914 = vst [vmem:[#allocation87_spill] sm:$0xff] %v14568_v10  ;;  %v14583_v29 = vpack.c.bf16 %v15916_v25, %v15915_v33  ;;  %v10292_v9 = vpack.c.bf16 %v15922_v35, %v13497_v45  ;;  %v15923_v25 = vld [vmem:[#allocation32_spill] sm:$0xff]  ;;  %v15928_v45 = vand.u32 4294901760, %v14547_v21  ;;  %v15930_v33 = vld [vmem:[#allocation18_spill] sm:$0xff] }
 0x261   :  { %15912 = vst [vmem:[#allocation86_spill] sm:$0xff] %v14563_v58  ;;  %v14589_v3 = vpack.c.bf16 %v15335_v62, %v15918_v44  ;;  %v14595_v46 = vpack.c.bf16 %v15920_v34, %v15336_v40  ;;  %v15924_v57 = vand.u32 4294901760, %v15923_v25  ;;  %10289 = vmatpush3.bf16.msra.mxu0 %v10288_v14  ;;  %v14604_v44 = vadd.f32 %v14450_v39, %v4704_v48  ;;  %v15932_v14 = vld [vmem:[#allocation5_spill] sm:$0xff]  ;;  %v15934_v48 = vld [vmem:[#allocation6_spill] sm:$0xff] }
 0x262   :  { %15917 = vst [vmem:[#allocation88_spill] sm:$0xff] %v14583_v29  ;;  %v15925_v62 = vand.u32 4294901760, %v14537_v31  ;;  %v15927_v40 = vand.u32 4294901760, %v14542_v26  ;;  %v15935_v39 = vand.u32 4294901760, %v15934_v48  ;;  %10291 = vmatprep.subr.bf16.mxu0 %v10290_v41  ;;  %v15947_v48 = vld [vmem:[#allocation47_spill] sm:$0xff]  ;;  %v15950_v41 = vld [vmem:[#allocation48_spill] sm:$0xff] }
 0x263   :  { %15919 = vst [vmem:[#allocation89_spill] sm:$0xff] %v14589_v3  ;;  %15921 = vst [vmem:[#allocation90_spill] sm:$0xff] %v14595_v46  ;;  %6904 = vmatmul.mubr.f32.vlgmr.msra.gmra.mrb[24].mxu1 %v15924_v57  ;;  %v15933_v57 = vand.u32 4294901760, %v15932_v14  ;;  %v15936_v3 = vand.u32 4294901760, %v14563_v58  ;;  %v15945_v14 = vld [vmem:[#allocation20_spill] sm:$0xff] }
 0x264   :  { %v14610_v34 = vpack.c.bf16 %v15925_v62, %v15337_v11  ;;  %v14616_v35 = vpack.c.bf16 %v15928_v45, %v15927_v40  ;;  %10361 = vmatpush3.bf16.msra.mxu1 %v15930_v33  ;;  %7174 = vmatprep.mubr.f32.mxu1 %v15931_v18  ;;  %v15937_v62 = vand.u32 4294901760, %v14568_v10  ;;  %v15940_v40 = vld [vmem:[#allocation12_spill] sm:$0xff]  ;;  %v15942_v33 = vld [vmem:[#allocation15_spill] sm:$0xff] }
 0x265   :  { %v10326_v46 = vpack.c.bf16 %v15935_v39, %v15933_v57  ;;  %10293 = vmatpush3.bf16.msra.mxu0 %v10292_v9  ;;  %v15941_v45 = vand.u32 4294901760, %v15940_v40  ;;  %v15946_v57 = vand.u32 4294901760, %v15945_v14  ;;  %v15948_v39 = vand.u32 4294901760, %v15947_v48  ;;  %v15952_v9 = vld [vmem:[#allocation49_spill] sm:$0xff]  ;;  %v15969_v48 = vld [vmem:[#allocation14_spill] sm:$0xff] }
 0x266   :  { %15926 = vst [vmem:[#allocation38_spill] sm:$0xff] %v14610_v34  ;;  %15929 = vst [vmem:[#allocation32_spill] sm:$0xff] %v14616_v35  ;;  %v14628_v11 = vpack.c.bf16 %v15937_v62, %v15936_v3  ;;  %v15939_v34 = vld [vmem:[#allocation19_spill] sm:$0xff]  ;;  %v15943_v35 = vand.u32 4294901760, %v15942_v33  ;;  %v15951_v3 = vand.u32 4294901760, %v15950_v41  ;;  %v15962_v33 = vand.u32 4294901760, %v13837_v28 }
 0x267   :  { %10363 = vmatprep.subr.bf16.mxu1 %v15939_v34  ;;  %10327 = vmatprep.subr.bf16.mxu0 %v10326_v46  ;;  %v10330_v42 = vpack.c.bf16 %v15948_v39, %v15946_v57  ;;  %v15953_v34 = vand.u32 4294901760, %v15952_v9  ;;  %v15956_v62 = vld [vmem:[#allocation51_spill] sm:$0xff]  ;;  %v15968_v28 = vand.u32 4294901760, %v14149_v59  ;;  %v14680_v39 = vand.u32 4294901760, %v15969_v48 }
 0x268   :  { %15938 = vst [vmem:[#allocation18_spill] sm:$0xff] %v14628_v11  ;;  %v10328_v29 = vpack.c.bf16 %v15943_v35, %v15941_v45  ;;  %10365 = vmatpush3.bf16.msra.mxu1 %v15944_v36  ;;  %6796 = vmatmul.mubr.f32.vlgmr.msra.gmra.mrb[22].mxu0 %v15923_v25  ;;  %v15954_v36 = vld [vmem:[#allocation50_spill] sm:$0xff]  ;;  %v15957_v40 = vand.u32 4294901760, %v15956_v62  ;;  %v15960_v25 = vand.u32 4294901760, %v15858_v2  ;;  %v8667_v2 = vpop.f32.mrb[12].mxu1 }
 0x269   :  { %10367 = vmatprep.subr.bf16.mxu1 %v15949_v60  ;;  %7070 = vmatprep.mubr.f32.mxu0 %v15931_v18  ;;  %v10332_v35 = vpack.c.bf16 %v15953_v34, %v15951_v3  ;;  %v15955_v46 = vand.u32 4294901760, %v15954_v36  ;;  %v15958_v60 = vand.u32 4294901760, %v15853_v49  ;;  %v15964_v49 = vand.u32 4294901760, %v13855_v12  ;;  %15970 = vst [vmem:[#allocation25_spill] sm:$0xff] %v14680_v39  ;;  %v15975_v34 = vld [vmem:[#allocation23_spill] sm:$0xff] }
 0x26a   :  { %10329 = vmatpush3.bf16.msra.mxu0 %v10328_v29  ;;  %v15959_v29 = vand.u32 4294901760, %v15854_v53 }
 0x26b   :  { %10331 = vmatprep.subr.bf16.mxu0 %v10330_v42  ;;  %v10334_v45 = vpack.c.bf16 %v15957_v40, %v15955_v46  ;;  %v15977_v46 = vld [vmem:[#allocation27_spill] sm:$0xff] }
 0x26c   :  { %10369 = vmatpush3.bf16.msra.mxu1 %v13977_v27  ;;  %v10336_v18 = vpack.c.bf16 %v15959_v29, %v15958_v60  ;;  %v15961_v27 = vand.u32 4294901760, %v13804_v24  ;;  %v15966_v24 = vld [vmem:[#allocation10_spill] sm:$0xff]  ;;  %v15978_v62 = vand.u32 4294901760, %v15977_v46  ;;  %v15979_v29 = vld [vmem:[#allocation28_spill] sm:$0xff] }
 0x26d   :  { %10371 = vmatprep.subr.bf16.mxu1 %v13984_v13  ;;  %v15963_v13 = vand.u32 4294901760, %v13842_v47  ;;  %v15967_v57 = vand.u32 4294901760, %v15966_v24  ;;  %v7416_v47 = vsub.f32 %v14149_v59, %v15968_v28  ;;  %v15988_v28 = vld [vmem:[#allocation57_spill] sm:$0xff] }
 0x26e   :  { %10333 = vmatpush3.bf16.msra.mxu0 %v10332_v35  ;;  %v10338_v42 = vpack.c.bf16 %v15961_v27, %v15960_v25  ;;  %v15976_v35 = vand.u32 4294901760, %v15975_v34  ;;  %v7304_v40 = vsub.f32 %v15977_v46, %v15978_v62  ;;  %v15981_v25 = vld [vmem:[#allocation29_spill] sm:$0xff] }
 0x26f   :  { %10335 = vmatprep.subr.bf16.mxu0 %v10334_v45  ;;  %v10340_v14 = vpack.c.bf16 %v15963_v13, %v15962_v33  ;;  %v7417_v60 = vand.u32 4294901760, %v7416_v47  ;;  %v15982_v27 = vand.u32 4294901760, %v15981_v25  ;;  %v14702_v33 = vsub.f32 %v15969_v48, %v14680_v39  ;;  %v15983_v13 = vld [vmem:[#allocation35_spill] sm:$0xff] }
 0x270   :  { %10373 = vmatpush3.bf16.msra.mxu1 %v14007_v22  ;;  %v15965_v22 = vand.u32 4294901760, %v13860_v15  ;;  %v15971_v15 = vld [vmem:[#allocation4_spill] sm:$0xff]  ;;  %v7297_v36 = vsub.f32 %v15975_v34, %v15976_v35  ;;  %v15989_v47 = vand.u32 4294901760, %v15988_v28 }
 0x271   :  { %10375 = vmatprep.subr.bf16.mxu1 %v14013_v50  ;;  %v7409_v50 = vsub.f32 %v15966_v24, %v15967_v57  ;;  %v15972_v12 = vand.u32 4294901760, %v15971_v15 }
 0x272   :  { %10337 = vmatpush3.bf16.msra.mxu0 %v10336_v18  ;;  %v10342_v53 = vpack.c.bf16 %v15965_v22, %v15964_v49  ;;  %v15985_v22 = vld [vmem:[#allocation37_spill] sm:$0xff]  ;;  %v7298_v57 = vand.u32 4294901760, %v7297_v36  ;;  %v7437_v48 = vsub.f32 %v15988_v28, %v15989_v47  ;;  %v15992_v36 = vld [vmem:[#allocation39_spill] sm:$0xff]  ;;  %v15995_v47 = vld [vmem:[#allocation62_spill] sm:$0xff] }
 0x273   :  { %10339 = vmatprep.subr.bf16.mxu0 %v10338_v42  ;;  %v7410_v45 = vand.u32 4294901760, %v7409_v50  ;;  %v7430_v42 = vsub.f32 %v15981_v25, %v15982_v27  ;;  %v7305_v50 = vand.u32 4294901760, %v7304_v40 }
 0x274   :  { %10377 = vmatpush3.bf16.msra.mxu1 %v14031_v43  ;;  %v8668_v43 = vpop.f32.mrb[13].mxu1 }
 0x275   :  { %10379 = vmatprep.subr.bf16.mxu1 %v14038_v55  ;;  %v8669_v41 = vadd.f32 %v8668_v43, %v8667_v2  ;;  %v15973_v55 = vld [vmem:[#allocation17_spill] sm:$0xff]  ;;  %v15990_v43 = vld [vmem:[#allocation58_spill] sm:$0xff]  ;;  %v7431_v62 = vand.u32 4294901760, %v7430_v42 }
 0x276   :  { %10341 = vmatpush3.bf16.msra.mxu0 %v10340_v14  ;;  %v15974_v3 = vand.u32 4294901760, %v15973_v55  ;;  %v15984_v14 = vand.u32 4294901760, %v15983_v13  ;;  %v15991_v15 = vand.u32 4294901760, %v15990_v43  ;;  %v8632_v55 = vpop.f32.mrb[10].mxu0 }
 0x277   :  { %10343 = vmatprep.subr.bf16.mxu0 %v10342_v53 }
 0x278   :  { %10381 = vmatpush3.bf16.msra.mxu1 %v14045_v23  ;;  %v10346_v9 = vpack.c.bf16 %v15974_v3, %v15972_v12  ;;  %v15980_v23 = vand.u32 4294901760, %v15979_v29  ;;  %v7311_v49 = vsub.f32 %v15983_v13, %v15984_v14  ;;  %v7444_v12 = vsub.f32 %v15990_v43, %v15991_v15  ;;  %v15993_v14 = vld [vmem:[#allocation61_spill] sm:$0xff] }
 0x279   :  { %10383 = vmatprep.subr.bf16.mxu1 %v14053_v19  ;;  %v15986_v19 = vld [vmem:[#allocation52_spill] sm:$0xff]  ;;  %v10422_v3 = vpack.c.bf16 %v7417_v60, %v7410_v45  ;;  %v15996_v15 = vand.u32 4294901760, %v15995_v47  ;;  %v10424_v45 = vpack.c.bf16 %v7305_v50, %v7298_v57  ;;  %v7438_v60 = vand.u32 4294901760, %v7437_v48  ;;  %v16005_v50 = vld [vmem:[#allocation33_spill] sm:$0xff]  ;;  %v16006_v48 = vld [vmem:[#allocation43_spill] sm:$0xff] }
 0x27a   :  { %v7423_v18 = vsub.f32 %v15979_v29, %v15980_v23  ;;  %10345 = vmatpush3.bf16.msra.mxu0 %v15985_v22  ;;  %v15987_v53 = vand.u32 4294901760, %v15986_v19  ;;  %v8633_v23 = vpop.f32.mrb[11].mxu0  ;;  %v7312_v27 = vand.u32 4294901760, %v7311_v49  ;;  %v15994_v22 = vand.u32 4294901760, %v15993_v14 }
 0x27b   :  { %10347 = vmatprep.subr.bf16.mxu0 %v10346_v9  ;;  %v8634_v9 = vadd.f32 %v8633_v23, %v8632_v55  ;;  %v7332_v11 = vsub.f32 %v15995_v47, %v15996_v15  ;;  %v15999_v23 = vand.u32 4294901760, %v14330_v54  ;;  %v16004_v57 = vand.u32 4294901760, %v14702_v33 }
 0x27c   :  { %v7318_v2 = vsub.f32 %v15986_v19, %v15987_v53  ;;  %10385 = vmatpush3.bf16.msra.mxu1 %v14100_v56  ;;  %v7424_v35 = vand.u32 4294901760, %v7423_v18  ;;  %v7325_v53 = vsub.f32 %v15993_v14, %v15994_v22  ;;  %v7445_v18 = vand.u32 4294901760, %v7444_v12  ;;  %v16000_v22 = vld [vmem:[#allocation34_spill] sm:$0xff] }
 0x27d   :  { %10387 = vmatprep.subr.bf16.mxu1 %v14117_v8  ;;  %v15997_v8 = vld [vmem:[#allocation42_spill] sm:$0xff]  ;;  %v5074_v42 = vadd.f32 %v8634_v9, %v14604_v44  ;;  %v16001_v15 = vand.u32 4294901760, %v16000_v22  ;;  %v7280_v44 = vsub.f32 %v14702_v33, %v16004_v57 }
 0x27e   :  { %10349 = vmatpush3.bf16.msra.mxu0 %v15992_v36  ;;  %v7319_v40 = vand.u32 4294901760, %v7318_v2  ;;  %v10426_v49 = vpack.c.bf16 %v7431_v62, %v7424_v35  ;;  %v15998_v2 = vand.u32 4294901760, %v14325_v0  ;;  %v7458_v36 = vsub.f32 %v14330_v54, %v15999_v23 }
 0x27f   :  { %10351 = vmatprep.subr.bf16.mxu0 %v15997_v8  ;;  %v7333_v35 = vand.u32 4294901760, %v7332_v11  ;;  %v14747_v62 = vadd.f32 %v8669_v41, %v5074_v42  ;;  %v10430_v9 = vpack.c.bf16 %v7445_v18, %v7438_v60  ;;  %v16008_v23 = vand.u32 4294901760, %v14340_v61  ;;  %v16012_v60 = vld [vmem:[#allocation36_spill] sm:$0xff] }
 0x280   :  { %10389 = vmatpush3.bf16.msra.mxu1 %v14125_v51  ;;  %v7451_v55 = vsub.f32 %v14325_v0, %v15998_v2  ;;  %v16002_v51 = vld [vmem:[#allocation30_spill] sm:$0xff]  ;;  %v10428_v12 = vpack.c.bf16 %v7319_v40, %v7312_v27  ;;  %v7459_v40 = vand.u32 4294901760, %v7458_v36  ;;  %v16010_v11 = vand.u32 4294901760, %v14346_v4  ;;  %v16014_v42 = vld [vmem:[#allocation40_spill] sm:$0xff] }
 0x281   :  { %10423 = vmatprep.subr.bf16.mxu1 %v10422_v3  ;;  %v16003_v56 = vand.u32 4294901760, %v16002_v51  ;;  %v7326_v3 = vand.u32 4294901760, %v7325_v53  ;;  %v7346_v22 = vsub.f32 %v14340_v61, %v16008_v23  ;;  %v16011_v53 = vand.u32 4294901760, %v14351_v20  ;;  %v16019_v36 = vld [vmem:[#allocation44_spill] sm:$0xff] }
 0x282   :  { %10353 = vmatpush3.bf16.msra.mxu0 %v16006_v48  ;;  %v7452_v27 = vand.u32 4294901760, %v7451_v55  ;;  %v7465_v41 = vsub.f32 %v14346_v4, %v16010_v11  ;;  %v16013_v18 = vand.u32 4294901760, %v16012_v60  ;;  %v16015_v51 = vand.u32 4294901760, %v16014_v42  ;;  %v16016_v48 = vld [vmem:[#allocation11_spill] sm:$0xff] }
 0x283   :  { %v14740_v8 = vpack.c.bf16 %v16003_v56, %v16001_v15  ;;  %7176 = vmatmul.mubr.f32.vlgmr.msra.gmra.mrb[26].mxu1 %v16005_v50  ;;  %v16007_v56 = vand.u32 4294901760, %v14335_v1  ;;  %v16009_v15 = vld [vmem:[#allocation45_spill] sm:$0xff]  ;;  %v16020_v23 = vand.u32 4294901760, %v16019_v36  ;;  %v16021_v11 = vand.u32 4294901760, %v14363_v63 }
 0x284   :  { %10425 = vmatpush3.bf16.msra.mxu1 %v10424_v45  ;;  %7518 = vmatprep.mubr.f32.mxu1 %v14680_v39  ;;  %v7472_v45 = vsub.f32 %v14351_v20, %v16011_v53  ;;  %v14767_v57 = vpack.c.bf16 %v16015_v51, %v16013_v18  ;;  %v16022_v53 = vand.u32 4294901760, %v14368_v38  ;;  %v7347_v42 = vand.u32 4294901760, %v7346_v22 }
 0x285   :  { %v7339_v2 = vsub.f32 %v14335_v1, %v16007_v56  ;;  %10355 = vmatprep.subr.bf16.mxu0 %v16009_v15  ;;  %10427 = vmatprep.subr.bf16.mxu1 %v10426_v49  ;;  %v10432_v56 = vpack.c.bf16 %v7333_v35, %v7326_v3  ;;  %v16017_v49 = vld [vmem:[#allocation41_spill] sm:$0xff]  ;;  %v7353_v39 = vsub.f32 %v14363_v63, %v16021_v11  ;;  %v16023_v3 = vand.u32 4294901760, %v14493_v5 }
 0x286   :  { %10357 = vmatpush3.bf16.msra.mxu0 %v16016_v48  ;;  %v16018_v55 = vand.u32 4294901760, %v16017_v49  ;;  %v7360_v60 = vsub.f32 %v14368_v38, %v16022_v53  ;;  %v16024_v51 = vand.u32 4294901760, %v14504_v37  ;;  %v7281_v49 = vand.u32 4294901760, %v7280_v44  ;;  %v16027_v53 = vld [vmem:[#allocation7_spill] sm:$0xff] }
 0x287   :  { %10391 = vmatprep.subr.bf16.mxu0 %v14740_v8  ;;  %v7340_v18 = vand.u32 4294901760, %v7339_v2  ;;  %v7479_v35 = vsub.f32 %v14493_v5, %v16023_v3  ;;  %v7466_v36 = vand.u32 4294901760, %v7465_v41  ;;  %v16028_v2 = vand.u32 4294901760, %v16027_v53 }
 0x288   :  { %v14774_v15 = vpack.c.bf16 %v16020_v23, %v16018_v55  ;;  %10429 = vmatpush3.bf16.msra.mxu1 %v10428_v12  ;;  %v7486_v48 = vsub.f32 %v14504_v37, %v16024_v51  ;;  %v10434_v55 = vpack.c.bf16 %v7459_v40, %v7452_v27  ;;  %v7473_v23 = vand.u32 4294901760, %v7472_v45  ;;  %v16025_v12 = vld [vmem:[#allocation3_spill] sm:$0xff]  ;;  %v16031_v40 = vld [vmem:[#allocation8_spill] sm:$0xff]  ;;  %v16033_v45 = vld [vmem:[#allocation9_spill] sm:$0xff] }
 0x289   :  { %10431 = vmatprep.subr.bf16.mxu1 %v10430_v9  ;;  %7072 = vmatmul.mubr.f32.vlgmr.msra.gmra.mrb[24].mxu0 %v16005_v50  ;;  %v16026_v11 = vand.u32 4294901760, %v16025_v12  ;;  %v7354_v3 = vand.u32 4294901760, %v7353_v39  ;;  %v7361_v5 = vand.u32 4294901760, %v7360_v60  ;;  %v16029_v51 = vand.u32 4294901760, %v14509_v16 }
 0x28a   :  { %10393 = vmatpush3.bf16.msra.mxu0 %v14767_v57  ;;  %7282 = vmatprep.mubr.f32.mxu0 %v7281_v49  ;;  %v16030_v9 = vand.u32 4294901760, %v14516_v17  ;;  %v10436_v50 = vpack.c.bf16 %v7347_v42, %v7340_v18  ;;  %v16032_v41 = vand.u32 4294901760, %v16031_v40  ;;  %v16034_v12 = vand.u32 4294901760, %v16033_v45  ;;  %v16039_v42 = vld [vmem:[#allocation26_spill] sm:$0xff] }
 0x28b   :  { %v14794_v22 = vpack.c.bf16 %v16028_v2, %v16026_v11  ;;  %v7367_v44 = vsub.f32 %v14509_v16, %v16029_v51  ;;  %10395 = vmatprep.subr.bf16.mxu0 %v14774_v15  ;;  %v7480_v39 = vand.u32 4294901760, %v7479_v35  ;;  %v7487_v60 = vand.u32 4294901760, %v7486_v48  ;;  %v16041_v48 = vld [vmem:[#allocation53_spill] sm:$0xff] }
 0x28c   :  { %v7374_v27 = vsub.f32 %v14516_v17, %v16030_v9  ;;  %10433 = vmatpush3.bf16.msra.mxu1 %v10432_v56  ;;  %v14808_v11 = vpack.c.bf16 %v16034_v12, %v16032_v41  ;;  %v10438_v49 = vpack.c.bf16 %v7473_v23, %v7466_v36  ;;  %v16035_v53 = vand.u32 4294901760, %v14521_v30  ;;  %v16037_v9 = vld [vmem:[#allocation24_spill] sm:$0xff]  ;;  %v16043_v36 = vld [vmem:[#allocation54_spill] sm:$0xff] }
 0x28d   :  { %10435 = vmatprep.subr.bf16.mxu1 %v10434_v55  ;;  %v16036_v51 = vand.u32 4294901760, %v14526_v7  ;;  %v16038_v18 = vand.u32 4294901760, %v16037_v9  ;;  %v16040_v40 = vand.u32 4294901760, %v16039_v42  ;;  %v10440_v35 = vpack.c.bf16 %v7361_v5, %v7354_v3 }
 0x28e   :  { %v7493_v2 = vsub.f32 %v14521_v30, %v16035_v53  ;;  %10397 = vmatpush3.bf16.msra.mxu0 %v14794_v22  ;;  %v16042_v55 = vand.u32 4294901760, %v16041_v48  ;;  %v16044_v23 = vand.u32 4294901760, %v16043_v36  ;;  %v7368_v45 = vand.u32 4294901760, %v7367_v44  ;;  %v16051_v48 = vld [vmem:[#allocation56_spill] sm:$0xff] }
 0x28f   :  { %v7500_v56 = vsub.f32 %v14526_v7, %v16036_v51  ;;  %v14820_v17 = vpack.c.bf16 %v16040_v40, %v16038_v18  ;;  %v7375_v12 = vand.u32 4294901760, %v7374_v27  ;;  %10399 = vmatprep.subr.bf16.mxu0 %v14808_v11  ;;  %v10442_v53 = vpack.c.bf16 %v7487_v60, %v7480_v39  ;;  %v16049_v39 = vld [vmem:[#allocation55_spill] sm:$0xff] }
 0x290   :  { %v14827_v41 = vpack.c.bf16 %v16044_v23, %v16042_v55  ;;  %10437 = vmatpush3.bf16.msra.mxu1 %v10436_v50  ;;  %v16045_v51 = vand.u32 4294901760, %v14531_v6  ;;  %v16046_v18 = vand.u32 4294901760, %v14537_v31  ;;  %v7494_v3 = vand.u32 4294901760, %v7493_v2 }
 0x291   :  { %10439 = vmatprep.subr.bf16.mxu1 %v10438_v49  ;;  %v7501_v42 = vand.u32 4294901760, %v7500_v56  ;;  %v16047_v40 = vand.u32 4294901760, %v14542_v26  ;;  %v16048_v27 = vand.u32 4294901760, %v14547_v21  ;;  %v16050_v60 = vand.u32 4294901760, %v16049_v39  ;;  %v16053_v49 = vld [vmem:[#allocation59_spill] sm:$0xff]  ;;  %v16055_v56 = vld [vmem:[#allocation60_spill] sm:$0xff] }
 0x292   :  { %v7381_v9 = vsub.f32 %v14531_v6, %v16045_v51  ;;  %v7388_v5 = vsub.f32 %v14537_v31, %v16046_v18  ;;  %10401 = vmatpush3.bf16.msra.mxu0 %v14820_v17  ;;  %v16052_v55 = vand.u32 4294901760, %v16051_v48  ;;  %v10444_v23 = vpack.c.bf16 %v7375_v12, %v7368_v45 }
 0x293   :  { %v7507_v44 = vsub.f32 %v14542_v26, %v16047_v40  ;;  %v7514_v50 = vsub.f32 %v14547_v21, %v16048_v27  ;;  %v16054_v2 = vand.u32 4294901760, %v16053_v49  ;;  %v16056_v51 = vand.u32 4294901760, %v16055_v56  ;;  %10403 = vmatprep.subr.bf16.mxu0 %v14827_v41  ;;  %v8737_v49 = vpop.f32.mrb[14].mxu1 }
 0x294   :  { %v14847_v36 = vpack.c.bf16 %v16052_v55, %v16050_v60  ;;  %10441 = vmatpush3.bf16.msra.mxu1 %v10440_v35  ;;  %v7382_v40 = vand.u32 4294901760, %v7381_v9  ;;  %v7389_v27 = vand.u32 4294901760, %v7388_v5  ;;  %v16057_v21 = vand.u32 4294901760, %v14563_v58  ;;  %v8738_v35 = vpop.f32.mrb[15].mxu1  ;;  %v16060_v9 = vld [vmem:[#allocation63_spill] sm:$0xff] }
 0x295   :  { %v14853_v18 = vpack.c.bf16 %v16056_v51, %v16054_v2  ;;  %v16058_v48 = vand.u32 4294901760, %v14568_v10  ;;  %10443 = vmatprep.subr.bf16.mxu1 %v10442_v53  ;;  %v10446_v45 = vpack.c.bf16 %v7501_v42, %v7494_v3  ;;  %v7508_v12 = vand.u32 4294901760, %v7507_v44  ;;  %v16059_v2 = vld [vmem:[#allocation13_spill] sm:$0xff]  ;;  %v16062_v51 = vld [vmem:[#allocation64_spill] sm:$0xff] }
 0x296   :  { %v7395_v39 = vsub.f32 %v14563_v58, %v16057_v21  ;;  %v7515_v55 = vand.u32 4294901760, %v7514_v50  ;;  %v14863_v56 = vand.u32 4294901760, %v16059_v2  ;;  %10405 = vmatpush3.bf16.msra.mxu0 %v14847_v36  ;;  %v16061_v5 = vand.u32 4294901760, %v16060_v9  ;;  %v16066_v9 = vld [vmem:[#allocation68_spill] sm:$0xff] }
 0x297   :  { %v7402_v60 = vsub.f32 %v14568_v10, %v16058_v48  ;;  %v16063_v26 = vand.u32 4294901760, %v16062_v51  ;;  %v16064_v58 = vand.u32 4294901760, %v14383_v32  ;;  %v16065_v53 = vand.u32 4294901760, %v14388_v52  ;;  %10407 = vmatprep.subr.bf16.mxu0 %v14853_v18 }
 0x298   :  { %v8739_v42 = vadd.f32 %v8738_v35, %v8737_v49  ;;  %10445 = vmatpush3.bf16.msra.mxu1 %v10444_v23  ;;  %v10448_v44 = vpack.c.bf16 %v7389_v27, %v7382_v40  ;;  %v7396_v50 = vand.u32 4294901760, %v7395_v39  ;;  %v10450_v10 = vpack.c.bf16 %v7515_v55, %v7508_v12  ;;  %v16070_v23 = vld [vmem:[#allocation70_spill] sm:$0xff]  ;;  %v16072_v27 = vld [vmem:[#allocation71_spill] sm:$0xff]  ;;  %v16074_v49 = vld [vmem:[#allocation72_spill] sm:$0xff] }
 0x299   :  { %v14870_v21 = vpack.c.bf16 %v16063_v26, %v16061_v5  ;;  %v14876_v3 = vpack.c.bf16 %v16065_v53, %v16064_v58  ;;  %v7403_v48 = vand.u32 4294901760, %v7402_v60  ;;  %10447 = vmatprep.subr.bf16.mxu1 %v10446_v45  ;;  %v16067_v26 = vand.u32 4294901760, %v16066_v9  ;;  %v16068_v5 = vld [vmem:[#allocation69_spill] sm:$0xff]  ;;  %v8702_v45 = vpop.f32.mrb[12].mxu0 }
 0x29a   :  { %v16069_v51 = vand.u32 4294901760, %v16068_v5  ;;  %v14888_v52 = vsub.f32 %v16059_v2, %v14863_v56  ;;  %v16071_v40 = vand.u32 4294901760, %v16070_v23  ;;  %v16073_v39 = vand.u32 4294901760, %v16072_v27  ;;  %v8703_v12 = vpop.f32.mrb[13].mxu0  ;;  %v16076_v2 = vld [vmem:[#allocation73_spill] sm:$0xff]  ;;  %v16082_v23 = vld [vmem:[#allocation76_spill] sm:$0xff] }
 0x29b   :  { %10409 = vmatpush3.bf16.msra.mxu0 %v14870_v21  ;;  %v10452_v58 = vpack.c.bf16 %v7403_v48, %v7396_v50  ;;  %v8704_v55 = vadd.f32 %v8703_v12, %v8702_v45  ;;  %v16075_v35 = vand.u32 4294901760, %v16074_v49  ;;  %v16077_v53 = vand.u32 4294901760, %v16076_v2  ;;  %v16084_v27 = vld [vmem:[#allocation77_spill] sm:$0xff] }
 0x29c   :  { %v14884_v32 = vpack.c.bf16 %v16069_v51, %v16067_v26  ;;  %10449 = vmatpush3.bf16.msra.mxu1 %v10448_v44  ;;  %10411 = vmatprep.subr.bf16.mxu0 %v14876_v3  ;;  %v14895_v60 = vpack.c.bf16 %v16073_v39, %v16071_v40  ;;  %v7285_v50 = vand.u32 4294901760, %v14888_v52  ;;  %v16080_v26 = vld [vmem:[#allocation75_spill] sm:$0xff]  ;;  %v16083_v40 = vand.u32 4294901760, %v16082_v23 }
 0x29d   :  { %10451 = vmatprep.subr.bf16.mxu1 %v10450_v10  ;;  %v14902_v44 = vpack.c.bf16 %v16077_v53, %v16075_v35  ;;  %v5350_v48 = vadd.f32 %v8704_v55, %v14747_v62  ;;  %v16078_v10 = vld [vmem:[#allocation74_spill] sm:$0xff]  ;;  %v16081_v5 = vand.u32 4294901760, %v16080_v26  ;;  %v16086_v12 = vand.u32 4294901760, %v14702_v33 }
 0x29e   :  { %v16079_v9 = vand.u32 4294901760, %v16078_v10  ;;  %v7286_v62 = vsub.f32 %v14888_v52, %v7285_v50  ;;  %v10454_v55 = vpack.c.bf16 %v14149_v59, %v15966_v24  ;;  %v10458_v35 = vpack.c.bf16 %v15981_v25, %v15979_v29 }
 0x29f   :  { %10413 = vmatpush3.bf16.msra.mxu0 %v14884_v32  ;;  %v5454_v45 = vadd.f32 %v8739_v42, %v5350_v48  ;;  %v10456_v42 = vpack.c.bf16 %v15977_v46, %v15975_v34  ;;  %v10460_v59 = vpack.c.bf16 %v15986_v19, %v15983_v13  ;;  %v10462_v24 = vpack.c.bf16 %v15990_v43, %v15988_v28  ;;  %v16087_v19 = vld [vmem:[#allocation81_spill] sm:$0xff]  ;;  %v16100_v48 = vld [vmem:[#allocation78_spill] sm:$0xff] }
 0x2a0   :  { %10453 = vmatpush3.bf16.msra.mxu1 %v10452_v58  ;;  %10415 = vmatprep.subr.bf16.mxu0 %v14895_v60  ;;  %v14912_v51 = vpack.c.bf16 %v16081_v5, %v16079_v9  ;;  %v16085_v58 = vand.u32 4294901760, %v16084_v27  ;;  %v7287_v49 = vand.u32 4294901760, %v7286_v62  ;;  %v10464_v34 = vpack.c.bf16 %v15995_v47, %v15993_v14  ;;  %v16090_v14 = vld [vmem:[#allocation85_spill] sm:$0xff]  ;;  %v16101_v5 = vld [vmem:[#allocation79_spill] sm:$0xff]  ;;  %v16102_v27 = vld [vmem:[#allocation80_spill] sm:$0xff] }
 0x2a1   :  { %10487 = vmatprep.subr.bf16.mxu1 %v14740_v8  ;;  %v10466_v46 = vpack.c.bf16 %v14330_v54, %v14325_v0  ;;  %v10468_v29 = vpack.c.bf16 %v14340_v61, %v14335_v1  ;;  %v10470_v25 = vpack.c.bf16 %v14351_v20, %v14346_v4  ;;  %v10472_v54 = vpack.c.bf16 %v14368_v38, %v14363_v63  ;;  %v16088_v20 = vld [vmem:[#allocation83_spill] sm:$0xff] }
 0x2a2   :  { %v14920_v39 = vpack.c.bf16 %v16085_v58, %v16083_v40  ;;  %v10474_v61 = vpack.c.bf16 %v14504_v37, %v16087_v19  ;;  %v10476_v1 = vpack.c.bf16 %v16088_v20, %v14509_v16  ;;  %v10478_v4 = vpack.c.bf16 %v14526_v7, %v14521_v30  ;;  %v16089_v16 = vld [vmem:[#allocation84_spill] sm:$0xff]  ;;  %v16091_v30 = vld [vmem:[#allocation86_spill] sm:$0xff]  ;;  %v16092_v7 = vld [vmem:[#allocation87_spill] sm:$0xff] }
 0x2a3   :  { %7520 = vmatmul.mubr.f32.vlgmr.msra.gmra.mrb[28].mxu1 %v14863_v56  ;;  %10417 = vmatpush3.bf16.msra.mxu0 %v14902_v44  ;;  %v10480_v37 = vpack.c.bf16 %v14537_v31, %v14531_v6  ;;  %v10482_v47 = vpack.c.bf16 %v16090_v14, %v16089_v16  ;;  %v10484_v2 = vpack.c.bf16 %v16092_v7, %v16091_v30  ;;  %v16093_v6 = vld [vmem:[#allocation25_spill] sm:$0xff]  ;;  %v16109_v19 = vmov 0.0  }
 0x2a4   :  { %10489 = vmatpush3.bf16.msra.mxu1 %v14767_v57  ;;  %7762 = vmatprep.mubr.f32.mxu1 %v16086_v12  ;;  %v16094_v31 = vld [vmem:[#allocation65_spill] sm:$0xff]  ;;  %v16104_v12 = vld [vmem:[#allocation88_spill] sm:$0xff] }
 0x2a5   :  { %10419 = vmatprep.subr.bf16.mxu0 %v14912_v51  ;;  %10491 = vmatprep.subr.bf16.mxu1 %v14774_v15 }
 0x2a7   :  { %10421 = vmatpush3.bf16.msra.mxu0 %v14920_v39 }
 0x2a8   :  { %10493 = vmatpush3.bf16.msra.mxu1 %v14794_v22  ;;  %10455 = vmatprep.subr.bf16.mxu0 %v10454_v55 }
 0x2a9   :  { %10495 = vmatprep.subr.bf16.mxu1 %v14808_v11 }
 0x2aa   :  { %7288 = vmatmul.mubr.f32.vlgmr.msra.gmra.mrb[26].mxu0 %v7287_v49 }
 0x2ab   :  { %10457 = vmatpush3.bf16.msra.mxu0 %v10456_v42  ;;  %7655 = vmatprep.mubr.f32.mxu0 %v14702_v33 }
 0x2ac   :  { %10497 = vmatpush3.bf16.msra.mxu1 %v14820_v17  ;;  %10459 = vmatprep.subr.bf16.mxu0 %v10458_v35  ;;  %v16105_v35 = vld [vmem:[#allocation89_spill] sm:$0xff] }
 0x2ad   :  { %10499 = vmatprep.subr.bf16.mxu1 %v14827_v41 }
 0x2af   :  { %10461 = vmatpush3.bf16.msra.mxu0 %v10460_v59  ;;  %v8807_v33 = vpop.f32.mrb[16].mxu1 }
 0x2b0   :  { %10501 = vmatpush3.bf16.msra.mxu1 %v14847_v36  ;;  %10463 = vmatprep.subr.bf16.mxu0 %v10462_v24  ;;  %v8808_v13 = vpop.f32.mrb[17].mxu1 }
 0x2b1   :  { %10503 = vmatprep.subr.bf16.mxu1 %v14853_v18  ;;  %v8809_v0 = vadd.f32 %v8808_v13, %v8807_v33 }
 0x2b3   :  { %10465 = vmatpush3.bf16.msra.mxu0 %v10464_v34  ;;  %v16106_v34 = vld [vmem:[#allocation90_spill] sm:$0xff] }
 0x2b4   :  { %10505 = vmatpush3.bf16.msra.mxu1 %v14870_v21  ;;  %10467 = vmatprep.subr.bf16.mxu0 %v10466_v46 }
 0x2b5   :  { %10507 = vmatprep.subr.bf16.mxu1 %v14876_v3 }
 0x2b7   :  { %10469 = vmatpush3.bf16.msra.mxu0 %v10468_v29  ;;  %v10695_v29 = vmov 0.0|0.0  }
 0x2b8   :  { %10509 = vmatpush3.bf16.msra.mxu1 %v14884_v32  ;;  %10471 = vmatprep.subr.bf16.mxu0 %v10470_v25  ;;  %v8772_v38 = vpop.f32.mrb[14].mxu0  ;;  %v16107_v25 = vld [vmem:[#allocation38_spill] sm:$0xff] }
 0x2b9   :  { %10511 = vmatprep.subr.bf16.mxu1 %v14895_v60  ;;  %v8773_v63 = vpop.f32.mrb[15].mxu0 }
 0x2ba   :  { %v8774_v28 = vadd.f32 %v8773_v63, %v8772_v38 }
 0x2bb   :  { %10473 = vmatpush3.bf16.msra.mxu0 %v10472_v54 }
 0x2bc   :  { %10513 = vmatpush3.bf16.msra.mxu1 %v14902_v44  ;;  %10475 = vmatprep.subr.bf16.mxu0 %v10474_v61  ;;  %v5566_v43 = vadd.f32 %v8774_v28, %v5454_v45 }
 0x2bd   :  { %10515 = vmatprep.subr.bf16.mxu1 %v14912_v51 }
 0x2be   :  { %v5798_v53 = vadd.f32 %v8809_v0, %v5566_v43  ;;  %v16108_v0 = vld [vmem:[#allocation32_spill] sm:$0xff] }
 0x2bf   :  { %10477 = vmatpush3.bf16.msra.mxu0 %v10476_v1 }
 0x2c0   :  { %10517 = vmatpush3.bf16.msra.mxu1 %v14920_v39  ;;  %10479 = vmatprep.subr.bf16.mxu0 %v10478_v4 }
 0x2c1   :  { %10551 = vmatprep.subr.bf16.mxu1 %v14740_v8  ;;  %v16095_v8 = vld [vmem:[#allocation66_spill] sm:$0xff] }
 0x2c3   :  { %7766 = vmatmul.mubr.f32.vlgmr.msra.gmra.mrb[30].mxu1 %v7285_v50  ;;  %10481 = vmatpush3.bf16.msra.mxu0 %v10480_v37 }
 0x2c4   :  { %10553 = vmatpush3.bf16.msra.mxu1 %v14767_v57  ;;  %8036 = vmatprep.mubr.f32.mxu1 %v16093_v6  ;;  %v16096_v57 = vld [vmem:[#allocation22_spill] sm:$0xff] }
 0x2c5   :  { %10483 = vmatprep.subr.bf16.mxu0 %v10482_v47  ;;  %10555 = vmatprep.subr.bf16.mxu1 %v14774_v15  ;;  %v16097_v15 = vld [vmem:[#allocation21_spill] sm:$0xff] }
 0x2c7   :  { %10485 = vmatpush3.bf16.msra.mxu0 %v10484_v2 }
 0x2c8   :  { %10557 = vmatpush3.bf16.msra.mxu1 %v14794_v22  ;;  %10519 = vmatprep.subr.bf16.mxu0 %v16094_v31  ;;  %v16098_v22 = vld [vmem:[#allocation16_spill] sm:$0xff] }
 0x2c9   :  { %10559 = vmatprep.subr.bf16.mxu1 %v14808_v11  ;;  %v8044_v11 = vld [vmem:[%s15056_s7] sm:$0xff] }
 0x2ca   :  { %7658 = vmatmul.mubr.f32.vlgmr.msra.gmra.mrb[28].mxu0 %v14888_v52  ;;  %v8045_v52 = vld [vmem:[%s15056_s7 + $0x8] sm:$0xff]  ;;  %v8051_v50 = vand.u32 4294901760, %v8044_v11 }
 0x2cb   :  { %10521 = vmatpush3.bf16.msra.mxu0 %v16095_v8  ;;  %7932 = vmatprep.mubr.f32.mxu0 %v16093_v6 }
 0x2cc   :  { %10561 = vmatpush3.bf16.msra.mxu1 %v14820_v17  ;;  %10523 = vmatprep.subr.bf16.mxu0 %v16096_v57  ;;  %v16099_v17 = vld [vmem:[#allocation67_spill] sm:$0xff] }
 0x2cd   :  { %10563 = vmatprep.subr.bf16.mxu1 %v14827_v41  ;;  %v8054_v41 = vand.u32 4294901760, %v8045_v52 }
 0x2cf   :  { %10525 = vmatpush3.bf16.msra.mxu0 %v16097_v15  ;;  %v8136_v23 = vsub.f32 %v8045_v52, %v8054_v41 }
 0x2d0   :  { %10565 = vmatpush3.bf16.msra.mxu1 %v14847_v36  ;;  %10527 = vmatprep.subr.bf16.mxu0 %v16098_v22  ;;  %v36_v36 = vld [vmem:[%s15057_s2] sm:$0xff]  ;;  %v8877_v10 = vpop.f32.mrb[18].mxu1 }
 0x2d1   :  { %10567 = vmatprep.subr.bf16.mxu1 %v14853_v18  ;;  %v8048_v9 = vsel %vm8046_vm1, %v36_v36, 0  ;;  %v8878_v26 = vpop.f32.mrb[19].mxu1  ;;  %v8129_v18 = vsub.f32 %v8044_v11, %v8051_v50 }
 0x2d2   :  { %v8879_v40 = vadd.f32 %v8878_v26, %v8877_v10  ;;  %v15013_v58 = vand.u32 4294901760, %v8048_v9 }
 0x2d3   :  { %10529 = vmatpush3.bf16.msra.mxu0 %v16099_v17  ;;  %v8130_v45 = vand.u32 4294901760, %v8129_v18  ;;  %v10589_v20 = vpack.c.bf16 %v8136_v23, %v8129_v18 }
 0x2d4   :  { %10569 = vmatpush3.bf16.msra.mxu1 %v14870_v21  ;;  %10531 = vmatprep.subr.bf16.mxu0 %v16100_v48  ;;  %v16103_v21 = vld [vmem:[#allocation82_spill] sm:$0xff]  ;;  %v8118_v62 = vsub.f32 %v8048_v9, %v15013_v58 }
 0x2d5   :  { %10571 = vmatprep.subr.bf16.mxu1 %v14876_v3  ;;  %v8137_v3 = vand.u32 4294901760, %v8136_v23 }
 0x2d7   :  { %10533 = vmatpush3.bf16.msra.mxu0 %v16101_v5  ;;  %v8138_v59 = vsub.f32 %v8136_v23, %v8137_v3  ;;  %v10595_v38 = vpack.c.bf16 %v8137_v3, %v8130_v45  ;;  %v14_v23 = vstv %s15058_s8 }
 0x2d8   :  { %10573 = vmatpush3.bf16.msra.mxu1 %v14884_v32  ;;  %10535 = vmatprep.subr.bf16.mxu0 %v16102_v27  ;;  %v8842_v55 = vpop.f32.mrb[16].mxu0  ;;  %v8119_v32 = vand.u32 4294901760, %v8118_v62  ;;  %15 = vst [vmem:[#allocation2] sm:$0x1] %v14_v23 }
 0x2d9   :  { %10575 = vmatprep.subr.bf16.mxu1 %v14895_v60  ;;  %v8843_v42 = vpop.f32.mrb[17].mxu0  ;;  %v8131_v60 = vsub.f32 %v8129_v18, %v8130_v45  ;;  %v8139_v33 = vand.u32 4294901760, %v8138_v59 }
 0x2da   :  { %v8844_v49 = vadd.f32 %v8843_v42, %v8842_v55  ;;  %v8120_v24 = vsub.f32 %v8118_v62, %v8119_v32 }
 0x2db   :  { %10537 = vmatpush3.bf16.msra.mxu0 %v16103_v21 }
 0x2dc   :  { %10577 = vmatpush3.bf16.msra.mxu1 %v14902_v44  ;;  %10539 = vmatprep.subr.bf16.mxu0 %v16104_v12  ;;  %v5936_v46 = vadd.f32 %v8844_v49, %v5798_v53  ;;  %v10583_v44 = vpack.c.bf16 %v8054_v41, %v8051_v50  ;;  %v8121_v54 = vand.u32 4294901760, %v8120_v24 }
 0x2dd   :  { %10579 = vmatprep.subr.bf16.mxu1 %v14912_v51  ;;  %v8132_v51 = vand.u32 4294901760, %v8131_v60 }
 0x2de   :  { %v6044_v13 = vadd.f32 %v8879_v40, %v5936_v46 }
 0x2df   :  { %10541 = vmatpush3.bf16.msra.mxu0 %v16105_v35  ;;  %v10586_v61 = vpack.c.bf16 %v8139_v33, %v8132_v51 }
 0x2e0   :  { %10581 = vmatpush3.bf16.msra.mxu1 %v14920_v39  ;;  %10543 = vmatprep.subr.bf16.mxu0 %v16106_v34  ;;  %v16110_v39 = vld [vmem:[#allocation18_spill] sm:$0xff] }
 0x2e1   :  { %10582 = vmatprep.subr.bf16.mxu1 %v10695_v29 }
 0x2e3   :  { %8038 = vmatmul.mubr.f32.vlgmr.msra.gmra.mrb[32].mxu1 %v14863_v56  ;;  %10545 = vmatpush3.bf16.msra.mxu0 %v16107_v25 }
 0x2e4   :  { %10547 = vmatprep.subr.bf16.mxu0 %v16108_v0  ;;  %10584 = vmatpush3.bf16.msra.mxu1 %v10583_v44 }
 0x2e5   :  { %9392 = vmatprep.mubr.msk.f32.mxu1 %vm10696_vm2, %v16109_v19 }
 0x2e7   :  { %10549 = vmatpush3.bf16.msra.mxu0 %v16110_v39  ;;  %9393 = vmatmul.mubr.f32.vlgmr.msra.gmra.mrb[34].mxu1 %v8121_v54 }
 0x2e8   :  { %10585 = vmatprep.subr.bf16.mxu0 %v10695_v29 }
 0x2ea   :  { %7934 = vmatmul.mubr.f32.vlgmr.msra.gmra.mrb[30].mxu0 %v14863_v56 }
 0x2eb   :  { %10587 = vmatpush3.bf16.msra.mxu0 %v10586_v61  ;;  %9399 = vmatprep.mubr.msk.f32.mxu0 %vm10696_vm2, %v16109_v19 }
 0x2ec   :  { %10588 = vmatprep.subr.bf16.mxu0 %v10695_v29 }
 0x2ee   :  { %9400 = vmatmul.mubr.f32.vlgmr.msra.gmra.mrb[32].mxu0 %v15013_v58 }
 0x2ef   :  { %10590 = vmatpush3.bf16.msra.mxu0 %v10589_v20  ;;  %9406 = vmatprep.mubr.msk.f32.mxu0 %vm10696_vm2, %v16109_v19 }
 0x2f0   :  { %10591 = vmatprep.subr.bf16.mxu0 %v10695_v29 }
 0x2f1   :  { %v8947_v1 = vpop.f32.mrb[20].mxu1 }
 0x2f2   :  { %v8948_v4 = vpop.f32.mrb[21].mxu1 }
 0x2f3   :  { %v8949_v56 = vadd.f32 %v8948_v4, %v8947_v1 }
 0x2f6   :  { %9407 = vmatmul.mubr.f32.vlgmr.msra.gmra.mrb[32].mxu0 %v8118_v62 }
 0x2f7   :  { %10593 = vmatpush3.bf16.msra.mxu0 %v10583_v44  ;;  %9413 = vmatprep.mubr.msk.f32.mxu0 %vm10696_vm2, %v16109_v19 }
 0x2f8   :  { %10594 = vmatprep.subr.bf16.mxu0 %v10695_v29  ;;  %v8912_v63 = vpop.f32.mrb[18].mxu0 }
 0x2f9   :  { %v8913_v28 = vpop.f32.mrb[19].mxu0 }
 0x2fa   :  { %v8914_v37 = vadd.f32 %v8913_v28, %v8912_v63 }
 0x2fc   :  { %v6212_v43 = vadd.f32 %v8914_v37, %v6044_v13 }
 0x2fe   :  { %9414 = vmatmul.mubr.f32.vlgmr.msra.gmra.mrb[32].mxu0 %v8119_v32  ;;  %v6316_v16 = vadd.f32 %v8949_v56, %v6212_v43  ;;  %v8529_v56 = vld [vmem:[#allocation2] ss:$0 sm:$0xff] }
 0x2ff   :  { %10596 = vmatpush3.bf16.msra.mxu0 %v10595_v38  ;;  %9420 = vmatprep.mubr.msk.f32.mxu0 %vm10696_vm2, %v16109_v19 }
 0x300   :  { %10597 = vmatprep.subr.bf16.mxu0 %v10695_v29 }
 0x306   :  { %9421 = vmatmul.mubr.f32.vlgmr.msra.gmra.mrb[32].mxu0 %v15013_v58 }
 0x307   :  { %10599 = vmatpush3.bf16.msra.mxu0 %v10583_v44  ;;  %9427 = vmatprep.mubr.msk.f32.mxu0 %vm10696_vm2, %v16109_v19 }
 0x30e   :  { %9428 = vmatmul.mubr.f32.vlgmr.msra.gmra.mrb[32].mxu0 %v15013_v58 }
 0x311   :  { %v9017_v14 = vpop.f32.mrb[22].mxu1 }
 0x312   :  { %v9018_v47 = vpop.f32.mrb[23].mxu1 }
 0x313   :  { %v9019_v30 = vadd.f32 %v9018_v47, %v9017_v14 }
 0x31b   :  { %v8982_v7 = vpop.f32.mrb[20].mxu0 }
 0x31c   :  { %v8983_v2 = vpop.f32.mrb[21].mxu0 }
 0x31d   :  { %v8984_v53 = vadd.f32 %v8983_v2, %v8982_v7 }
 0x31f   :  { %v6428_v6 = vadd.f32 %v8984_v53, %v6316_v16 }
 0x321   :  { %v6660_v31 = vadd.f32 %v9019_v30, %v6428_v6 }
 0x336   :  { %v9087_v8 = vpop.f32.mrb[24].mxu1 }
 0x337   :  { %v9088_v57 = vpop.f32.mrb[25].mxu1 }
 0x338   :  { %v9089_v15 = vadd.f32 %v9088_v57, %v9087_v8 }
 0x33b   :  { %v9052_v22 = vpop.f32.mrb[22].mxu0 }
 0x33c   :  { %v9053_v11 = vpop.f32.mrb[23].mxu0 }
 0x33d   :  { %v9054_v52 = vadd.f32 %v9053_v11, %v9052_v22 }
 0x33f   :  { %v6798_v17 = vadd.f32 %v9054_v52, %v6660_v31 }
 0x341   :  { %v6906_v50 = vadd.f32 %v9089_v15, %v6798_v17 }
 0x356   :  { %v9157_v41 = vpop.f32.mrb[26].mxu1 }
 0x357   :  { %v9158_v36 = vpop.f32.mrb[27].mxu1 }
 0x358   :  { %v9159_v48 = vadd.f32 %v9158_v36, %v9157_v41 }
 0x35c   :  { %v9122_v10 = vpop.f32.mrb[24].mxu0 }
 0x35d   :  { %v9123_v9 = vpop.f32.mrb[25].mxu0 }
 0x35e   :  { %v9124_v26 = vadd.f32 %v9123_v9, %v9122_v10 }
 0x360   :  { %v7074_v5 = vadd.f32 %v9124_v26, %v6906_v50 }
 0x362   :  { %v7178_v18 = vadd.f32 %v9159_v48, %v7074_v5 }
 0x376   :  { %v9227_v40 = vpop.f32.mrb[28].mxu1 }
 0x377   :  { %v9228_v27 = vpop.f32.mrb[29].mxu1 }
 0x378   :  { %v9229_v58 = vadd.f32 %v9228_v27, %v9227_v40 }
 0x37d   :  { %v9192_v21 = vpop.f32.mrb[26].mxu0 }
 0x37e   :  { %v9193_v45 = vpop.f32.mrb[27].mxu0 }
 0x37f   :  { %v9194_v3 = vadd.f32 %v9193_v45, %v9192_v21 }
 0x381   :  { %v7290_v62 = vadd.f32 %v9194_v3, %v7178_v18 }
 0x383   :  { %v7522_v12 = vadd.f32 %v9229_v58, %v7290_v62 }
 0x396   :  { %v9297_v55 = vpop.f32.mrb[30].mxu1 }
 0x397   :  { %v9298_v32 = vpop.f32.mrb[31].mxu1 }
 0x398   :  { %v9299_v42 = vadd.f32 %v9298_v32, %v9297_v55 }
 0x39d   :  { %v9262_v49 = vpop.f32.mrb[28].mxu0 }
 0x39e   :  { %v9263_v35 = vpop.f32.mrb[29].mxu0 }
 0x39f   :  { %v9264_v60 = vadd.f32 %v9263_v35, %v9262_v49 }
 0x3a1   :  { %v7660_v59 = vadd.f32 %v9264_v60, %v7522_v12 }
 0x3a3   :  { %v7768_v24 = vadd.f32 %v9299_v42, %v7660_v59 }
 0x3b6   :  { %v9367_v34 = vpop.f32.mrb[32].mxu1 }
 0x3b7   :  { %v9368_v46 = vpop.f32.mrb[33].mxu1 }
 0x3b8   :  { %v9369_v29 = vadd.f32 %v9368_v46, %v9367_v34 }
 0x3ba   :  { %v8123_v44 = vpop.f32.mrb[34].mxu1 }
 0x3bb   :  { %v9394_v25 = vpop.f32.mrb[35].mxu1 }
 0x3bd   :  { %v9332_v51 = vpop.f32.mrb[30].mxu0 }
 0x3be   :  { %v9333_v33 = vpop.f32.mrb[31].mxu0 }
 0x3bf   :  { %v9334_v13 = vadd.f32 %v9333_v33, %v9332_v51 }
 0x3c1   :  { %v7936_v54 = vadd.f32 %v9334_v13, %v7768_v24 }
 0x3c3   :  { %v8040_v0 = vadd.f32 %v9369_v29, %v7936_v54 }
 0x3c5   :  { %v8043_v20 = vmax.f32 %v8040_v0, 0.0 }
 0x3e1   :  { %v8505_v19 = vpop.f32.mrb[32].mxu0 }
 0x3e2   :  { %v10602_v39 = vadd.f32 %v8505_v19, %v8123_v44  ;;  %v9429_v61 = vpop.f32.mrb[33].mxu0 }
 0x3e4   :  { %v8509_v1 = vmul.f32 %v10602_v39, %v8043_v20 }
 0x3e6   :  { %v8510_v4 = vsel %vm69_vm0, %v8509_v1, 0.0 }
 0x3e7   :  { %8511 = vadd.xlane.f32.xlu0 %v8510_v4 }
 0x474   :  { %v8512_v38 = vpop.xlane.xlu0 %8511 }
 0x475   :  { %v8520_v63 = vadd.f32 %v8529_v56, %v8512_v38 }
 0x477   :  { %10692 = vtanh.f32 %v8520_v63 }
 0x481   :  { %v10693_v28 = vpop.eup %10692 }
 0x482   :  { %8523 = vst.msk [vmem:[%s15059_s9] sm:$0xff] %vm8522_vm3, %v10693_v28 }

</bundles_post_ra>
